<compile_context>
chip_gen: v7x
topology: tpu7x:2x2x1
jax: 0.10.0
libtpu: 0.0.40
codegen_flags: <defaults>
</compile_context>

<pallas_src>
import jax
import jax.numpy as jnp
from jax import lax
from jax.experimental import pallas as pl
from jax.experimental.pallas import tpu as pltpu

# ----------------------- module hyper-parameters -----------------------------
DIM = 8                      # input channels (dim)
HEADS = 4
DIM_HEAD = 32
HIDDEN = HEADS * DIM_HEAD    # 128
SCALE = DIM_HEAD ** (-0.5)

B, H, W = 2, 8, 8            # batch / spatial
N = H * W                    # flattened sequence length (64)

# dot_general dimension numbers (MXU-native NN / NT forms)
NN = (((1,), (0,)), ((), ()))   # lhs[m,k] @ rhs[k,n]
NT = (((1,), (1,)), ((), ()))   # lhs[m,k] @ rhs[n,k]^T   (no explicit .T)


# ------------------------------ kernel ---------------------------------------
def attention_kernel(x_ref, wqkv_ref, wout_ref, bout_ref, o_ref, qkv_scr):
    # x_ref    : [bb, DIM, N]        channels-first activations
    # wqkv_ref : [3*HIDDEN, DIM]     native conv weight layout (no transpose)
    # wout_ref : [DIM, HIDDEN]       native conv weight layout
    # bout_ref : [DIM, 1]            output-proj bias
    # o_ref    : [bb, DIM, N]        channels-first output
    # qkv_scr  : VMEM [bb, 3*HIDDEN, N] f32 staging buffer (channels on sublanes)
    bb = x_ref.shape[0]

    # --- load params once; fold softmax SCALE into the q rows of W_qkv -------
    w_q = wqkv_ref[0:HIDDEN, :].astype(jnp.float32) * SCALE        # [128, DIM]
    w_kv = wqkv_ref[HIDDEN:, :].astype(jnp.float32)                # [256, DIM]
    w_qkv = jnp.concatenate([w_q, w_kv], axis=0)                   # [384, DIM]
    w_out = wout_ref[...].astype(jnp.float32)                      # [DIM, 128]
    b_out = bout_ref[...].astype(jnp.float32)                      # [DIM, 1]

    # --- QKV projection straight into the transposed layout ------------------
    #   qkv[c_out, n] = sum_c w_qkv[c_out, c] * x[c, n]     (plain NN matmul,
    #   M=384 per batch, no activation transpose, sublane-aligned head slabs)
    for b in range(bb):
        qkv_scr[b] = lax.dot_general(
            w_qkv, x_ref[b].astype(jnp.float32), NN,
            preferred_element_type=jnp.float32)                    # [384, N]

    # --- per (batch, head) attention + fused K=128 output projection ---------
    for b in range(bb):
        head_outs = []
        for h in range(HEADS):
            lo = h * DIM_HEAD
            # Sublane-tile-aligned row slices (channels on sublanes, already
            # scaled q) — no lane sub-tile slicing anywhere.
            qh = qkv_scr[b, 0 * HIDDEN + lo:0 * HIDDEN + lo + DIM_HEAD, :]  # [D, N]
            kh = qkv_scr[b, 1 * HIDDEN + lo:1 * HIDDEN + lo + DIM_HEAD, :]  # [D, N]
            vh = qkv_scr[b, 2 * HIDDEN + lo:2 * HIDDEN + lo + DIM_HEAD, :]  # [D, N]

            # sim[i, j] = sum_d q[d, i] * k[d, j]
            sim = jnp.dot(qh.T, kh, preferred_element_type=jnp.float32)     # [N, N]
            sim = sim - jnp.max(sim, axis=-1, keepdims=True)
            p = jnp.exp(sim)
            attn = p / jnp.sum(p, axis=-1, keepdims=True)   # exact divide (tiny)

            # out_t[d, i] = sum_j v[d, j] * attn[i, j]   (NT form, no transpose)
            head_outs.append(lax.dot_general(
                vh, attn, NT, preferred_element_type=jnp.float32))          # [D, N]

        # Channel-major head outputs stack along sublanes in (h d) order —
        # a free sublane concatenation, enabling ONE K=128 output projection.
        out_all = jnp.concatenate(head_outs, axis=0)                # [HIDDEN, N]
        y = lax.dot_general(w_out, out_all, NN,
                            preferred_element_type=jnp.float32)     # [DIM, N]
        o_ref[b] = (y + b_out).astype(o_ref.dtype)


# ------------------------------ wrapper ---------------------------------------
@jax.jit
def attention_pallas(x_nchw, w_qkv, w_out, b_out):
    """x_nchw: [B, DIM, H, W] (NCHW).  Conv weights in PyTorch layout."""
    b, c, hh, ww = x_nchw.shape
    n = hh * ww
    hidden = w_out.shape[1]

    # Free reshapes only — no wrapper-side activation or weight transposes.
    x_cn = x_nchw.reshape(b, c, n)            # [B, DIM, N] (stays channels-first)
    wqkv_mat = w_qkv.reshape(3 * hidden, c)   # [3*HIDDEN, DIM]  native layout
    wout_mat = w_out.reshape(c, hidden)       # [DIM, HIDDEN]    native layout
    bout_mat = b_out.reshape(c, 1)            # [DIM, 1]

    # Single grid step: the whole problem fits in < 1 MiB of VMEM and the
    # kernel is launch/latency bound, so per-step grid overhead (and any
    # megacore split on 2-TC chips) does not pay off.
    out_cn = pl.pallas_call(
        attention_kernel,
        out_shape=jax.ShapeDtypeStruct((b, c, n), x_nchw.dtype),
        grid=(1,),
        in_specs=[
            pl.BlockSpec((b, c, n), lambda i: (0, 0, 0)),
            pl.BlockSpec((3 * hidden, c), lambda i: (0, 0)),
            pl.BlockSpec((c, hidden), lambda i: (0, 0)),
            pl.BlockSpec((c, 1), lambda i: (0, 0)),
        ],
        out_specs=pl.BlockSpec((b, c, n), lambda i: (0, 0, 0)),
        scratch_shapes=[pltpu.VMEM((b, 3 * hidden, n), jnp.float32)],
        compiler_params=pltpu.CompilerParams(
            dimension_semantics=("arbitrary",)),
    )(x_cn, wqkv_mat, wout_mat, bout_mat)

    return out_cn.reshape(b, c, hh, ww)       # free reshape back to NCHW


# --------------------------- pure-JAX reference -------------------------------
def attention_reference(x_nchw, w_qkv, w_out, b_out):
    b, c, hh, ww = x_nchw.shape
    n = hh * ww
    x_flat = jnp.transpose(x_nchw, (0, 2, 3, 1)).reshape(b, n, c)
    qkv = x_flat @ jnp.transpose(w_qkv[:, :, 0, 0], (1, 0))          # [B, N, 3*HIDDEN]
    q, k, v = jnp.split(qkv, 3, axis=-1)

    def split_heads(t):  # [B, N, HIDDEN] -> [B, heads, N, D]
        return jnp.transpose(t.reshape(b, n, HEADS, DIM_HEAD), (0, 2, 1, 3))

    q, k, v = map(split_heads, (q, k, v))
    q = q * SCALE
    sim = jnp.einsum('bhid,bhjd->bhij', q, k)
    sim = sim - jnp.max(sim, axis=-1, keepdims=True)
    attn = jax.nn.softmax(sim, axis=-1)
    out = jnp.einsum('bhij,bhjd->bhid', attn, v)                     # [B, heads, N, D]
    out = jnp.transpose(out, (0, 2, 1, 3)).reshape(b, n, HIDDEN)     # (h d) channel order
    y = out @ jnp.transpose(w_out[:, :, 0, 0], (1, 0)) + b_out[None, None, :]
    return jnp.transpose(y.reshape(b, hh, ww, c), (0, 3, 1, 2))


# --------------------------------- main ---------------------------------------
if __name__ == "__main__":
    key = jax.random.PRNGKey(0)
    kx, kq, ko, kb = jax.random.split(key, 4)

    x = jax.random.normal(kx, (B, DIM, H, W), dtype=jnp.float32)
    # deterministic synthetic parameters (same shapes as the nn.Conv2d weights)
    w_qkv = jax.random.normal(kq, (3 * HIDDEN, DIM, 1, 1), dtype=jnp.float32) * 0.05
    w_out = jax.random.normal(ko, (DIM, HIDDEN, 1, 1), dtype=jnp.float32) * 0.05
    b_out = jax.random.normal(kb, (DIM,), dtype=jnp.float32) * 0.05

    out = attention_pallas(x, w_qkv, w_out, b_out)
    out = jax.block_until_ready(out)

    ref = attention_reference(x, w_qkv, w_out, b_out)
    assert out.shape == (B, DIM, H, W)
    # Exact softmax divide now; remaining difference is MXU f32 matmul rounding
    # vs the XLA einsum reference, well inside this tolerance.
    assert jnp.allclose(out, ref, atol=2e-3, rtol=2e-3), \
        f"max abs diff = {jnp.max(jnp.abs(out - ref))}"

    print("KERNEL_OK")
</pallas_src>

<mosaic_0001>
module attributes {stable_mosaic.version = 11 : i64} {
  func.func @attention_kernel(%arg0: i32, %arg1: memref<2x8x64xf32, #tpu.memory_space<vmem>>, %arg2: memref<384x8xf32, #tpu.memory_space<vmem>>, %arg3: memref<8x128xf32, #tpu.memory_space<vmem>>, %arg4: memref<8x1xf32, #tpu.memory_space<vmem>>, %arg5: memref<2x8x64xf32, #tpu.memory_space<vmem>>, %arg6: memref<2x384x64xf32, #tpu.memory_space<vmem>>) attributes {dimension_semantics = [#tpu.dimension_semantics<arbitrary>], iteration_bounds = array<i64: 1>, scalar_prefetch = 0 : i64, scratch_operands = 1 : i64, tpu.core_type = #tpu.core_type<tc>, window_params = [{pipeline_mode = #tpu.pipeline_mode<synchronous>, transform_indices = @transform_0, window_bounds = array<i64: 2, 8, 64>}, {pipeline_mode = #tpu.pipeline_mode<synchronous>, transform_indices = @transform_1, window_bounds = array<i64: 384, 8>}, {pipeline_mode = #tpu.pipeline_mode<synchronous>, transform_indices = @transform_2, window_bounds = array<i64: 8, 128>}, {pipeline_mode = #tpu.pipeline_mode<synchronous>, transform_indices = @transform_3, window_bounds = array<i64: 8, 1>}, {pipeline_mode = #tpu.pipeline_mode<synchronous>, transform_indices = @transform_4, window_bounds = array<i64: 2, 8, 64>}]} {
    %c0 = arith.constant 0 : index
    %c0_0 = arith.constant 0 : index
    %0 = vector.load %arg2[%c0, %c0_0] : memref<384x8xf32, #tpu.memory_space<vmem>>, vector<128x8xf32>
    %cst = arith.constant 0.176776692 : f32
    %1 = vector.broadcast %cst : f32 to vector<128x8xf32>
    %2 = arith.mulf %0, %1 : vector<128x8xf32>
    %c128 = arith.constant 128 : index
    %c0_1 = arith.constant 0 : index
    %3 = vector.load %arg2[%c128, %c0_1] : memref<384x8xf32, #tpu.memory_space<vmem>>, vector<256x8xf32>
    %4 = tpu.concatenate %2, %3 in 0 : vector<128x8xf32>, vector<256x8xf32> -> vector<384x8xf32>
    %c0_2 = arith.constant 0 : index
    %c0_3 = arith.constant 0 : index
    %5 = vector.load %arg3[%c0_2, %c0_3] : memref<8x128xf32, #tpu.memory_space<vmem>>, vector<8x128xf32>
    %c0_4 = arith.constant 0 : index
    %c0_5 = arith.constant 0 : index
    %6 = vector.load %arg4[%c0_4, %c0_5] : memref<8x1xf32, #tpu.memory_space<vmem>>, vector<8x1xf32>
    %c0_6 = arith.constant 0 : index
    %c0_7 = arith.constant 0 : index
    %c0_8 = arith.constant 0 : index
    %7 = vector.load %arg1[%c0_6, %c0_7, %c0_8] : memref<2x8x64xf32, #tpu.memory_space<vmem>>, vector<1x8x64xf32>
    %8 = vector.shape_cast %7 : vector<1x8x64xf32> to vector<8x64xf32>
    %cst_9 = arith.constant dense<0.000000e+00> : vector<384x64xf32>
    %9 = tpu.matmul %4, %8, %cst_9 {dimension_numbers = #tpu.dot_dimension_numbers<[1], [0], [0], [1], [0, 0, 1, 1], [], []>} : vector<384x8xf32>, vector<8x64xf32>, vector<384x64xf32> -> vector<384x64xf32>
    %c0_10 = arith.constant 0 : index
    %c0_11 = arith.constant 0 : index
    %c0_12 = arith.constant 0 : index
    %10 = vector.load %arg6[%c0_10, %c0_11, %c0_12] : memref<2x384x64xf32, #tpu.memory_space<vmem>>, vector<1x384x64xf32>
    %11 = vector.shape_cast %10 : vector<1x384x64xf32> to vector<384x64xf32>
    %12 = vector.shape_cast %9 : vector<384x64xf32> to vector<1x384x64xf32>
    tpu.vector_store %arg6[%c0_10, %c0_11, %c0_12], %12 {strides = array<i32>} : memref<2x384x64xf32, #tpu.memory_space<vmem>>, vector<1x384x64xf32>,
    %c1 = arith.constant 1 : index
    %c0_13 = arith.constant 0 : index
    %c0_14 = arith.constant 0 : index
    %13 = vector.load %arg1[%c1, %c0_13, %c0_14] : memref<2x8x64xf32, #tpu.memory_space<vmem>>, vector<1x8x64xf32>
    %14 = vector.shape_cast %13 : vector<1x8x64xf32> to vector<8x64xf32>
    %cst_15 = arith.constant dense<0.000000e+00> : vector<384x64xf32>
    %15 = tpu.matmul %4, %14, %cst_15 {dimension_numbers = #tpu.dot_dimension_numbers<[1], [0], [0], [1], [0, 0, 1, 1], [], []>} : vector<384x8xf32>, vector<8x64xf32>, vector<384x64xf32> -> vector<384x64xf32>
    %c1_16 = arith.constant 1 : index
    %c0_17 = arith.constant 0 : index
    %c0_18 = arith.constant 0 : index
    %16 = vector.load %arg6[%c1_16, %c0_17, %c0_18] : memref<2x384x64xf32, #tpu.memory_space<vmem>>, vector<1x384x64xf32>
    %17 = vector.shape_cast %16 : vector<1x384x64xf32> to vector<384x64xf32>
    %18 = vector.shape_cast %15 : vector<384x64xf32> to vector<1x384x64xf32>
    tpu.vector_store %arg6[%c1_16, %c0_17, %c0_18], %18 {strides = array<i32>} : memref<2x384x64xf32, #tpu.memory_space<vmem>>, vector<1x384x64xf32>,
    %c0_19 = arith.constant 0 : index
    %c0_20 = arith.constant 0 : index
    %c0_21 = arith.constant 0 : index
    %19 = vector.load %arg6[%c0_19, %c0_20, %c0_21] : memref<2x384x64xf32, #tpu.memory_space<vmem>>, vector<1x32x64xf32>
    %20 = vector.shape_cast %19 : vector<1x32x64xf32> to vector<32x64xf32>
    %c0_22 = arith.constant 0 : index
    %c128_23 = arith.constant 128 : index
    %c0_24 = arith.constant 0 : index
    %21 = vector.load %arg6[%c0_22, %c128_23, %c0_24] : memref<2x384x64xf32, #tpu.memory_space<vmem>>, vector<1x32x64xf32>
    %22 = vector.shape_cast %21 : vector<1x32x64xf32> to vector<32x64xf32>
    %c0_25 = arith.constant 0 : index
    %c256 = arith.constant 256 : index
    %c0_26 = arith.constant 0 : index
    %23 = vector.load %arg6[%c0_25, %c256, %c0_26] : memref<2x384x64xf32, #tpu.memory_space<vmem>>, vector<1x32x64xf32>
    %24 = vector.shape_cast %23 : vector<1x32x64xf32> to vector<32x64xf32>
    %25 = tpu.transpose %20, [1, 0] : vector<32x64xf32> -> vector<64x32xf32>
    %cst_27 = arith.constant dense<0.000000e+00> : vector<64x64xf32>
    %26 = tpu.matmul %25, %22, %cst_27 {dimension_numbers = #tpu.dot_dimension_numbers<[1], [0], [0], [1], [0, 0, 1, 1], [], []>} : vector<64x32xf32>, vector<32x64xf32>, vector<64x64xf32> -> vector<64x64xf32>
    %cst_28 = arith.constant dense<0xFF800000> : vector<64xf32>
    %27 = vector.multi_reduction <maximumf>, %26, %cst_28 [1] : vector<64x64xf32> to vector<64xf32>
    %28 = vector.shape_cast %27 : vector<64xf32> to vector<64x1xf32>
    %29 = vector.broadcast %28 : vector<64x1xf32> to vector<64x64xf32>
    %30 = arith.subf %26, %29 : vector<64x64xf32>
    %31 = math.exp %30 : vector<64x64xf32>
    %cst_29 = arith.constant dense<0.000000e+00> : vector<64xf32>
    %32 = vector.multi_reduction <add>, %31, %cst_29 [1] : vector<64x64xf32> to vector<64xf32>
    %33 = vector.shape_cast %32 : vector<64xf32> to vector<64x1xf32>
    %34 = vector.broadcast %33 : vector<64x1xf32> to vector<64x64xf32>
    %35 = arith.divf %31, %34 : vector<64x64xf32>
    %cst_30 = arith.constant dense<0.000000e+00> : vector<32x64xf32>
    %36 = tpu.matmul %24, %35, %cst_30 {dimension_numbers = #tpu.dot_dimension_numbers<[1], [1], [0], [0], [0, 0, 1, 0], [], []>} : vector<32x64xf32>, vector<64x64xf32>, vector<32x64xf32> -> vector<32x64xf32>
    %c0_31 = arith.constant 0 : index
    %c32 = arith.constant 32 : index
    %c0_32 = arith.constant 0 : index
    %37 = vector.load %arg6[%c0_31, %c32, %c0_32] : memref<2x384x64xf32, #tpu.memory_space<vmem>>, vector<1x32x64xf32>
    %38 = vector.shape_cast %37 : vector<1x32x64xf32> to vector<32x64xf32>
    %c0_33 = arith.constant 0 : index
    %c160 = arith.constant 160 : index
    %c0_34 = arith.constant 0 : index
    %39 = vector.load %arg6[%c0_33, %c160, %c0_34] : memref<2x384x64xf32, #tpu.memory_space<vmem>>, vector<1x32x64xf32>
    %40 = vector.shape_cast %39 : vector<1x32x64xf32> to vector<32x64xf32>
    %c0_35 = arith.constant 0 : index
    %c288 = arith.constant 288 : index
    %c0_36 = arith.constant 0 : index
    %41 = vector.load %arg6[%c0_35, %c288, %c0_36] : memref<2x384x64xf32, #tpu.memory_space<vmem>>, vector<1x32x64xf32>
    %42 = vector.shape_cast %41 : vector<1x32x64xf32> to vector<32x64xf32>
    %43 = tpu.transpose %38, [1, 0] : vector<32x64xf32> -> vector<64x32xf32>
    %cst_37 = arith.constant dense<0.000000e+00> : vector<64x64xf32>
    %44 = tpu.matmul %43, %40, %cst_37 {dimension_numbers = #tpu.dot_dimension_numbers<[1], [0], [0], [1], [0, 0, 1, 1], [], []>} : vector<64x32xf32>, vector<32x64xf32>, vector<64x64xf32> -> vector<64x64xf32>
    %cst_38 = arith.constant dense<0xFF800000> : vector<64xf32>
    %45 = vector.multi_reduction <maximumf>, %44, %cst_38 [1] : vector<64x64xf32> to vector<64xf32>
    %46 = vector.shape_cast %45 : vector<64xf32> to vector<64x1xf32>
    %47 = vector.broadcast %46 : vector<64x1xf32> to vector<64x64xf32>
    %48 = arith.subf %44, %47 : vector<64x64xf32>
    %49 = math.exp %48 : vector<64x64xf32>
    %cst_39 = arith.constant dense<0.000000e+00> : vector<64xf32>
    %50 = vector.multi_reduction <add>, %49, %cst_39 [1] : vector<64x64xf32> to vector<64xf32>
    %51 = vector.shape_cast %50 : vector<64xf32> to vector<64x1xf32>
    %52 = vector.broadcast %51 : vector<64x1xf32> to vector<64x64xf32>
    %53 = arith.divf %49, %52 : vector<64x64xf32>
    %cst_40 = arith.constant dense<0.000000e+00> : vector<32x64xf32>
    %54 = tpu.matmul %42, %53, %cst_40 {dimension_numbers = #tpu.dot_dimension_numbers<[1], [1], [0], [0], [0, 0, 1, 0], [], []>} : vector<32x64xf32>, vector<64x64xf32>, vector<32x64xf32> -> vector<32x64xf32>
    %c0_41 = arith.constant 0 : index
    %c64 = arith.constant 64 : index
    %c0_42 = arith.constant 0 : index
    %55 = vector.load %arg6[%c0_41, %c64, %c0_42] : memref<2x384x64xf32, #tpu.memory_space<vmem>>, vector<1x32x64xf32>
    %56 = vector.shape_cast %55 : vector<1x32x64xf32> to vector<32x64xf32>
    %c0_43 = arith.constant 0 : index
    %c192 = arith.constant 192 : index
    %c0_44 = arith.constant 0 : index
    %57 = vector.load %arg6[%c0_43, %c192, %c0_44] : memref<2x384x64xf32, #tpu.memory_space<vmem>>, vector<1x32x64xf32>
    %58 = vector.shape_cast %57 : vector<1x32x64xf32> to vector<32x64xf32>
    %c0_45 = arith.constant 0 : index
    %c320 = arith.constant 320 : index
    %c0_46 = arith.constant 0 : index
    %59 = vector.load %arg6[%c0_45, %c320, %c0_46] : memref<2x384x64xf32, #tpu.memory_space<vmem>>, vector<1x32x64xf32>
    %60 = vector.shape_cast %59 : vector<1x32x64xf32> to vector<32x64xf32>
    %61 = tpu.transpose %56, [1, 0] : vector<32x64xf32> -> vector<64x32xf32>
    %cst_47 = arith.constant dense<0.000000e+00> : vector<64x64xf32>
    %62 = tpu.matmul %61, %58, %cst_47 {dimension_numbers = #tpu.dot_dimension_numbers<[1], [0], [0], [1], [0, 0, 1, 1], [], []>} : vector<64x32xf32>, vector<32x64xf32>, vector<64x64xf32> -> vector<64x64xf32>
    %cst_48 = arith.constant dense<0xFF800000> : vector<64xf32>
    %63 = vector.multi_reduction <maximumf>, %62, %cst_48 [1] : vector<64x64xf32> to vector<64xf32>
    %64 = vector.shape_cast %63 : vector<64xf32> to vector<64x1xf32>
    %65 = vector.broadcast %64 : vector<64x1xf32> to vector<64x64xf32>
    %66 = arith.subf %62, %65 : vector<64x64xf32>
    %67 = math.exp %66 : vector<64x64xf32>
    %cst_49 = arith.constant dense<0.000000e+00> : vector<64xf32>
    %68 = vector.multi_reduction <add>, %67, %cst_49 [1] : vector<64x64xf32> to vector<64xf32>
    %69 = vector.shape_cast %68 : vector<64xf32> to vector<64x1xf32>
    %70 = vector.broadcast %69 : vector<64x1xf32> to vector<64x64xf32>
    %71 = arith.divf %67, %70 : vector<64x64xf32>
    %cst_50 = arith.constant dense<0.000000e+00> : vector<32x64xf32>
    %72 = tpu.matmul %60, %71, %cst_50 {dimension_numbers = #tpu.dot_dimension_numbers<[1], [1], [0], [0], [0, 0, 1, 0], [], []>} : vector<32x64xf32>, vector<64x64xf32>, vector<32x64xf32> -> vector<32x64xf32>
    %c0_51 = arith.constant 0 : index
    %c96 = arith.constant 96 : index
    %c0_52 = arith.constant 0 : index
    %73 = vector.load %arg6[%c0_51, %c96, %c0_52] : memref<2x384x64xf32, #tpu.memory_space<vmem>>, vector<1x32x64xf32>
    %74 = vector.shape_cast %73 : vector<1x32x64xf32> to vector<32x64xf32>
    %c0_53 = arith.constant 0 : index
    %c224 = arith.constant 224 : index
    %c0_54 = arith.constant 0 : index
    %75 = vector.load %arg6[%c0_53, %c224, %c0_54] : memref<2x384x64xf32, #tpu.memory_space<vmem>>, vector<1x32x64xf32>
    %76 = vector.shape_cast %75 : vector<1x32x64xf32> to vector<32x64xf32>
    %c0_55 = arith.constant 0 : index
    %c352 = arith.constant 352 : index
    %c0_56 = arith.constant 0 : index
    %77 = vector.load %arg6[%c0_55, %c352, %c0_56] : memref<2x384x64xf32, #tpu.memory_space<vmem>>, vector<1x32x64xf32>
    %78 = vector.shape_cast %77 : vector<1x32x64xf32> to vector<32x64xf32>
    %79 = tpu.transpose %74, [1, 0] : vector<32x64xf32> -> vector<64x32xf32>
    %cst_57 = arith.constant dense<0.000000e+00> : vector<64x64xf32>
    %80 = tpu.matmul %79, %76, %cst_57 {dimension_numbers = #tpu.dot_dimension_numbers<[1], [0], [0], [1], [0, 0, 1, 1], [], []>} : vector<64x32xf32>, vector<32x64xf32>, vector<64x64xf32> -> vector<64x64xf32>
    %cst_58 = arith.constant dense<0xFF800000> : vector<64xf32>
    %81 = vector.multi_reduction <maximumf>, %80, %cst_58 [1] : vector<64x64xf32> to vector<64xf32>
    %82 = vector.shape_cast %81 : vector<64xf32> to vector<64x1xf32>
    %83 = vector.broadcast %82 : vector<64x1xf32> to vector<64x64xf32>
    %84 = arith.subf %80, %83 : vector<64x64xf32>
    %85 = math.exp %84 : vector<64x64xf32>
    %cst_59 = arith.constant dense<0.000000e+00> : vector<64xf32>
    %86 = vector.multi_reduction <add>, %85, %cst_59 [1] : vector<64x64xf32> to vector<64xf32>
    %87 = vector.shape_cast %86 : vector<64xf32> to vector<64x1xf32>
    %88 = vector.broadcast %87 : vector<64x1xf32> to vector<64x64xf32>
    %89 = arith.divf %85, %88 : vector<64x64xf32>
    %cst_60 = arith.constant dense<0.000000e+00> : vector<32x64xf32>
    %90 = tpu.matmul %78, %89, %cst_60 {dimension_numbers = #tpu.dot_dimension_numbers<[1], [1], [0], [0], [0, 0, 1, 0], [], []>} : vector<32x64xf32>, vector<64x64xf32>, vector<32x64xf32> -> vector<32x64xf32>
    %91 = tpu.concatenate %36, %54, %72, %90 in 0 : vector<32x64xf32>, vector<32x64xf32>, vector<32x64xf32>, vector<32x64xf32> -> vector<128x64xf32>
    %cst_61 = arith.constant dense<0.000000e+00> : vector<8x64xf32>
    %92 = tpu.matmul %5, %91, %cst_61 {dimension_numbers = #tpu.dot_dimension_numbers<[1], [0], [0], [1], [0, 0, 1, 1], [], []>} : vector<8x128xf32>, vector<128x64xf32>, vector<8x64xf32> -> vector<8x64xf32>
    %93 = vector.broadcast %6 : vector<8x1xf32> to vector<8x64xf32>
    %94 = arith.addf %92, %93 : vector<8x64xf32>
    %c0_62 = arith.constant 0 : index
    %c0_63 = arith.constant 0 : index
    %c0_64 = arith.constant 0 : index
    %95 = vector.load %arg5[%c0_62, %c0_63, %c0_64] : memref<2x8x64xf32, #tpu.memory_space<vmem>>, vector<1x8x64xf32>
    %96 = vector.shape_cast %95 : vector<1x8x64xf32> to vector<8x64xf32>
    %97 = vector.shape_cast %94 : vector<8x64xf32> to vector<1x8x64xf32>
    tpu.vector_store %arg5[%c0_62, %c0_63, %c0_64], %97 {strides = array<i32>} : memref<2x8x64xf32, #tpu.memory_space<vmem>>, vector<1x8x64xf32>,
    %c1_65 = arith.constant 1 : index
    %c0_66 = arith.constant 0 : index
    %c0_67 = arith.constant 0 : index
    %98 = vector.load %arg6[%c1_65, %c0_66, %c0_67] : memref<2x384x64xf32, #tpu.memory_space<vmem>>, vector<1x32x64xf32>
    %99 = vector.shape_cast %98 : vector<1x32x64xf32> to vector<32x64xf32>
    %c1_68 = arith.constant 1 : index
    %c128_69 = arith.constant 128 : index
    %c0_70 = arith.constant 0 : index
    %100 = vector.load %arg6[%c1_68, %c128_69, %c0_70] : memref<2x384x64xf32, #tpu.memory_space<vmem>>, vector<1x32x64xf32>
    %101 = vector.shape_cast %100 : vector<1x32x64xf32> to vector<32x64xf32>
    %c1_71 = arith.constant 1 : index
    %c256_72 = arith.constant 256 : index
    %c0_73 = arith.constant 0 : index
    %102 = vector.load %arg6[%c1_71, %c256_72, %c0_73] : memref<2x384x64xf32, #tpu.memory_space<vmem>>, vector<1x32x64xf32>
    %103 = vector.shape_cast %102 : vector<1x32x64xf32> to vector<32x64xf32>
    %104 = tpu.transpose %99, [1, 0] : vector<32x64xf32> -> vector<64x32xf32>
    %cst_74 = arith.constant dense<0.000000e+00> : vector<64x64xf32>
    %105 = tpu.matmul %104, %101, %cst_74 {dimension_numbers = #tpu.dot_dimension_numbers<[1], [0], [0], [1], [0, 0, 1, 1], [], []>} : vector<64x32xf32>, vector<32x64xf32>, vector<64x64xf32> -> vector<64x64xf32>
    %cst_75 = arith.constant dense<0xFF800000> : vector<64xf32>
    %106 = vector.multi_reduction <maximumf>, %105, %cst_75 [1] : vector<64x64xf32> to vector<64xf32>
    %107 = vector.shape_cast %106 : vector<64xf32> to vector<64x1xf32>
    %108 = vector.broadcast %107 : vector<64x1xf32> to vector<64x64xf32>
    %109 = arith.subf %105, %108 : vector<64x64xf32>
    %110 = math.exp %109 : vector<64x64xf32>
    %cst_76 = arith.constant dense<0.000000e+00> : vector<64xf32>
    %111 = vector.multi_reduction <add>, %110, %cst_76 [1] : vector<64x64xf32> to vector<64xf32>
    %112 = vector.shape_cast %111 : vector<64xf32> to vector<64x1xf32>
    %113 = vector.broadcast %112 : vector<64x1xf32> to vector<64x64xf32>
    %114 = arith.divf %110, %113 : vector<64x64xf32>
    %cst_77 = arith.constant dense<0.000000e+00> : vector<32x64xf32>
    %115 = tpu.matmul %103, %114, %cst_77 {dimension_numbers = #tpu.dot_dimension_numbers<[1], [1], [0], [0], [0, 0, 1, 0], [], []>} : vector<32x64xf32>, vector<64x64xf32>, vector<32x64xf32> -> vector<32x64xf32>
    %c1_78 = arith.constant 1 : index
    %c32_79 = arith.constant 32 : index
    %c0_80 = arith.constant 0 : index
    %116 = vector.load %arg6[%c1_78, %c32_79, %c0_80] : memref<2x384x64xf32, #tpu.memory_space<vmem>>, vector<1x32x64xf32>
    %117 = vector.shape_cast %116 : vector<1x32x64xf32> to vector<32x64xf32>
    %c1_81 = arith.constant 1 : index
    %c160_82 = arith.constant 160 : index
    %c0_83 = arith.constant 0 : index
    %118 = vector.load %arg6[%c1_81, %c160_82, %c0_83] : memref<2x384x64xf32, #tpu.memory_space<vmem>>, vector<1x32x64xf32>
    %119 = vector.shape_cast %118 : vector<1x32x64xf32> to vector<32x64xf32>
    %c1_84 = arith.constant 1 : index
    %c288_85 = arith.constant 288 : index
    %c0_86 = arith.constant 0 : index
    %120 = vector.load %arg6[%c1_84, %c288_85, %c0_86] : memref<2x384x64xf32, #tpu.memory_space<vmem>>, vector<1x32x64xf32>
    %121 = vector.shape_cast %120 : vector<1x32x64xf32> to vector<32x64xf32>
    %122 = tpu.transpose %117, [1, 0] : vector<32x64xf32> -> vector<64x32xf32>
    %cst_87 = arith.constant dense<0.000000e+00> : vector<64x64xf32>
    %123 = tpu.matmul %122, %119, %cst_87 {dimension_numbers = #tpu.dot_dimension_numbers<[1], [0], [0], [1], [0, 0, 1, 1], [], []>} : vector<64x32xf32>, vector<32x64xf32>, vector<64x64xf32> -> vector<64x64xf32>
    %cst_88 = arith.constant dense<0xFF800000> : vector<64xf32>
    %124 = vector.multi_reduction <maximumf>, %123, %cst_88 [1] : vector<64x64xf32> to vector<64xf32>
    %125 = vector.shape_cast %124 : vector<64xf32> to vector<64x1xf32>
    %126 = vector.broadcast %125 : vector<64x1xf32> to vector<64x64xf32>
    %127 = arith.subf %123, %126 : vector<64x64xf32>
    %128 = math.exp %127 : vector<64x64xf32>
    %cst_89 = arith.constant dense<0.000000e+00> : vector<64xf32>
    %129 = vector.multi_reduction <add>, %128, %cst_89 [1] : vector<64x64xf32> to vector<64xf32>
    %130 = vector.shape_cast %129 : vector<64xf32> to vector<64x1xf32>
    %131 = vector.broadcast %130 : vector<64x1xf32> to vector<64x64xf32>
    %132 = arith.divf %128, %131 : vector<64x64xf32>
    %cst_90 = arith.constant dense<0.000000e+00> : vector<32x64xf32>
    %133 = tpu.matmul %121, %132, %cst_90 {dimension_numbers = #tpu.dot_dimension_numbers<[1], [1], [0], [0], [0, 0, 1, 0], [], []>} : vector<32x64xf32>, vector<64x64xf32>, vector<32x64xf32> -> vector<32x64xf32>
    %c1_91 = arith.constant 1 : index
    %c64_92 = arith.constant 64 : index
    %c0_93 = arith.constant 0 : index
    %134 = vector.load %arg6[%c1_91, %c64_92, %c0_93] : memref<2x384x64xf32, #tpu.memory_space<vmem>>, vector<1x32x64xf32>
    %135 = vector.shape_cast %134 : vector<1x32x64xf32> to vector<32x64xf32>
    %c1_94 = arith.constant 1 : index
    %c192_95 = arith.constant 192 : index
    %c0_96 = arith.constant 0 : index
    %136 = vector.load %arg6[%c1_94, %c192_95, %c0_96] : memref<2x384x64xf32, #tpu.memory_space<vmem>>, vector<1x32x64xf32>
    %137 = vector.shape_cast %136 : vector<1x32x64xf32> to vector<32x64xf32>
    %c1_97 = arith.constant 1 : index
    %c320_98 = arith.constant 320 : index
    %c0_99 = arith.constant 0 : index
    %138 = vector.load %arg6[%c1_97, %c320_98, %c0_99] : memref<2x384x64xf32, #tpu.memory_space<vmem>>, vector<1x32x64xf32>
    %139 = vector.shape_cast %138 : vector<1x32x64xf32> to vector<32x64xf32>
    %140 = tpu.transpose %135, [1, 0] : vector<32x64xf32> -> vector<64x32xf32>
    %cst_100 = arith.constant dense<0.000000e+00> : vector<64x64xf32>
    %141 = tpu.matmul %140, %137, %cst_100 {dimension_numbers = #tpu.dot_dimension_numbers<[1], [0], [0], [1], [0, 0, 1, 1], [], []>} : vector<64x32xf32>, vector<32x64xf32>, vector<64x64xf32> -> vector<64x64xf32>
    %cst_101 = arith.constant dense<0xFF800000> : vector<64xf32>
    %142 = vector.multi_reduction <maximumf>, %141, %cst_101 [1] : vector<64x64xf32> to vector<64xf32>
    %143 = vector.shape_cast %142 : vector<64xf32> to vector<64x1xf32>
    %144 = vector.broadcast %143 : vector<64x1xf32> to vector<64x64xf32>
    %145 = arith.subf %141, %144 : vector<64x64xf32>
    %146 = math.exp %145 : vector<64x64xf32>
    %cst_102 = arith.constant dense<0.000000e+00> : vector<64xf32>
    %147 = vector.multi_reduction <add>, %146, %cst_102 [1] : vector<64x64xf32> to vector<64xf32>
    %148 = vector.shape_cast %147 : vector<64xf32> to vector<64x1xf32>
    %149 = vector.broadcast %148 : vector<64x1xf32> to vector<64x64xf32>
    %150 = arith.divf %146, %149 : vector<64x64xf32>
    %cst_103 = arith.constant dense<0.000000e+00> : vector<32x64xf32>
    %151 = tpu.matmul %139, %150, %cst_103 {dimension_numbers = #tpu.dot_dimension_numbers<[1], [1], [0], [0], [0, 0, 1, 0], [], []>} : vector<32x64xf32>, vector<64x64xf32>, vector<32x64xf32> -> vector<32x64xf32>
    %c1_104 = arith.constant 1 : index
    %c96_105 = arith.constant 96 : index
    %c0_106 = arith.constant 0 : index
    %152 = vector.load %arg6[%c1_104, %c96_105, %c0_106] : memref<2x384x64xf32, #tpu.memory_space<vmem>>, vector<1x32x64xf32>
    %153 = vector.shape_cast %152 : vector<1x32x64xf32> to vector<32x64xf32>
    %c1_107 = arith.constant 1 : index
    %c224_108 = arith.constant 224 : index
    %c0_109 = arith.constant 0 : index
    %154 = vector.load %arg6[%c1_107, %c224_108, %c0_109] : memref<2x384x64xf32, #tpu.memory_space<vmem>>, vector<1x32x64xf32>
    %155 = vector.shape_cast %154 : vector<1x32x64xf32> to vector<32x64xf32>
    %c1_110 = arith.constant 1 : index
    %c352_111 = arith.constant 352 : index
    %c0_112 = arith.constant 0 : index
    %156 = vector.load %arg6[%c1_110, %c352_111, %c0_112] : memref<2x384x64xf32, #tpu.memory_space<vmem>>, vector<1x32x64xf32>
    %157 = vector.shape_cast %156 : vector<1x32x64xf32> to vector<32x64xf32>
    %158 = tpu.transpose %153, [1, 0] : vector<32x64xf32> -> vector<64x32xf32>
    %cst_113 = arith.constant dense<0.000000e+00> : vector<64x64xf32>
    %159 = tpu.matmul %158, %155, %cst_113 {dimension_numbers = #tpu.dot_dimension_numbers<[1], [0], [0], [1], [0, 0, 1, 1], [], []>} : vector<64x32xf32>, vector<32x64xf32>, vector<64x64xf32> -> vector<64x64xf32>
    %cst_114 = arith.constant dense<0xFF800000> : vector<64xf32>
    %160 = vector.multi_reduction <maximumf>, %159, %cst_114 [1] : vector<64x64xf32> to vector<64xf32>
    %161 = vector.shape_cast %160 : vector<64xf32> to vector<64x1xf32>
    %162 = vector.broadcast %161 : vector<64x1xf32> to vector<64x64xf32>
    %163 = arith.subf %159, %162 : vector<64x64xf32>
    %164 = math.exp %163 : vector<64x64xf32>
    %cst_115 = arith.constant dense<0.000000e+00> : vector<64xf32>
    %165 = vector.multi_reduction <add>, %164, %cst_115 [1] : vector<64x64xf32> to vector<64xf32>
    %166 = vector.shape_cast %165 : vector<64xf32> to vector<64x1xf32>
    %167 = vector.broadcast %166 : vector<64x1xf32> to vector<64x64xf32>
    %168 = arith.divf %164, %167 : vector<64x64xf32>
    %cst_116 = arith.constant dense<0.000000e+00> : vector<32x64xf32>
    %169 = tpu.matmul %157, %168, %cst_116 {dimension_numbers = #tpu.dot_dimension_numbers<[1], [1], [0], [0], [0, 0, 1, 0], [], []>} : vector<32x64xf32>, vector<64x64xf32>, vector<32x64xf32> -> vector<32x64xf32>
    %170 = tpu.concatenate %115, %133, %151, %169 in 0 : vector<32x64xf32>, vector<32x64xf32>, vector<32x64xf32>, vector<32x64xf32> -> vector<128x64xf32>
    %cst_117 = arith.constant dense<0.000000e+00> : vector<8x64xf32>
    %171 = tpu.matmul %5, %170, %cst_117 {dimension_numbers = #tpu.dot_dimension_numbers<[1], [0], [0], [1], [0, 0, 1, 1], [], []>} : vector<8x128xf32>, vector<128x64xf32>, vector<8x64xf32> -> vector<8x64xf32>
    %172 = vector.broadcast %6 : vector<8x1xf32> to vector<8x64xf32>
    %173 = arith.addf %171, %172 : vector<8x64xf32>
    %c1_118 = arith.constant 1 : index
    %c0_119 = arith.constant 0 : index
    %c0_120 = arith.constant 0 : index
    %174 = vector.load %arg5[%c1_118, %c0_119, %c0_120] : memref<2x8x64xf32, #tpu.memory_space<vmem>>, vector<1x8x64xf32>
    %175 = vector.shape_cast %174 : vector<1x8x64xf32> to vector<8x64xf32>
    %176 = vector.shape_cast %173 : vector<8x64xf32> to vector<1x8x64xf32>
    tpu.vector_store %arg5[%c1_118, %c0_119, %c0_120], %176 {strides = array<i32>} : memref<2x8x64xf32, #tpu.memory_space<vmem>>, vector<1x8x64xf32>,
    return
  }
  func.func @transform_0(%arg0: i32) -> (i32, i32, i32) {
    %c0_i32 = arith.constant 0 : i32
    %c0_i32_0 = arith.constant 0 : i32
    %c0_i32_1 = arith.constant 0 : i32
    %c0_i32_2 = arith.constant 0 : i32
    return %c0_i32, %c0_i32_0, %c0_i32_1 : i32, i32, i32
  }
  func.func @transform_1(%arg0: i32) -> (i32, i32) {
    %c0_i32 = arith.constant 0 : i32
    %c0_i32_0 = arith.constant 0 : i32
    %c0_i32_1 = arith.constant 0 : i32
    return %c0_i32, %c0_i32_0 : i32, i32
  }
  func.func @transform_2(%arg0: i32) -> (i32, i32) {
    %c0_i32 = arith.constant 0 : i32
    %c0_i32_0 = arith.constant 0 : i32
    %c0_i32_1 = arith.constant 0 : i32
    return %c0_i32, %c0_i32_0 : i32, i32
  }
  func.func @transform_3(%arg0: i32) -> (i32, i32) {
    %c0_i32 = arith.constant 0 : i32
    %c0_i32_0 = arith.constant 0 : i32
    %c0_i32_1 = arith.constant 0 : i32
    return %c0_i32, %c0_i32_0 : i32, i32
  }
  func.func @transform_4(%arg0: i32) -> (i32, i32, i32) {
    %c0_i32 = arith.constant 0 : i32
    %c0_i32_0 = arith.constant 0 : i32
    %c0_i32_1 = arith.constant 0 : i32
    %c0_i32_2 = arith.constant 0 : i32
    return %c0_i32, %c0_i32_0, %c0_i32_1 : i32, i32, i32
  }
}

</mosaic_0001>

<bundles_post_ra>
// kernel: attention_pallas.1
= control target key start
LH: loop header
LB: loop body
LE: loop exit
PB: predicated region body
PF: predicated region fallthrough
CT: control target
= control target key end

     0   :  { %vm84_vm0 = vcmask 64512   ;;  %vm534_vm1 = vcmask 523264   ;;  %vm983_vm2 = vcmask 261120   ;;  %vm5853_vm4 = vmmov 0   ;;  %s7261_s0 = inlined_call_operand.vmem [shape: f32[2,8,64], index: 0, kind: input, shape index: {}]   ;;  %s7262_s1 = inlined_call_operand.vmem [shape: f32[384,8], index: 1, kind: input, shape index: {}]   ;;  %s7263_s2 = inlined_call_operand.vmem [shape: f32[8,128], index: 2, kind: input, shape index: {}]   ;;  %s7264_s3 = inlined_call_operand.vmem [shape: f32[8,1], index: 3, kind: input, shape index: {}]   ;;  %s7265_s4 = inlined_call_operand.vmem [shape: f32[2,8,64], index: 4, kind: output, shape index: {}]  }
   0x1   :  { %v83_v0 = vld [vmem:[%s7261_s0] sm:$0xff]  ;;  %v18_v2 = vld [vmem:[%s7262_s1 + $0x8] sm:$0xff]  ;;  %v19_v5 = vld [vmem:[%s7262_s1 + $0x10] sm:$0xff] }
   0x2   :  { %v17_v1 = vld [vmem:[%s7262_s1] sm:$0xff]  ;;  %4730 = vmatprep.subr.mxu0 %v83_v0  ;;  %v5892_v4 = vmul.f32 0.17677669, %v18_v2  ;;  %v20_v6 = vld [vmem:[%s7262_s1 + $0x18] sm:$0xff]  ;;  %5588 = vmatprep.subr.mxu1 %v83_v0  ;;  %v5900_v7 = vmul.f32 0.17677669, %v19_v5  ;;  %vm6463_vm3 = vmpackc.low %vm534_vm1, %vm534_vm1 }
   0x3   :  { %v5890_v3 = vmul.f32 0.17677669, %v17_v1  ;;  %4731 = vmatpush3.msra.mxu0 %v83_v0  ;;  %v21_v8 = vld [vmem:[%s7262_s1 + $0x20] sm:$0xff]  ;;  %5589 = vmatpush3.msra.mxu1 %v83_v0  ;;  %v5909_v9 = vmul.f32 0.17677669, %v20_v6  ;;  %v22_v11 = vld [vmem:[%s7262_s1 + $0x28] sm:$0xff] }
   0x4   :  { %v5913_v10 = vmul.f32 0.17677669, %v21_v8  ;;  %v23_v12 = vld [vmem:[%s7262_s1 + $0x30] sm:$0xff]  ;;  %v5923_v13 = vmul.f32 0.17677669, %v22_v11  ;;  %v24_v15 = vld [vmem:[%s7262_s1 + $0x38] sm:$0xff] }
   0x5   :  { %4732 = vmatprep.mubr.msk.f32.mxu0 %vm84_vm0, %v5890_v3  ;;  %v5927_v14 = vmul.f32 0.17677669, %v23_v12  ;;  %v25_v16 = vld [vmem:[%s7262_s1 + $0x40] sm:$0xff]  ;;  %v5937_v17 = vmul.f32 0.17677669, %v24_v15  ;;  %v26_v19 = vld [vmem:[%s7262_s1 + $0x48] sm:$0xff] }
   0x6   :  { %4733 = vmatmul.mubr.msk.f32.vlgmr.msra.gmra.mrb[0].mxu0 %vm84_vm0, %v5892_v4  ;;  %v5941_v18 = vmul.f32 0.17677669, %v25_v16  ;;  %v27_v20 = vld [vmem:[%s7262_s1 + $0x50] sm:$0xff]  ;;  %v5951_v21 = vmul.f32 0.17677669, %v26_v19  ;;  %v28_v23 = vld [vmem:[%s7262_s1 + $0x58] sm:$0xff] }
   0x7   :  { %4735 = vmatprep.mubr.msk.f32.mxu0 %vm84_vm0, %v5900_v7  ;;  %v5955_v22 = vmul.f32 0.17677669, %v27_v20  ;;  %v29_v24 = vld [vmem:[%s7262_s1 + $0x60] sm:$0xff]  ;;  %v5965_v25 = vmul.f32 0.17677669, %v28_v23  ;;  %v30_v27 = vld [vmem:[%s7262_s1 + $0x68] sm:$0xff] }
   0x8   :  { %v5969_v26 = vmul.f32 0.17677669, %v29_v24  ;;  %v31_v28 = vld [vmem:[%s7262_s1 + $0x70] sm:$0xff]  ;;  %v5979_v29 = vmul.f32 0.17677669, %v30_v27  ;;  %v32_v31 = vld [vmem:[%s7262_s1 + $0x78] sm:$0xff] }
   0x9   :  { %v5983_v30 = vmul.f32 0.17677669, %v31_v28  ;;  %v5990_v32 = vmul.f32 0.17677669, %v32_v31  ;;  %v5997_v33 = vld [vmem:[%s7262_s1 + $0x80] sm:$0xff]  ;;  %v6006_v34 = vld [vmem:[%s7262_s1 + $0x88] sm:$0xff] }
   0xa   :  { %4736 = vmatmul.mubr.msk.f32.gmra.mrb[2].mxu0 %vm84_vm0, %v5909_v9  ;;  %v6011_v35 = vld [vmem:[%s7262_s1 + $0x90] sm:$0xff]  ;;  %v6020_v36 = vld [vmem:[%s7262_s1 + $0x98] sm:$0xff]  ;;  %v6027_v37 = vld [vmem:[%s7262_s1 + $0xa0] sm:$0xff] }
   0xb   :  { %4738 = vmatprep.mubr.msk.f32.mxu0 %vm84_vm0, %v5913_v10  ;;  %v6032_v38 = vld [vmem:[%s7262_s1 + $0xa8] sm:$0xff]  ;;  %v6037_v39 = vld [vmem:[%s7262_s1 + $0xb0] sm:$0xff]  ;;  %v6048_v40 = vld [vmem:[%s7262_s1 + $0xb8] sm:$0xff] }
   0xc   :  { %v6053_v41 = vld [vmem:[%s7262_s1 + $0xc0] sm:$0xff]  ;;  %v6062_v42 = vld [vmem:[%s7262_s1 + $0xc8] sm:$0xff]  ;;  %v6069_v43 = vld [vmem:[%s7262_s1 + $0xd0] sm:$0xff] }
   0xd   :  { %v6076_v44 = vld [vmem:[%s7262_s1 + $0xd8] sm:$0xff]  ;;  %v6081_v45 = vld [vmem:[%s7262_s1 + $0xe0] sm:$0xff]  ;;  %v6090_v46 = vld [vmem:[%s7262_s1 + $0xe8] sm:$0xff] }
   0xe   :  { %4739 = vmatmul.mubr.msk.f32.gmra.mrb[4].mxu0 %vm84_vm0, %v5923_v13  ;;  %v6095_v47 = vld [vmem:[%s7262_s1 + $0xf0] sm:$0xff]  ;;  %v6104_v48 = vld [vmem:[%s7262_s1 + $0xf8] sm:$0xff]  ;;  %v6109_v49 = vld [vmem:[%s7262_s1 + $0x100] sm:$0xff] }
   0xf   :  { %4741 = vmatprep.mubr.msk.f32.mxu0 %vm84_vm0, %v5927_v14  ;;  %v6118_v50 = vld [vmem:[%s7262_s1 + $0x108] sm:$0xff]  ;;  %v6123_v51 = vld [vmem:[%s7262_s1 + $0x110] sm:$0xff]  ;;  %v6132_v52 = vld [vmem:[%s7262_s1 + $0x118] sm:$0xff] }
  0x10   :  { %v6137_v53 = vld [vmem:[%s7262_s1 + $0x120] sm:$0xff]  ;;  %v6146_v54 = vld [vmem:[%s7262_s1 + $0x128] sm:$0xff]  ;;  %v6151_v55 = vld [vmem:[%s7262_s1 + $0x130] sm:$0xff] }
  0x11   :  { %v6160_v56 = vld [vmem:[%s7262_s1 + $0x138] sm:$0xff]  ;;  %v6165_v57 = vld [vmem:[%s7262_s1 + $0x140] sm:$0xff]  ;;  %v6174_v58 = vld [vmem:[%s7262_s1 + $0x148] sm:$0xff] }
  0x12   :  { %4742 = vmatmul.mubr.msk.f32.gmra.mrb[6].mxu0 %vm84_vm0, %v5937_v17  ;;  %v6179_v59 = vld [vmem:[%s7262_s1 + $0x150] sm:$0xff]  ;;  %v6188_v60 = vld [vmem:[%s7262_s1 + $0x158] sm:$0xff]  ;;  %v6193_v61 = vld [vmem:[%s7262_s1 + $0x160] sm:$0xff] }
  0x13   :  { %4744 = vmatprep.mubr.msk.f32.mxu0 %vm84_vm0, %v5941_v18  ;;  %v6202_v62 = vld [vmem:[%s7262_s1 + $0x168] sm:$0xff] }
  0x16   :  { %4745 = vmatmul.mubr.msk.f32.gmra.mrb[8].mxu0 %vm84_vm0, %v5951_v21 }
  0x17   :  { %4747 = vmatprep.mubr.msk.f32.mxu0 %vm84_vm0, %v5955_v22 }
  0x1a   :  { %4748 = vmatmul.mubr.msk.f32.gmra.mrb[10].mxu0 %vm84_vm0, %v5965_v25 }
  0x1b   :  { %4750 = vmatprep.mubr.msk.f32.mxu0 %vm84_vm0, %v5969_v26 }
  0x1e   :  { %4751 = vmatmul.mubr.msk.f32.gmra.mrb[12].mxu0 %vm84_vm0, %v5979_v29 }
  0x1f   :  { %4753 = vmatprep.mubr.msk.f32.mxu0 %vm84_vm0, %v5983_v30 }
  0x22   :  { %4754 = vmatmul.mubr.msk.f32.gmra.mrb[14].mxu0 %vm84_vm0, %v5990_v32 }
  0x23   :  { %4756 = vmatprep.mubr.msk.f32.mxu0 %vm84_vm0, %v5997_v33 }
  0x26   :  { %4757 = vmatmul.mubr.msk.f32.gmra.mrb[16].mxu0 %vm84_vm0, %v6006_v34 }
  0x27   :  { %4759 = vmatprep.mubr.msk.f32.mxu0 %vm84_vm0, %v6011_v35 }
  0x2a   :  { %4760 = vmatmul.mubr.msk.f32.gmra.mrb[18].mxu0 %vm84_vm0, %v6020_v36 }
  0x2b   :  { %4762 = vmatprep.mubr.msk.f32.mxu0 %vm84_vm0, %v6027_v37 }
  0x2e   :  { %4763 = vmatmul.mubr.msk.f32.gmra.mrb[20].mxu0 %vm84_vm0, %v6032_v38 }
  0x2f   :  { %4765 = vmatprep.mubr.msk.f32.mxu0 %vm84_vm0, %v6037_v39 }
  0x32   :  { %4766 = vmatmul.mubr.msk.f32.gmra.mrb[22].mxu0 %vm84_vm0, %v6048_v40 }
  0x33   :  { %4768 = vmatprep.mubr.msk.f32.mxu0 %vm84_vm0, %v6053_v41 }
  0x36   :  { %4769 = vmatmul.mubr.msk.f32.gmra.mrb[24].mxu0 %vm84_vm0, %v6062_v42 }
  0x37   :  { %4771 = vmatprep.mubr.msk.f32.mxu0 %vm84_vm0, %v6069_v43 }
  0x3a   :  { %4772 = vmatmul.mubr.msk.f32.gmra.mrb[26].mxu0 %vm84_vm0, %v6076_v44 }
  0x3b   :  { %4774 = vmatprep.mubr.msk.f32.mxu0 %vm84_vm0, %v6081_v45 }
  0x3e   :  { %4775 = vmatmul.mubr.msk.f32.gmra.mrb[28].mxu0 %vm84_vm0, %v6090_v46 }
  0x3f   :  { %4777 = vmatprep.mubr.msk.f32.mxu0 %vm84_vm0, %v6095_v47 }
  0x42   :  { %4778 = vmatmul.mubr.msk.f32.gmra.mrb[30].mxu0 %vm84_vm0, %v6104_v48 }
  0x43   :  { %4780 = vmatprep.mubr.msk.f32.mxu0 %vm84_vm0, %v6109_v49 }
  0x46   :  { %4781 = vmatmul.mubr.msk.f32.gmra.mrb[32].mxu0 %vm84_vm0, %v6118_v50 }
  0x47   :  { %4783 = vmatprep.mubr.msk.f32.mxu0 %vm84_vm0, %v6123_v51 }
  0x4a   :  { %4784 = vmatmul.mubr.msk.f32.gmra.mrb[34].mxu0 %vm84_vm0, %v6132_v52 }
  0x4b   :  { %4786 = vmatprep.mubr.msk.f32.mxu0 %vm84_vm0, %v6137_v53 }
  0x4e   :  { %4787 = vmatmul.mubr.msk.f32.gmra.mrb[36].mxu0 %vm84_vm0, %v6146_v54 }
  0x4f   :  { %4789 = vmatprep.mubr.msk.f32.mxu0 %vm84_vm0, %v6151_v55 }
  0x52   :  { %4790 = vmatmul.mubr.msk.f32.gmra.mrb[38].mxu0 %vm84_vm0, %v6160_v56 }
  0x53   :  { %4792 = vmatprep.mubr.msk.f32.mxu0 %vm84_vm0, %v6165_v57 }
  0x56   :  { %4793 = vmatmul.mubr.msk.f32.gmra.mrb[40].mxu0 %vm84_vm0, %v6174_v58 }
  0x57   :  { %4795 = vmatprep.mubr.msk.f32.mxu0 %vm84_vm0, %v6179_v59 }
  0x5a   :  { %4796 = vmatmul.mubr.msk.f32.gmra.mrb[42].mxu0 %vm84_vm0, %v6188_v60 }
  0x5b   :  { %4798 = vmatprep.mubr.msk.f32.mxu0 %vm84_vm0, %v6193_v61 }
  0x5e   :  { %4799 = vmatmul.mubr.msk.f32.gmra.mrb[44].mxu0 %vm84_vm0, %v6202_v62 }
  0xd9   :  { %v4734_v63 = vpop.f32.mrb[0].mxu0 }
  0xda   :  { %536 = vst.msk [vmem:[#allocation2 + $0x8] sm:$0xff] %vm534_vm1, %v4734_v63  ;;  %v295_v0 = vpop.f32.mrb[1].mxu0 }
  0xdb   :  { %535 = vst.msk [vmem:[#allocation2] sm:$0xff] %vm534_vm1, %v295_v0 }
  0xdd   :  { %v4737_v1 = vpop.f32.mrb[2].mxu0 }
  0xde   :  { %538 = vst.msk [vmem:[#allocation2 + $0x18] sm:$0xff] %vm534_vm1, %v4737_v1  ;;  %v305_v2 = vpop.f32.mrb[3].mxu0 }
  0xdf   :  { %537 = vst.msk [vmem:[#allocation2 + $0x10] sm:$0xff] %vm534_vm1, %v305_v2 }
  0xe1   :  { %v4740_v5 = vpop.f32.mrb[4].mxu0  ;;  %v940_v12 = vld [vmem:[#allocation2 + $0x8] sm:$0xff] }
  0xe2   :  { %v939_v6 = vld [vmem:[#allocation2] sm:$0xff]  ;;  %540 = vst.msk [vmem:[#allocation2 + $0x28] sm:$0xff] %vm534_vm1, %v4740_v5  ;;  %v315_v8 = vpop.f32.mrb[5].mxu0 }
  0xe3   :  { %951 = vxpose.xlu0.b32.start [1/4] (short) (narrow) %v939_v6, 64  ;;  %539 = vst.msk [vmem:[#allocation2 + $0x20] sm:$0xff] %vm534_vm1, %v315_v8  ;;  %v6229_v8 = vld [vmem:[%s7262_s1 + $0x170] sm:$0xff] }
  0xe4   :  { %4801 = vmatprep.mubr.msk.f32.mxu1 %vm84_vm0, %v6229_v8 }
  0xe5   :  { %v4743_v11 = vpop.f32.mrb[6].mxu0  ;;  %v942_v24 = vld [vmem:[#allocation2 + $0x18] sm:$0xff] }
  0xe6   :  { %542 = vst.msk [vmem:[#allocation2 + $0x38] sm:$0xff] %vm534_vm1, %v4743_v11  ;;  %v325_v15 = vpop.f32.mrb[7].mxu0  ;;  %v941_v16 = vld [vmem:[#allocation2 + $0x10] sm:$0xff]  ;;  %v6234_v11 = vld [vmem:[%s7262_s1 + $0x178] sm:$0xff] }
  0xe7   :  { %952 = vxpose.xlu0.b32.cont [2/4] (short) (narrow) %v940_v12, 64  ;;  %541 = vst.msk [vmem:[#allocation2 + $0x30] sm:$0xff] %vm534_vm1, %v325_v15  ;;  %v4196_v12 = vld [vmem:[%s7261_s0 + $0x8] sm:$0xff]  ;;  %4802 = vmatmul.mubr.msk.f32.vlgmr.msra.gmra.mrb[0].mxu1 %vm84_vm0, %v6234_v11 }
  0xe8   :  { %4804 = vmatprep.subr.mxu1 %v4196_v12  ;;  %4806 = vmatprep.mubr.msk.f32.mxu1 %vm84_vm0, %v5890_v3 }
  0xe9   :  { %v4746_v19 = vpop.f32.mrb[8].mxu0  ;;  %4805 = vmatpush3.msra.mxu1 %v4196_v12 }
  0xea   :  { %544 = vst.msk [vmem:[#allocation2 + $0x48] sm:$0xff] %vm534_vm1, %v4746_v19  ;;  %v335_v20 = vpop.f32.mrb[9].mxu0 }
  0xeb   :  { %953 = vxpose.xlu0.b32.cont [3/4] (short) (narrow) %v941_v16, 64  ;;  %543 = vst.msk [vmem:[#allocation2 + $0x40] sm:$0xff] %vm534_vm1, %v335_v20  ;;  %4807 = vmatmul.mubr.msk.f32.vlgmr.msra.gmra.mrb[2].mxu1 %vm84_vm0, %v5892_v4 }
  0xec   :  { %4809 = vmatprep.mubr.msk.f32.mxu1 %vm84_vm0, %v5900_v7 }
  0xed   :  { %v4749_v23 = vpop.f32.mrb[10].mxu0 }
  0xee   :  { %546 = vst.msk [vmem:[#allocation2 + $0x58] sm:$0xff] %vm534_vm1, %v4749_v23  ;;  %v345_v27 = vpop.f32.mrb[11].mxu0 }
  0xef   :  { %954 = vxpose.xlu0.b32.end [4/4] (short) (narrow) %v942_v24, 64  ;;  %545 = vst.msk [vmem:[#allocation2 + $0x50] sm:$0xff] %vm534_vm1, %v345_v27  ;;  %4810 = vmatmul.mubr.msk.f32.gmra.mrb[4].mxu1 %vm84_vm0, %v5909_v9 }
  0xf0   :  { %4812 = vmatprep.mubr.msk.f32.mxu1 %vm84_vm0, %v5913_v10 }
  0xf1   :  { %v4752_v28 = vpop.f32.mrb[12].mxu0 }
  0xf2   :  { %548 = vst.msk [vmem:[#allocation2 + $0x68] sm:$0xff] %vm534_vm1, %v4752_v28  ;;  %v355_v31 = vpop.f32.mrb[13].mxu0 }
  0xf3   :  { %547 = vst.msk [vmem:[#allocation2 + $0x60] sm:$0xff] %vm534_vm1, %v355_v31  ;;  %4813 = vmatmul.mubr.msk.f32.gmra.mrb[6].mxu1 %vm84_vm0, %v5923_v13 }
  0xf4   :  { %4815 = vmatprep.mubr.msk.f32.mxu1 %vm84_vm0, %v5927_v14 }
  0xf5   :  { %v4755_v63 = vpop.f32.mrb[14].mxu0 }
  0xf6   :  { %550 = vst.msk [vmem:[#allocation2 + $0x78] sm:$0xff] %vm534_vm1, %v4755_v63  ;;  %v365_v0 = vpop.f32.mrb[15].mxu0 }
  0xf7   :  { %549 = vst.msk [vmem:[#allocation2 + $0x70] sm:$0xff] %vm534_vm1, %v365_v0  ;;  %4816 = vmatmul.mubr.msk.f32.gmra.mrb[8].mxu1 %vm84_vm0, %v5937_v17 }
  0xf8   :  { %4818 = vmatprep.mubr.msk.f32.mxu1 %vm84_vm0, %v5941_v18 }
  0xf9   :  { %v4758_v1 = vpop.f32.mrb[16].mxu0 }
  0xfa   :  { %552 = vst.msk [vmem:[#allocation2 + $0x88] sm:$0xff] %vm534_vm1, %v4758_v1  ;;  %v375_v2 = vpop.f32.mrb[17].mxu0 }
  0xfb   :  { %551 = vst.msk [vmem:[#allocation2 + $0x80] sm:$0xff] %vm534_vm1, %v375_v2  ;;  %4819 = vmatmul.mubr.msk.f32.gmra.mrb[10].mxu1 %vm84_vm0, %v5951_v21 }
  0xfc   :  { %4821 = vmatprep.mubr.msk.f32.mxu1 %vm84_vm0, %v5955_v22 }
  0xfd   :  { %v4761_v5 = vpop.f32.mrb[18].mxu0 }
  0xfe   :  { %554 = vst.msk [vmem:[#allocation2 + $0x98] sm:$0xff] %vm534_vm1, %v4761_v5  ;;  %v385_v6 = vpop.f32.mrb[19].mxu0 }
  0xff   :  { %553 = vst.msk [vmem:[#allocation2 + $0x90] sm:$0xff] %vm534_vm1, %v385_v6  ;;  %4822 = vmatmul.mubr.msk.f32.gmra.mrb[12].mxu1 %vm84_vm0, %v5965_v25 }
 0x100   :  { %4824 = vmatprep.mubr.msk.f32.mxu1 %vm84_vm0, %v5969_v26 }
 0x101   :  { %v944_v15 = vld [vmem:[#allocation2 + $0x88] sm:$0xff]  ;;  %v4764_v3 = vpop.f32.mrb[20].mxu0 }
 0x102   :  { %v943_v16 = vld [vmem:[#allocation2 + $0x80] sm:$0xff]  ;;  %556 = vst.msk [vmem:[#allocation2 + $0xa8] sm:$0xff] %vm534_vm1, %v4764_v3  ;;  %v395_v4 = vpop.f32.mrb[21].mxu0 }
 0x103   :  { %v5284_v19 = vpack.c.bf16 %v944_v15, %v943_v16  ;;  %4825 = vmatmul.mubr.msk.f32.gmra.mrb[14].mxu1 %vm84_vm0, %v5979_v29  ;;  %555 = vst.msk [vmem:[#allocation2 + $0xa0] sm:$0xff] %vm534_vm1, %v395_v4 }
 0x104   :  { %4827 = vmatprep.mubr.msk.f32.mxu1 %vm84_vm0, %v5983_v30 }
 0x105   :  { %5285 = vmatprep.subr.bf16.mxu0 %v5284_v19  ;;  %v946_v20 = vld [vmem:[#allocation2 + $0x98] sm:$0xff]  ;;  %v4767_v7 = vpop.f32.mrb[22].mxu0 }
 0x106   :  { %5287 = vmatpush3.bf16.msra.mxu0 %v5284_v19  ;;  %v945_v23 = vld [vmem:[#allocation2 + $0x90] sm:$0xff]  ;;  %558 = vst.msk [vmem:[#allocation2 + $0xb8] sm:$0xff] %vm534_vm1, %v4767_v7  ;;  %v405_v9 = vpop.f32.mrb[23].mxu0 }
 0x107   :  { %v5288_v24 = vpack.c.bf16 %v946_v20, %v945_v23  ;;  %4828 = vmatmul.mubr.msk.f32.gmra.mrb[16].mxu1 %vm84_vm0, %v5990_v32  ;;  %557 = vst.msk [vmem:[#allocation2 + $0xb0] sm:$0xff] %vm534_vm1, %v405_v9 }
 0x108   :  { %4830 = vmatprep.mubr.msk.f32.mxu1 %vm84_vm0, %v5997_v33 }
 0x109   :  { %5289 = vmatprep.subr.bf16.mxu0 %v5288_v24  ;;  %v4770_v10 = vpop.f32.mrb[24].mxu0 }
 0x10a   :  { %5291 = vmatpush3.bf16.msra.mxu0 %v5288_v24  ;;  %560 = vst.msk [vmem:[#allocation2 + $0xc8] sm:$0xff] %vm534_vm1, %v4770_v10  ;;  %v415_v13 = vpop.f32.mrb[25].mxu0 }
 0x10b   :  { %4831 = vmatmul.mubr.msk.f32.gmra.mrb[18].mxu1 %vm84_vm0, %v6006_v34  ;;  %559 = vst.msk [vmem:[#allocation2 + $0xc0] sm:$0xff] %vm534_vm1, %v415_v13 }
 0x10c   :  { %4833 = vmatprep.mubr.msk.f32.mxu1 %vm84_vm0, %v6011_v35 }
 0x10d   :  { %v4773_v14 = vpop.f32.mrb[26].mxu0 }
 0x10e   :  { %562 = vst.msk [vmem:[#allocation2 + $0xd8] sm:$0xff] %vm534_vm1, %v4773_v14  ;;  %v425_v17 = vpop.f32.mrb[27].mxu0 }
 0x10f   :  { %4834 = vmatmul.mubr.msk.f32.gmra.mrb[20].mxu1 %vm84_vm0, %v6020_v36  ;;  %561 = vst.msk [vmem:[#allocation2 + $0xd0] sm:$0xff] %vm534_vm1, %v425_v17 }
 0x110   :  { %4836 = vmatprep.mubr.msk.f32.mxu1 %vm84_vm0, %v6027_v37 }
 0x111   :  { %v4776_v18 = vpop.f32.mrb[28].mxu0 }
 0x112   :  { %564 = vst.msk [vmem:[#allocation2 + $0xe8] sm:$0xff] %vm534_vm1, %v4776_v18  ;;  %v435_v21 = vpop.f32.mrb[29].mxu0 }
 0x113   :  { %4837 = vmatmul.mubr.msk.f32.gmra.mrb[22].mxu1 %vm84_vm0, %v6032_v38  ;;  %563 = vst.msk [vmem:[#allocation2 + $0xe0] sm:$0xff] %vm534_vm1, %v435_v21 }
 0x114   :  { %4839 = vmatprep.mubr.msk.f32.mxu1 %vm84_vm0, %v6037_v39 }
 0x115   :  { %v4779_v25 = vpop.f32.mrb[30].mxu0 }
 0x116   :  { %566 = vst.msk [vmem:[#allocation2 + $0xf8] sm:$0xff] %vm534_vm1, %v4779_v25  ;;  %v445_v26 = vpop.f32.mrb[31].mxu0 }
 0x117   :  { %4840 = vmatmul.mubr.msk.f32.gmra.mrb[24].mxu1 %vm84_vm0, %v6048_v40  ;;  %565 = vst.msk [vmem:[#allocation2 + $0xf0] sm:$0xff] %vm534_vm1, %v445_v26 }
 0x118   :  { %4842 = vmatprep.mubr.msk.f32.mxu1 %vm84_vm0, %v6053_v41 }
 0x119   :  { %v4782_v30 = vpop.f32.mrb[32].mxu0 }
 0x11a   :  { %568 = vst.msk [vmem:[#allocation2 + $0x108] sm:$0xff] %vm534_vm1, %v4782_v30  ;;  %v455_v32 = vpop.f32.mrb[33].mxu0 }
 0x11b   :  { %4843 = vmatmul.mubr.msk.f32.gmra.mrb[26].mxu1 %vm84_vm0, %v6062_v42  ;;  %567 = vst.msk [vmem:[#allocation2 + $0x100] sm:$0xff] %vm534_vm1, %v455_v32 }
 0x11c   :  { %4845 = vmatprep.mubr.msk.f32.mxu1 %vm84_vm0, %v6069_v43 }
 0x11d   :  { %v4785_v34 = vpop.f32.mrb[34].mxu0 }
 0x11e   :  { %570 = vst.msk [vmem:[#allocation2 + $0x118] sm:$0xff] %vm534_vm1, %v4785_v34  ;;  %v465_v35 = vpop.f32.mrb[35].mxu0 }
 0x11f   :  { %4846 = vmatmul.mubr.msk.f32.gmra.mrb[28].mxu1 %vm84_vm0, %v6076_v44  ;;  %569 = vst.msk [vmem:[#allocation2 + $0x110] sm:$0xff] %vm534_vm1, %v465_v35 }
 0x120   :  { %4848 = vmatprep.mubr.msk.f32.mxu1 %vm84_vm0, %v6081_v45 }
 0x121   :  { %v4788_v37 = vpop.f32.mrb[36].mxu0 }
 0x122   :  { %572 = vst.msk [vmem:[#allocation2 + $0x128] sm:$0xff] %vm534_vm1, %v4788_v37  ;;  %v475_v38 = vpop.f32.mrb[37].mxu0  ;;  %v947_v39 = vld [vmem:[#allocation2 + $0x100] sm:$0xff] }
 0x123   :  { %4849 = vmatmul.mubr.msk.f32.gmra.mrb[30].mxu1 %vm84_vm0, %v6090_v46  ;;  %571 = vst.msk [vmem:[#allocation2 + $0x120] sm:$0xff] %vm534_vm1, %v475_v38 }
 0x124   :  { %4851 = vmatprep.mubr.msk.f32.mxu1 %vm84_vm0, %v6095_v47 }
 0x125   :  { %v4791_v41 = vpop.f32.mrb[38].mxu0 }
 0x126   :  { %574 = vst.msk [vmem:[#allocation2 + $0x138] sm:$0xff] %vm534_vm1, %v4791_v41  ;;  %v485_v42 = vpop.f32.mrb[39].mxu0 }
 0x127   :  { %4852 = vmatmul.mubr.msk.f32.gmra.mrb[32].mxu1 %vm84_vm0, %v6104_v48  ;;  %573 = vst.msk [vmem:[#allocation2 + $0x130] sm:$0xff] %vm534_vm1, %v485_v42 }
 0x128   :  { %4854 = vmatprep.mubr.msk.f32.mxu1 %vm84_vm0, %v6109_v49 }
 0x129   :  { %v4794_v44 = vpop.f32.mrb[40].mxu0 }
 0x12a   :  { %576 = vst.msk [vmem:[#allocation2 + $0x148] sm:$0xff] %vm534_vm1, %v4794_v44  ;;  %v495_v45 = vpop.f32.mrb[41].mxu0  ;;  %v1330_v48 = vld [vmem:[#allocation2 + $0x120] sm:$0xff] }
 0x12b   :  { %4855 = vmatmul.mubr.msk.f32.gmra.mrb[34].mxu1 %vm84_vm0, %v6118_v50  ;;  %575 = vst.msk [vmem:[#allocation2 + $0x140] sm:$0xff] %vm534_vm1, %v495_v45  ;;  %v1322_v45 = vld [vmem:[#allocation2 + $0x20] sm:$0xff] }
 0x12c   :  { %4857 = vmatprep.mubr.msk.f32.mxu1 %vm84_vm0, %v6123_v51 }
 0x12d   :  { %v4797_v47 = vpop.f32.mrb[42].mxu0 }
 0x12e   :  { %578 = vst.msk [vmem:[#allocation2 + $0x158] sm:$0xff] %vm534_vm1, %v4797_v47  ;;  %v505_v49 = vpop.f32.mrb[43].mxu0  ;;  %v1324_v47 = vld [vmem:[#allocation2 + $0x30] sm:$0xff] }
 0x12f   :  { %4858 = vmatmul.mubr.msk.f32.gmra.mrb[36].mxu1 %vm84_vm0, %v6132_v52  ;;  %577 = vst.msk [vmem:[#allocation2 + $0x150] sm:$0xff] %vm534_vm1, %v505_v49 }
 0x130   :  { %4860 = vmatprep.mubr.msk.f32.mxu1 %vm84_vm0, %v6137_v53 }
 0x131   :  { %v4800_v51 = vpop.f32.mrb[44].mxu0 }
 0x132   :  { %580 = vst.msk [vmem:[#allocation2 + $0x168] sm:$0xff] %vm534_vm1, %v4800_v51  ;;  %v515_v52 = vpop.f32.mrb[45].mxu0 }
 0x133   :  { %4861 = vmatmul.mubr.msk.f32.gmra.mrb[38].mxu1 %vm84_vm0, %v6146_v54  ;;  %579 = vst.msk [vmem:[#allocation2 + $0x160] sm:$0xff] %vm534_vm1, %v515_v52 }
 0x134   :  { %4863 = vmatprep.mubr.msk.f32.mxu1 %vm84_vm0, %v6151_v55 }
 0x137   :  { %4864 = vmatmul.mubr.msk.f32.gmra.mrb[40].mxu1 %vm84_vm0, %v6160_v56 }
 0x138   :  { %4866 = vmatprep.mubr.msk.f32.mxu1 %vm84_vm0, %v6165_v57 }
 0x13b   :  { %4867 = vmatmul.mubr.msk.f32.gmra.mrb[42].mxu1 %vm84_vm0, %v6174_v58 }
 0x13c   :  { %4869 = vmatprep.mubr.msk.f32.mxu1 %vm84_vm0, %v6179_v59 }
 0x13f   :  { %4870 = vmatmul.mubr.msk.f32.gmra.mrb[44].mxu1 %vm84_vm0, %v6188_v60 }
 0x140   :  { %4872 = vmatprep.mubr.msk.f32.mxu1 %vm84_vm0, %v6193_v61 }
 0x143   :  { %4873 = vmatmul.mubr.msk.f32.gmra.mrb[46].mxu1 %vm84_vm0, %v6202_v62 }
 0x144   :  { %4875 = vmatprep.mubr.msk.f32.mxu1 %vm84_vm0, %v6229_v8 }
 0x147   :  { %4876 = vmatmul.mubr.msk.f32.gmra.mrb[48].mxu1 %vm84_vm0, %v6234_v11 }
 0x148   :  { %4914 = vmatprep.mubr.msk.f32.mxu1 %vm534_vm1, %v947_v39 }
 0x163   :  { %v967_v22 = vpop.trf.xlu0 }
 0x164   :  { %4886 = vmatprep.mubr.msk.f32.mxu0 %vm983_vm2, %v967_v22 }
 0x167   :  { %v968_v29 = vpop.trf.xlu0 }
 0x168   :  { %4887 = vmatmul.mubr.msk.f32.vlgmr.msra.gmra.mrb[46].mxu0 %vm983_vm2, %v968_v29 }
 0x16b   :  { %v969_v33 = vpop.trf.xlu0 }
 0x16c   :  { %4889 = vmatprep.mubr.msk.f32.mxu0 %vm983_vm2, %v969_v33 }
 0x16f   :  { %v970_v36 = vpop.trf.xlu0 }
 0x170   :  { %4890 = vmatmul.mubr.msk.f32.gmra.mrb[48].mxu0 %vm983_vm2, %v970_v36 }
 0x173   :  { %v971_v40 = vpop.trf.xlu0 }
 0x174   :  { %4892 = vmatprep.mubr.msk.f32.mxu0 %vm983_vm2, %v971_v40 }
 0x177   :  { %v972_v43 = vpop.trf.xlu0 }
 0x178   :  { %4893 = vmatmul.mubr.msk.f32.gmra.mrb[50].mxu0 %vm983_vm2, %v972_v43 }
 0x17b   :  { %v973_v46 = vpop.trf.xlu0 }
 0x17c   :  { %4895 = vmatprep.mubr.msk.f32.mxu0 %vm983_vm2, %v973_v46  ;;  %v1323_v46 = vld [vmem:[#allocation2 + $0x28] sm:$0xff] }
 0x17f   :  { %v974_v50 = vpop.trf.xlu0 }
 0x180   :  { %4896 = vmatmul.mubr.msk.f32.gmra.mrb[52].mxu0 %vm983_vm2, %v974_v50 }
 0x181   :  { %4956 = vmatprep.mubr.msk.f32.mxu0 %vm534_vm1, %v1330_v48  ;;  %v1325_v48 = vld [vmem:[#allocation2 + $0x38] sm:$0xff] }
 0x1ba   :  { %v4803_v49 = vpop.f32.mrb[0].mxu1 }
 0x1bb   :  { %582 = vst.msk [vmem:[#allocation2 + $0x178] sm:$0xff] %vm534_vm1, %v4803_v49  ;;  %v525_v50 = vpop.f32.mrb[1].mxu1 }
 0x1bc   :  { %581 = vst.msk [vmem:[#allocation2 + $0x170] sm:$0xff] %vm534_vm1, %v525_v50 }
 0x1be   :  { %v4808_v51 = vpop.f32.mrb[2].mxu1 }
 0x1bf   :  { %892 = vst.msk [vmem:[#allocation2 + $0x188] sm:$0xff] %vm534_vm1, %v4808_v51  ;;  %v651_v52 = vpop.f32.mrb[3].mxu1 }
 0x1c0   :  { %891 = vst.msk [vmem:[#allocation2 + $0x180] sm:$0xff] %vm534_vm1, %v651_v52 }
 0x23b   :  { %v4888_v53 = vpop.f32.mrb[46].mxu0 }
 0x23c   :  { %v1074_v54 = vpop.f32.mrb[47].mxu0  ;;  %v1116_v55 = vsel %vm534_vm1, %v4888_v53, -inf }
 0x23d   :  { %1117 = vmax.xlane.f32.xlu1 %v1116_v55  ;;  %v1113_v56 = vsel %vm534_vm1, %v1074_v54, -inf }
 0x241   :  { %1114 = vmax.xlane.f32.xlu1 %v1113_v56 }
 0x243   :  { %v4891_v57 = vpop.f32.mrb[48].mxu0 }
 0x244   :  { %v1084_v58 = vpop.f32.mrb[49].mxu0  ;;  %v1122_v60 = vsel %vm534_vm1, %v4891_v57, -inf }
 0x245   :  { %v1119_v59 = vsel %vm534_vm1, %v1084_v58, -inf }
 0x246   :  { %1120 = vmax.xlane.f32.xlu1 %v1119_v59 }
 0x24a   :  { %1123 = vmax.xlane.f32.xlu1 %v1122_v60 }
 0x24b   :  { %v4894_v61 = vpop.f32.mrb[50].mxu0 }
 0x24c   :  { %v1094_v62 = vpop.f32.mrb[51].mxu0  ;;  %v1128_v27 = vsel %vm534_vm1, %v4894_v61, -inf }
 0x24d   :  { %v1125_v28 = vsel %vm534_vm1, %v1094_v62, -inf }
 0x24e   :  { %1129 = vmax.xlane.f32.xlu1 %v1128_v27  ;;  %1126 = vmax.xlane.f32.xlu0 %v1125_v28 }
 0x253   :  { %v4897_v31 = vpop.f32.mrb[52].mxu0 }
 0x254   :  { %v1104_v63 = vpop.f32.mrb[53].mxu0  ;;  %v1134_v1 = vsel %vm534_vm1, %v4897_v31, -inf }
 0x255   :  { %v1131_v0 = vsel %vm534_vm1, %v1104_v63, -inf }
 0x256   :  { %1132 = vmax.xlane.f32.xlu1 %v1131_v0 }
 0x25a   :  { %1135 = vmax.xlane.f32.xlu1 %v1134_v1 }
 0x2ca   :  { %v1118_v2 = vpop.xlane.xlu1 %1117 }
 0x2cb   :  { %v1138_v5 = vsub.f32 %v4888_v53, %v1118_v2  ;;  %v4811_v53 = vpop.f32.mrb[4].mxu1 }
 0x2cc   :  { %894 = vst.msk [vmem:[#allocation2 + $0x198] sm:$0xff] %vm534_vm1, %v4811_v53 }
 0x2cd   :  { %v1147_v6 = vmul.f32 1.442695, %v1138_v5 }
 0x2ce   :  { %v1115_v8 = vpop.xlane.xlu1 %1114 }
 0x2cf   :  { %5595 = vpow2.f32 %v1147_v6  ;;  %v1137_v11 = vsub.f32 %v1074_v54, %v1115_v8  ;;  %v661_v54 = vpop.f32.mrb[5].mxu1 }
 0x2d0   :  { %893 = vst.msk [vmem:[#allocation2 + $0x190] sm:$0xff] %vm534_vm1, %v661_v54  ;;  %v4814_v55 = vpop.f32.mrb[6].mxu1 }
 0x2d1   :  { %v1145_v12 = vmul.f32 1.442695, %v1137_v11  ;;  %896 = vst.msk [vmem:[#allocation2 + $0x1a8] sm:$0xff] %vm534_vm1, %v4814_v55  ;;  %v671_v56 = vpop.f32.mrb[7].mxu1 }
 0x2d2   :  { %895 = vst.msk [vmem:[#allocation2 + $0x1a0] sm:$0xff] %vm534_vm1, %v671_v56 }
 0x2d3   :  { %5597 = vpow2.f32 %v1145_v12  ;;  %v1121_v15 = vpop.xlane.xlu1 %1120 }
 0x2d4   :  { %v1139_v16 = vsub.f32 %v1084_v58, %v1121_v15 }
 0x2d6   :  { %v1149_v24 = vmul.f32 1.442695, %v1139_v16 }
 0x2d7   :  { %v1124_v19 = vpop.xlane.xlu1 %1123 }
 0x2d8   :  { %v1140_v20 = vsub.f32 %v4891_v57, %v1124_v19  ;;  %v4817_v57 = vpop.f32.mrb[8].mxu1 }
 0x2d9   :  { %v6383_v23 = vpop.eup %5595  ;;  %898 = vst.msk [vmem:[#allocation2 + $0x1b8] sm:$0xff] %vm534_vm1, %v4817_v57  ;;  %v681_v58 = vpop.f32.mrb[9].mxu1 }
 0x2da   :  { %v1151_v3 = vmul.f32 1.442695, %v1140_v20  ;;  %v1164_v4 = vsel %vm534_vm1, %v6383_v23, 0.0  ;;  %897 = vst.msk [vmem:[#allocation2 + $0x1b0] sm:$0xff] %vm534_vm1, %v681_v58  ;;  %v4820_v59 = vpop.f32.mrb[10].mxu1 }
 0x2db   :  { %v1130_v7 = vpop.xlane.xlu1 %1129  ;;  %v1127_v9 = vpop.xlane.xlu0 %1126  ;;  %1165 = vadd.xlane.f32.xlu1 %v1164_v4  ;;  %900 = vst.msk [vmem:[#allocation2 + $0x1c8] sm:$0xff] %vm534_vm1, %v4820_v59 }
 0x2dc   :  { %5599 = vpow2.f32 %v1151_v3  ;;  %v1142_v10 = vsub.f32 %v4894_v61, %v1130_v7  ;;  %v1141_v17 = vsub.f32 %v1094_v62, %v1127_v9  ;;  %v691_v60 = vpop.f32.mrb[11].mxu1 }
 0x2dd   :  { %v6387_v13 = vpop.eup %5597  ;;  %5601 = vpow2.f32 %v1149_v24  ;;  %899 = vst.msk [vmem:[#allocation2 + $0x1c0] sm:$0xff] %vm534_vm1, %v691_v60  ;;  %v4823_v61 = vpop.f32.mrb[12].mxu1 }
 0x2de   :  { %v1155_v14 = vmul.f32 1.442695, %v1142_v10  ;;  %v1161_v18 = vsel %vm534_vm1, %v6387_v13, 0.0  ;;  %v1153_v21 = vmul.f32 1.442695, %v1141_v17  ;;  %902 = vst.msk [vmem:[#allocation2 + $0x1d8] sm:$0xff] %vm534_vm1, %v4823_v61 }
 0x2df   :  { %1162 = vadd.xlane.f32.xlu1 %v1161_v18  ;;  %v701_v62 = vpop.f32.mrb[13].mxu1 }
 0x2e0   :  { %5603 = vpow2.f32 %v1155_v14  ;;  %901 = vst.msk [vmem:[#allocation2 + $0x1d0] sm:$0xff] %vm534_vm1, %v701_v62  ;;  %v4826_v27 = vpop.f32.mrb[14].mxu1 }
 0x2e1   :  { %5605 = vpow2.f32 %v1153_v21  ;;  %904 = vst.msk [vmem:[#allocation2 + $0x1e8] sm:$0xff] %vm534_vm1, %v4826_v27  ;;  %v711_v28 = vpop.f32.mrb[15].mxu1 }
 0x2e2   :  { %903 = vst.msk [vmem:[#allocation2 + $0x1e0] sm:$0xff] %vm534_vm1, %v711_v28 }
 0x2e3   :  { %v1133_v22 = vpop.xlane.xlu1 %1132 }
 0x2e4   :  { %v1143_v25 = vsub.f32 %v1104_v63, %v1133_v22 }
 0x2e6   :  { %v6391_v26 = vpop.eup %5599  ;;  %v1157_v29 = vmul.f32 1.442695, %v1143_v25 }
 0x2e7   :  { %v1136_v30 = vpop.xlane.xlu1 %1135  ;;  %v1170_v32 = vsel %vm534_vm1, %v6391_v26, 0.0  ;;  %v6395_v33 = vpop.eup %5601 }
 0x2e8   :  { %v1144_v34 = vsub.f32 %v4897_v31, %v1136_v30  ;;  %1171 = vadd.xlane.f32.xlu1 %v1170_v32  ;;  %5607 = vpow2.f32 %v1157_v29  ;;  %v1167_v36 = vsel %vm534_vm1, %v6395_v33, 0.0  ;;  %v4829_v31 = vpop.f32.mrb[16].mxu1 }
 0x2e9   :  { %906 = vst.msk [vmem:[#allocation2 + $0x1f8] sm:$0xff] %vm534_vm1, %v4829_v31  ;;  %v721_v63 = vpop.f32.mrb[17].mxu1 }
 0x2ea   :  { %v1159_v35 = vmul.f32 1.442695, %v1144_v34  ;;  %v6399_v37 = vpop.eup %5603  ;;  %905 = vst.msk [vmem:[#allocation2 + $0x1f0] sm:$0xff] %vm534_vm1, %v721_v63  ;;  %v4832_v0 = vpop.f32.mrb[18].mxu1 }
 0x2eb   :  { %v1176_v38 = vsel %vm534_vm1, %v6399_v37, 0.0  ;;  %v6403_v39 = vpop.eup %5605  ;;  %908 = vst.msk [vmem:[#allocation2 + $0x208] sm:$0xff] %vm534_vm1, %v4832_v0  ;;  %v731_v1 = vpop.f32.mrb[19].mxu1  ;;  %v1326_v0 = vld [vmem:[#allocation2 + $0xa0] sm:$0xff] }
 0x2ec   :  { %1168 = vadd.xlane.f32.xlu1 %v1167_v36  ;;  %5609 = vpow2.f32 %v1159_v35  ;;  %v1173_v40 = vsel %vm534_vm1, %v6403_v39, 0.0  ;;  %907 = vst.msk [vmem:[#allocation2 + $0x200] sm:$0xff] %vm534_vm1, %v731_v1  ;;  %v4835_v2 = vpop.f32.mrb[20].mxu1  ;;  %v1327_v1 = vld [vmem:[#allocation2 + $0xa8] sm:$0xff] }
 0x2ed   :  { %910 = vst.msk [vmem:[#allocation2 + $0x218] sm:$0xff] %vm534_vm1, %v4835_v2  ;;  %v741_v5 = vpop.f32.mrb[21].mxu1 }
 0x2ee   :  { %909 = vst.msk [vmem:[#allocation2 + $0x210] sm:$0xff] %vm534_vm1, %v741_v5  ;;  %v4838_v6 = vpop.f32.mrb[22].mxu1  ;;  %v1329_v5 = vld [vmem:[#allocation2 + $0xb8] sm:$0xff] }
 0x2ef   :  { %912 = vst.msk [vmem:[#allocation2 + $0x228] sm:$0xff] %vm534_vm1, %v4838_v6  ;;  %v751_v8 = vpop.f32.mrb[23].mxu1  ;;  %v948_v6 = vld [vmem:[#allocation2 + $0x108] sm:$0xff] }
 0x2f0   :  { %1177 = vadd.xlane.f32.xlu1 %v1176_v38  ;;  %911 = vst.msk [vmem:[#allocation2 + $0x220] sm:$0xff] %vm534_vm1, %v751_v8  ;;  %v4841_v11 = vpop.f32.mrb[24].mxu1  ;;  %v949_v8 = vld [vmem:[#allocation2 + $0x110] sm:$0xff] }
 0x2f1   :  { %914 = vst.msk [vmem:[#allocation2 + $0x238] sm:$0xff] %vm534_vm1, %v4841_v11  ;;  %v761_v12 = vpop.f32.mrb[25].mxu1  ;;  %v1709_v11 = vld [vmem:[#allocation2 + $0xc8] sm:$0xff] }
 0x2f2   :  { %v6407_v41 = vpop.eup %5607  ;;  %913 = vst.msk [vmem:[#allocation2 + $0x230] sm:$0xff] %vm534_vm1, %v761_v12  ;;  %v4844_v15 = vpop.f32.mrb[26].mxu1  ;;  %v950_v12 = vld [vmem:[#allocation2 + $0x118] sm:$0xff] }
 0x2f3   :  { %v1179_v42 = vsel %vm534_vm1, %v6407_v41, 0.0  ;;  %916 = vst.msk [vmem:[#allocation2 + $0x248] sm:$0xff] %vm534_vm1, %v4844_v15  ;;  %v771_v16 = vpop.f32.mrb[27].mxu1 }
 0x2f4   :  { %1174 = vadd.xlane.f32.xlu1 %v1173_v40  ;;  %915 = vst.msk [vmem:[#allocation2 + $0x240] sm:$0xff] %vm534_vm1, %v771_v16  ;;  %v4847_v20 = vpop.f32.mrb[28].mxu1 }
 0x2f5   :  { %918 = vst.msk [vmem:[#allocation2 + $0x258] sm:$0xff] %vm534_vm1, %v4847_v20  ;;  %v781_v24 = vpop.f32.mrb[29].mxu1  ;;  %v1711_v20 = vld [vmem:[#allocation2 + $0xd8] sm:$0xff] }
 0x2f6   :  { %v6411_v43 = vpop.eup %5609  ;;  %917 = vst.msk [vmem:[#allocation2 + $0x250] sm:$0xff] %vm534_vm1, %v781_v24  ;;  %v4850_v3 = vpop.f32.mrb[30].mxu1 }
 0x2f7   :  { %v1182_v44 = vsel %vm534_vm1, %v6411_v43, 0.0  ;;  %920 = vst.msk [vmem:[#allocation2 + $0x268] sm:$0xff] %vm534_vm1, %v4850_v3  ;;  %v791_v4 = vpop.f32.mrb[31].mxu1 }
 0x2f8   :  { %1180 = vadd.xlane.f32.xlu1 %v1179_v42  ;;  %919 = vst.msk [vmem:[#allocation2 + $0x260] sm:$0xff] %vm534_vm1, %v791_v4  ;;  %v4853_v9 = vpop.f32.mrb[32].mxu1 }
 0x2f9   :  { %922 = vst.msk [vmem:[#allocation2 + $0x278] sm:$0xff] %vm534_vm1, %v4853_v9  ;;  %v801_v10 = vpop.f32.mrb[33].mxu1 }
 0x2fa   :  { %921 = vst.msk [vmem:[#allocation2 + $0x270] sm:$0xff] %vm534_vm1, %v801_v10  ;;  %v4856_v14 = vpop.f32.mrb[34].mxu1 }
 0x2fb   :  { %924 = vst.msk [vmem:[#allocation2 + $0x288] sm:$0xff] %vm534_vm1, %v4856_v14  ;;  %v811_v17 = vpop.f32.mrb[35].mxu1 }
 0x2fc   :  { %1183 = vadd.xlane.f32.xlu1 %v1182_v44  ;;  %923 = vst.msk [vmem:[#allocation2 + $0x280] sm:$0xff] %vm534_vm1, %v811_v17  ;;  %v4859_v18 = vpop.f32.mrb[36].mxu1 }
 0x2fd   :  { %926 = vst.msk [vmem:[#allocation2 + $0x298] sm:$0xff] %vm534_vm1, %v4859_v18  ;;  %v821_v21 = vpop.f32.mrb[37].mxu1 }
 0x2fe   :  { %925 = vst.msk [vmem:[#allocation2 + $0x290] sm:$0xff] %vm534_vm1, %v821_v21  ;;  %v4862_v22 = vpop.f32.mrb[38].mxu1 }
 0x2ff   :  { %928 = vst.msk [vmem:[#allocation2 + $0x2a8] sm:$0xff] %vm534_vm1, %v4862_v22  ;;  %v831_v25 = vpop.f32.mrb[39].mxu1 }
 0x300   :  { %927 = vst.msk [vmem:[#allocation2 + $0x2a0] sm:$0xff] %vm534_vm1, %v831_v25  ;;  %v4865_v29 = vpop.f32.mrb[40].mxu1 }
 0x301   :  { %930 = vst.msk [vmem:[#allocation2 + $0x2b8] sm:$0xff] %vm534_vm1, %v4865_v29  ;;  %v841_v34 = vpop.f32.mrb[41].mxu1 }
 0x302   :  { %929 = vst.msk [vmem:[#allocation2 + $0x2b0] sm:$0xff] %vm534_vm1, %v841_v34  ;;  %v4868_v35 = vpop.f32.mrb[42].mxu1 }
 0x303   :  { %932 = vst.msk [vmem:[#allocation2 + $0x2c8] sm:$0xff] %vm534_vm1, %v4868_v35  ;;  %v851_v38 = vpop.f32.mrb[43].mxu1 }
 0x304   :  { %931 = vst.msk [vmem:[#allocation2 + $0x2c0] sm:$0xff] %vm534_vm1, %v851_v38  ;;  %v4871_v44 = vpop.f32.mrb[44].mxu1 }
 0x305   :  { %934 = vst.msk [vmem:[#allocation2 + $0x2d8] sm:$0xff] %vm534_vm1, %v4871_v44 }
 0x32f   :  { %1334 = vxpose.xlu1.b32.start [1/4] (short) (narrow) %v1322_v45, 64 }
 0x333   :  { %1335 = vxpose.xlu1.b32.cont [2/4] (short) (narrow) %v1323_v46, 64 }
 0x337   :  { %1336 = vxpose.xlu1.b32.cont [3/4] (short) (narrow) %v1324_v47, 64  ;;  %v861_v47 = vpop.f32.mrb[45].mxu1 }
 0x338   :  { %933 = vst.msk [vmem:[#allocation2 + $0x2d0] sm:$0xff] %vm534_vm1, %v861_v47 }
 0x33b   :  { %1337 = vxpose.xlu1.b32.end [4/4] (short) (narrow) %v1325_v48, 64 }
 0x368   :  { %v1166_v19 = vpop.xlane.xlu1 %1165 }
 0x369   :  { %5611 = vrcp.f32 %v1166_v19  ;;  %v1710_v19 = vld [vmem:[#allocation2 + $0xd0] sm:$0xff] }
 0x36a   :  { %v5352_v3 = vpack.c.bf16 %v1711_v20, %v1710_v19 }
 0x36c   :  { %v1163_v7 = vpop.xlane.xlu1 %1162 }
 0x36d   :  { %5613 = vrcp.f32 %v1163_v7 }
 0x373   :  { %v5612_v30 = vpop.eup %5611 }
 0x374   :  { %v1188_v42 = vmul.f32 %v5612_v30, %v6383_v23 }
 0x375   :  { %v1172_v32 = vpop.xlane.xlu1 %1171 }
 0x376   :  { %5615 = vrcp.f32 %v1172_v32 }
 0x377   :  { %v5614_v36 = vpop.eup %5613 }
 0x378   :  { %v1186_v40 = vmul.f32 %v5614_v36, %v6387_v13  ;;  %v4874_v13 = vpop.f32.mrb[46].mxu1 }
 0x379   :  { %v1169_v45 = vpop.xlane.xlu1 %1168  ;;  %936 = vst.msk [vmem:[#allocation2 + $0x2e8] sm:$0xff] %vm534_vm1, %v4874_v13  ;;  %v871_v23 = vpop.f32.mrb[47].mxu1 }
 0x37a   :  { %5617 = vrcp.f32 %v1169_v45  ;;  %v5292_v48 = vpack.c.bf16 %v1188_v42, %v1186_v40  ;;  %935 = vst.msk [vmem:[#allocation2 + $0x2e0] sm:$0xff] %vm534_vm1, %v871_v23  ;;  %v4877_v49 = vpop.f32.mrb[48].mxu1 }
 0x37b   :  { %938 = vst.msk [vmem:[#allocation2 + $0x2f8] sm:$0xff] %vm534_vm1, %v4877_v49  ;;  %v881_v51 = vpop.f32.mrb[49].mxu1 }
 0x37c   :  { %5294 = vmatprep.subr.msk.bf16.mxu1 %vm6463_vm3, %v5292_v48  ;;  %937 = vst.msk [vmem:[#allocation2 + $0x2f0] sm:$0xff] %vm534_vm1, %v881_v51 }
 0x37d   :  { %5297 = vmatpush3.bf16.xpose.msk.msra.mxu1 %vm6463_vm3, %v5292_v48  ;;  %v1178_v50 = vpop.xlane.xlu1 %1177 }
 0x37e   :  { %5619 = vrcp.f32 %v1178_v50 }
 0x380   :  { %v5616_v53 = vpop.eup %5615 }
 0x381   :  { %v1175_v52 = vpop.xlane.xlu1 %1174  ;;  %v1192_v57 = vmul.f32 %v5616_v53, %v6391_v26 }
 0x382   :  { %5621 = vrcp.f32 %v1175_v52 }
 0x383   :  { %v3700_v46 = vld [vmem:[#allocation2 + $0x2f0] sm:$0xff] }
 0x384   :  { %v5618_v54 = vpop.eup %5617 }
 0x385   :  { %v1181_v55 = vpop.xlane.xlu1 %1180  ;;  %v1190_v56 = vmul.f32 %v5618_v54, %v6395_v33 }
 0x386   :  { %5623 = vrcp.f32 %v1181_v55 }
 0x387   :  { %v5298_v58 = vpack.c.bf16 %v1192_v57, %v1190_v56 }
 0x388   :  { %v5620_v60 = vpop.eup %5619 }
 0x389   :  { %5300 = vmatprep.subr.msk.bf16.mxu1 %vm6463_vm3, %v5298_v58  ;;  %v1184_v59 = vpop.xlane.xlu1 %1183  ;;  %v1196_v27 = vmul.f32 %v5620_v60, %v6399_v37  ;;  %v5316_v37 = vpack.c.bf16 %v1327_v1, %v1326_v0 }
 0x38a   :  { %5625 = vrcp.f32 %v1184_v59  ;;  %5303 = vmatpush3.bf16.xpose.msk.msra.mxu1 %vm6463_vm3, %v5298_v58 }
 0x38c   :  { %v5622_v61 = vpop.eup %5621 }
 0x38d   :  { %v1194_v62 = vmul.f32 %v5622_v61, %v6403_v39  ;;  %v1328_v39 = vld [vmem:[#allocation2 + $0xb0] sm:$0xff] }
 0x38f   :  { %v5304_v28 = vpack.c.bf16 %v1196_v27, %v1194_v62 }
 0x390   :  { %v5624_v26 = vpop.eup %5623 }
 0x391   :  { %5306 = vmatprep.subr.msk.bf16.mxu1 %vm6463_vm3, %v5304_v28  ;;  %v1198_v31 = vmul.f32 %v5624_v26, %v6407_v41  ;;  %v5320_v41 = vpack.c.bf16 %v1329_v5, %v1328_v39 }
 0x392   :  { %5309 = vmatpush3.bf16.xpose.msk.msra.mxu1 %vm6463_vm3, %v5304_v28 }
 0x394   :  { %v5626_v33 = vpop.eup %5625 }
 0x395   :  { %v1200_v63 = vmul.f32 %v5626_v33, %v6411_v43  ;;  %v1708_v43 = vld [vmem:[#allocation2 + $0xc0] sm:$0xff] }
 0x396   :  { %v5348_v15 = vpack.c.bf16 %v1709_v11, %v1708_v43 }
 0x397   :  { %v5310_v2 = vpack.c.bf16 %v1200_v63, %v1198_v31 }
 0x399   :  { %5312 = vmatprep.subr.msk.bf16.mxu1 %vm6463_vm3, %v5310_v2 }
 0x39a   :  { %5315 = vmatpush3.bf16.xpose.msk.msra.mxu1 %vm6463_vm3, %v5310_v2 }
 0x39b   :  { %5317 = vmatprep.subr.bf16.mxu1 %v5316_v37 }
 0x3a1   :  { %4915 = vmatmul.mubr.msk.f32.vlgmr.msra.gmra.mrb[50].mxu1 %vm534_vm1, %v948_v6 }
 0x3a2   :  { %4917 = vmatprep.mubr.msk.f32.mxu1 %vm534_vm1, %v949_v8  ;;  %5319 = vmatpush3.bf16.msra.mxu1 %v5316_v37 }
 0x3a3   :  { %5321 = vmatprep.subr.bf16.mxu1 %v5320_v41 }
 0x3a5   :  { %4918 = vmatmul.mubr.msk.f32.gmra.mrb[52].mxu1 %vm534_vm1, %v950_v12 }
 0x3a6   :  { %5323 = vmatpush3.bf16.msra.mxu1 %v5320_v41 }
 0x3a7   :  { %5349 = vmatprep.subr.bf16.mxu1 %v5348_v15 }
 0x3af   :  { %v1350_v16 = vpop.trf.xlu1 }
 0x3b0   :  { %4928 = vmatprep.mubr.msk.f32.mxu1 %vm983_vm2, %v1350_v16 }
 0x3b3   :  { %v1351_v24 = vpop.trf.xlu1 }
 0x3b4   :  { %4929 = vmatmul.mubr.msk.f32.vlgmr.msra.gmra.mrb[54].mxu1 %vm983_vm2, %v1351_v24 }
 0x3b5   :  { %5351 = vmatpush3.bf16.msra.mxu1 %v5348_v15 }
 0x3b6   :  { %5353 = vmatprep.subr.bf16.mxu1 %v5352_v3 }
 0x3b7   :  { %v1352_v4 = vpop.trf.xlu1 }
 0x3b8   :  { %4931 = vmatprep.mubr.msk.f32.mxu1 %vm983_vm2, %v1352_v4 }
 0x3b9   :  { %5355 = vmatpush3.bf16.msra.mxu1 %v5352_v3 }
 0x3bb   :  { %v1353_v7 = vpop.trf.xlu1 }
 0x3bc   :  { %4932 = vmatmul.mubr.msk.f32.gmra.mrb[56].mxu1 %vm983_vm2, %v1353_v7 }
 0x3bf   :  { %v1354_v9 = vpop.trf.xlu1 }
 0x3c0   :  { %4934 = vmatprep.mubr.msk.f32.mxu1 %vm983_vm2, %v1354_v9 }
 0x3c3   :  { %v1355_v10 = vpop.trf.xlu1 }
 0x3c4   :  { %4935 = vmatmul.mubr.msk.f32.gmra.mrb[58].mxu1 %vm983_vm2, %v1355_v10 }
 0x3c7   :  { %v1356_v14 = vpop.trf.xlu1 }
 0x3c8   :  { %4937 = vmatprep.mubr.msk.f32.mxu1 %vm983_vm2, %v1356_v14 }
 0x3cb   :  { %v1357_v17 = vpop.trf.xlu1 }
 0x3cc   :  { %4938 = vmatmul.mubr.msk.f32.gmra.mrb[60].mxu1 %vm983_vm2, %v1357_v17  ;;  %v2086_v17 = vld [vmem:[#allocation2 + $0x60] sm:$0xff] }
 0x474   :  { %v6506_v18 = vpop.f32.mrb[50].mxu1 }
 0x475   :  { %v6508_v21 = vpop.f32.mrb[51].mxu1 }
 0x476   :  { %v5413_v22 = vpack.c.bf16 %v6506_v18, %v6508_v21  ;;  %v2550_v18 = vld [vmem:[#allocation2 + $0x210] sm:$0xff]  ;;  %v2551_v21 = vld [vmem:[#allocation2 + $0x218] sm:$0xff] }
 0x478   :  { %v6512_v25 = vpop.f32.mrb[52].mxu1 }
 0x479   :  { %v6514_v29 = vpop.f32.mrb[53].mxu1 }
 0x47a   :  { %v5416_v30 = vpack.c.bf16 %v6512_v25, %v6514_v29  ;;  %v5440_v25 = vpack.c.bf16 %v2551_v21, %v2550_v18 }
 0x487   :  { %v4930_v32 = vpop.f32.mrb[54].mxu1 }
 0x488   :  { %v1498_v34 = vsel %vm534_vm1, %v4930_v32, -inf  ;;  %v1456_v35 = vpop.f32.mrb[55].mxu1 }
 0x489   :  { %1499 = vmax.xlane.f32.xlu0 %v1498_v34  ;;  %v1495_v36 = vsel %vm534_vm1, %v1456_v35, -inf  ;;  %v2087_v34 = vld [vmem:[#allocation2 + $0x68] sm:$0xff] }
 0x48d   :  { %1496 = vmax.xlane.f32.xlu0 %v1495_v36  ;;  %v2088_v36 = vld [vmem:[#allocation2 + $0x70] sm:$0xff] }
 0x48f   :  { %v4933_v38 = vpop.f32.mrb[56].mxu1 }
 0x490   :  { %v1504_v40 = vsel %vm534_vm1, %v4933_v38, -inf  ;;  %v1466_v42 = vpop.f32.mrb[57].mxu1 }
 0x491   :  { %1505 = vmax.xlane.f32.xlu0 %v1504_v40  ;;  %v1501_v44 = vsel %vm534_vm1, %v1466_v42, -inf  ;;  %v2089_v40 = vld [vmem:[#allocation2 + $0x78] sm:$0xff] }
 0x495   :  { %1502 = vmax.xlane.f32.xlu0 %v1501_v44 }
 0x497   :  { %v4936_v45 = vpop.f32.mrb[58].mxu1 }
 0x498   :  { %v1510_v47 = vsel %vm534_vm1, %v4936_v45, -inf  ;;  %v1476_v48 = vpop.f32.mrb[59].mxu1 }
 0x499   :  { %1511 = vmax.xlane.f32.xlu0 %v1510_v47  ;;  %v1507_v13 = vsel %vm534_vm1, %v1476_v48, -inf }
 0x49d   :  { %1508 = vmax.xlane.f32.xlu0 %v1507_v13 }
 0x49f   :  { %v4939_v23 = vpop.f32.mrb[60].mxu1 }
 0x4a0   :  { %v1486_v49 = vpop.f32.mrb[61].mxu1  ;;  %v1516_v51 = vsel %vm534_vm1, %v4939_v23, -inf }
 0x4a1   :  { %v1513_v50 = vsel %vm534_vm1, %v1486_v49, -inf }
 0x4a2   :  { %1514 = vmax.xlane.f32.xlu0 %v1513_v50 }
 0x4a6   :  { %1517 = vmax.xlane.f32.xlu0 %v1516_v51 }
 0x516   :  { %v1500_v52 = vpop.xlane.xlu0 %1499 }
 0x517   :  { %v1520_v53 = vsub.f32 %v4930_v32, %v1500_v52  ;;  %v1704_v32 = vld [vmem:[#allocation2 + $0x40] sm:$0xff] }
 0x519   :  { %v1529_v54 = vmul.f32 1.442695, %v1520_v53 }
 0x51a   :  { %v1497_v55 = vpop.xlane.xlu0 %1496 }
 0x51b   :  { %5627 = vpow2.f32 %v1529_v54  ;;  %v1519_v56 = vsub.f32 %v1456_v35, %v1497_v55  ;;  %v1705_v35 = vld [vmem:[#allocation2 + $0x48] sm:$0xff] }
 0x51d   :  { %v1527_v57 = vmul.f32 1.442695, %v1519_v56 }
 0x51e   :  { %v1506_v58 = vpop.xlane.xlu0 %1505 }
 0x51f   :  { %5629 = vpow2.f32 %v1527_v57  ;;  %v1522_v59 = vsub.f32 %v4933_v38, %v1506_v58  ;;  %v1706_v38 = vld [vmem:[#allocation2 + $0x50] sm:$0xff] }
 0x521   :  { %v1533_v27 = vmul.f32 1.442695, %v1522_v59 }
 0x522   :  { %v1503_v60 = vpop.xlane.xlu0 %1502 }
 0x523   :  { %v1521_v61 = vsub.f32 %v1466_v42, %v1503_v60  ;;  %v1707_v42 = vld [vmem:[#allocation2 + $0x58] sm:$0xff] }
 0x525   :  { %v6526_v62 = vpop.eup %5627  ;;  %v1531_v28 = vmul.f32 1.442695, %v1521_v61 }
 0x526   :  { %v1512_v26 = vpop.xlane.xlu0 %1511  ;;  %v1546_v33 = vsel %vm534_vm1, %v6526_v62, 0.0 }
 0x527   :  { %5631 = vpow2.f32 %v1531_v28  ;;  %v1524_v31 = vsub.f32 %v4936_v45, %v1512_v26  ;;  %1547 = vadd.xlane.f32.xlu0 %v1546_v33 }
 0x528   :  { %5633 = vpow2.f32 %v1533_v27 }
 0x529   :  { %v5630_v63 = vpop.eup %5629  ;;  %v1537_v0 = vmul.f32 1.442695, %v1524_v31 }
 0x52a   :  { %v1509_v1 = vpop.xlane.xlu0 %1508  ;;  %v1543_v2 = vsel %vm534_vm1, %v5630_v63, 0.0 }
 0x52b   :  { %v1523_v37 = vsub.f32 %v1476_v48, %v1509_v1  ;;  %1544 = vadd.xlane.f32.xlu0 %v1543_v2  ;;  %5635 = vpow2.f32 %v1537_v0  ;;  %v2090_v2 = vld [vmem:[#allocation2 + $0xe0] sm:$0xff] }
 0x52d   :  { %v1535_v39 = vmul.f32 1.442695, %v1523_v37  ;;  %v2091_v37 = vld [vmem:[#allocation2 + $0xe8] sm:$0xff] }
 0x52f   :  { %5637 = vpow2.f32 %v1535_v39  ;;  %v1515_v5 = vpop.xlane.xlu0 %1514  ;;  %v5380_v39 = vpack.c.bf16 %v2091_v37, %v2090_v2 }
 0x530   :  { %v1525_v6 = vsub.f32 %v1486_v49, %v1515_v5  ;;  %v2092_v5 = vld [vmem:[#allocation2 + $0xf0] sm:$0xff] }
 0x531   :  { %v6531_v8 = vpop.eup %5631 }
 0x532   :  { %v1539_v41 = vmul.f32 1.442695, %v1525_v6  ;;  %v1549_v43 = vsel %vm534_vm1, %v6531_v8, 0.0  ;;  %v5634_v11 = vpop.eup %5633  ;;  %v2093_v6 = vld [vmem:[#allocation2 + $0xf8] sm:$0xff] }
 0x533   :  { %1550 = vadd.xlane.f32.xlu0 %v1549_v43  ;;  %v1518_v12 = vpop.xlane.xlu0 %1517  ;;  %v1552_v19 = vsel %vm534_vm1, %v5634_v11, 0.0  ;;  %v5384_v43 = vpack.c.bf16 %v2093_v6, %v2092_v5 }
 0x534   :  { %5639 = vpow2.f32 %v1539_v41  ;;  %v1526_v15 = vsub.f32 %v4939_v23, %v1518_v12  ;;  %v1332_v41 = vld [vmem:[#allocation2 + $0x130] sm:$0xff]  ;;  %v1333_v12 = vld [vmem:[#allocation2 + $0x138] sm:$0xff] }
 0x535   :  { %v5636_v20 = vpop.eup %5635 }
 0x536   :  { %v1541_v16 = vmul.f32 1.442695, %v1526_v15  ;;  %v1558_v4 = vsel %vm534_vm1, %v5636_v20, 0.0 }
 0x537   :  { %1553 = vadd.xlane.f32.xlu0 %v1552_v19 }
 0x538   :  { %5641 = vpow2.f32 %v1541_v16 }
 0x539   :  { %v5638_v24 = vpop.eup %5637 }
 0x53a   :  { %v1555_v3 = vsel %vm534_vm1, %v5638_v24, 0.0 }
 0x53b   :  { %1556 = vadd.xlane.f32.xlu1 %v1555_v3  ;;  %1559 = vadd.xlane.f32.xlu0 %v1558_v4 }
 0x53e   :  { %v5640_v7 = vpop.eup %5639 }
 0x53f   :  { %v1561_v9 = vsel %vm534_vm1, %v5640_v7, 0.0 }
 0x540   :  { %1562 = vadd.xlane.f32.xlu0 %v1561_v9 }
 0x542   :  { %v5642_v10 = vpop.eup %5641 }
 0x543   :  { %v1564_v14 = vsel %vm534_vm1, %v5642_v10, 0.0 }
 0x544   :  { %1565 = vadd.xlane.f32.xlu0 %v1564_v14 }
 0x56e   :  { %2098 = vxpose.xlu1.b32.start [1/4] (short) (narrow) %v2086_v17, 64 }
 0x571   :  { %1716 = vxpose.xlu0.b32.start [1/4] (short) (narrow) %v1704_v32, 64 }
 0x572   :  { %2099 = vxpose.xlu1.b32.cont [2/4] (short) (narrow) %v2087_v34, 64 }
 0x575   :  { %1717 = vxpose.xlu0.b32.cont [2/4] (short) (narrow) %v1705_v35, 64  ;;  %v2094_v35 = vld [vmem:[#allocation2 + $0x160] sm:$0xff] }
 0x576   :  { %2100 = vxpose.xlu1.b32.cont [3/4] (short) (narrow) %v2088_v36, 64 }
 0x579   :  { %1718 = vxpose.xlu0.b32.cont [3/4] (short) (narrow) %v1706_v38, 64  ;;  %v1712_v38 = vld [vmem:[#allocation2 + $0x140] sm:$0xff] }
 0x57a   :  { %2101 = vxpose.xlu1.b32.end [4/4] (short) (narrow) %v2089_v40, 64 }
 0x57d   :  { %1719 = vxpose.xlu0.b32.end [4/4] (short) (narrow) %v1707_v42, 64 }
 0x5b4   :  { %v1548_v44 = vpop.xlane.xlu0 %1547 }
 0x5b5   :  { %5643 = vrcp.f32 %v1548_v44 }
 0x5b8   :  { %v1545_v45 = vpop.xlane.xlu0 %1544 }
 0x5b9   :  { %5645 = vrcp.f32 %v1545_v45 }
 0x5bf   :  { %v5644_v48 = vpop.eup %5643 }
 0x5c0   :  { %v1551_v47 = vpop.xlane.xlu0 %1550  ;;  %v1570_v50 = vmul.f32 %v5644_v48, %v6526_v62 }
 0x5c1   :  { %5647 = vrcp.f32 %v1551_v47 }
 0x5c3   :  { %v5646_v13 = vpop.eup %5645 }
 0x5c4   :  { %v1554_v23 = vpop.xlane.xlu0 %1553  ;;  %v1568_v49 = vmul.f32 %v5646_v13, %v5630_v63 }
 0x5c5   :  { %5649 = vrcp.f32 %v1554_v23 }
 0x5c6   :  { %v5324_v51 = vpack.c.bf16 %v1570_v50, %v1568_v49 }
 0x5c8   :  { %5326 = vmatprep.subr.msk.bf16.mxu0 %vm6463_vm3, %v5324_v51  ;;  %v1560_v52 = vpop.xlane.xlu0 %1559  ;;  %v1557_v53 = vpop.xlane.xlu1 %1556 }
 0x5c9   :  { %5651 = vrcp.f32 %v1560_v52  ;;  %5329 = vmatpush3.bf16.xpose.msk.msra.mxu0 %vm6463_vm3, %v5324_v51 }
 0x5ca   :  { %5653 = vrcp.f32 %v1557_v53 }
 0x5cb   :  { %v5648_v54 = vpop.eup %5647 }
 0x5cc   :  { %v1572_v57 = vmul.f32 %v5648_v54, %v6531_v8  ;;  %v1331_v8 = vld [vmem:[#allocation2 + $0x128] sm:$0xff] }
 0x5cd   :  { %v1563_v55 = vpop.xlane.xlu0 %1562 }
 0x5ce   :  { %5655 = vrcp.f32 %v1563_v55 }
 0x5cf   :  { %v5650_v56 = vpop.eup %5649 }
 0x5d0   :  { %v1574_v58 = vmul.f32 %v5650_v56, %v5634_v11 }
 0x5d1   :  { %v1566_v59 = vpop.xlane.xlu0 %1565 }
 0x5d2   :  { %5657 = vrcp.f32 %v1566_v59  ;;  %v5330_v60 = vpack.c.bf16 %v1574_v58, %v1572_v57 }
 0x5d3   :  { %v5652_v61 = vpop.eup %5651 }
 0x5d4   :  { %v5654_v62 = vpop.eup %5653  ;;  %5332 = vmatprep.subr.msk.bf16.mxu0 %vm6463_vm3, %v5330_v60  ;;  %v1578_v27 = vmul.f32 %v5652_v61, %v5636_v20 }
 0x5d5   :  { %5335 = vmatpush3.bf16.xpose.msk.msra.mxu0 %vm6463_vm3, %v5330_v60  ;;  %v1576_v28 = vmul.f32 %v5654_v62, %v5638_v24 }
 0x5d7   :  { %v5336_v26 = vpack.c.bf16 %v1578_v27, %v1576_v28 }
 0x5d8   :  { %v5656_v33 = vpop.eup %5655 }
 0x5d9   :  { %5338 = vmatprep.subr.msk.bf16.mxu0 %vm6463_vm3, %v5336_v26  ;;  %v1580_v63 = vmul.f32 %v5656_v33, %v5640_v7 }
 0x5dc   :  { %v5658_v31 = vpop.eup %5657 }
 0x5dd   :  { %5341 = vmatpush3.bf16.xpose.msk.msra.mxu0 %vm6463_vm3, %v5336_v26  ;;  %v1582_v0 = vmul.f32 %v5658_v31, %v5642_v10 }
 0x5df   :  { %v5342_v1 = vpack.c.bf16 %v1582_v0, %v1580_v63 }
 0x5e1   :  { %5344 = vmatprep.subr.msk.bf16.mxu0 %vm6463_vm3, %v5342_v1 }
 0x5e5   :  { %5347 = vmatpush3.bf16.xpose.msk.msra.mxu0 %vm6463_vm3, %v5342_v1 }
 0x5e6   :  { %5381 = vmatprep.subr.bf16.mxu0 %v5380_v39 }
 0x5ec   :  { %4957 = vmatmul.mubr.msk.f32.vlgmr.msra.gmra.mrb[54].mxu0 %vm534_vm1, %v1331_v8 }
 0x5ed   :  { %4959 = vmatprep.mubr.msk.f32.mxu0 %vm534_vm1, %v1332_v41  ;;  %5383 = vmatpush3.bf16.msra.mxu0 %v5380_v39 }
 0x5ee   :  { %5385 = vmatprep.subr.bf16.mxu0 %v5384_v43  ;;  %v2114_v11 = vpop.trf.xlu1 }
 0x5f0   :  { %4960 = vmatmul.mubr.msk.f32.gmra.mrb[56].mxu0 %vm534_vm1, %v1333_v12 }
 0x5f1   :  { %v1732_v15 = vpop.trf.xlu0  ;;  %5387 = vmatpush3.bf16.msra.mxu0 %v5384_v43  ;;  %5012 = vmatprep.mubr.msk.f32.mxu0 %vm983_vm2, %v2114_v11 }
 0x5f2   :  { %v2115_v16 = vpop.trf.xlu1  ;;  %4970 = vmatprep.mubr.msk.f32.mxu1 %vm983_vm2, %v1732_v15 }
 0x5f4   :  { %5013 = vmatmul.mubr.msk.f32.vlgmr.msra.gmra.mrb[58].mxu0 %vm983_vm2, %v2115_v16 }
 0x5f5   :  { %v1733_v19 = vpop.trf.xlu0 }
 0x5f6   :  { %4971 = vmatmul.mubr.msk.f32.vlgmr.msra.gmra.mrb[62].mxu1 %vm983_vm2, %v1733_v19  ;;  %v2116_v20 = vpop.trf.xlu1 }
 0x5f7   :  { %5015 = vmatprep.mubr.msk.f32.mxu0 %vm983_vm2, %v2116_v20 }
 0x5f9   :  { %v1734_v24 = vpop.trf.xlu0 }
 0x5fa   :  { %v2117_v3 = vpop.trf.xlu1  ;;  %4973 = vmatprep.mubr.msk.f32.mxu1 %vm983_vm2, %v1734_v24 }
 0x5fb   :  { %5016 = vmatmul.mubr.msk.f32.gmra.mrb[60].mxu0 %vm983_vm2, %v2117_v3 }
 0x5fd   :  { %v1735_v4 = vpop.trf.xlu0 }
 0x5fe   :  { %4974 = vmatmul.mubr.msk.f32.gmra.mrb[64].mxu1 %vm983_vm2, %v1735_v4  ;;  %v2118_v7 = vpop.trf.xlu1 }
 0x5ff   :  { %5018 = vmatprep.mubr.msk.f32.mxu0 %vm983_vm2, %v2118_v7 }
 0x601   :  { %v1736_v9 = vpop.trf.xlu0 }
 0x602   :  { %v2119_v10 = vpop.trf.xlu1  ;;  %4976 = vmatprep.mubr.msk.f32.mxu1 %vm983_vm2, %v1736_v9 }
 0x603   :  { %5019 = vmatmul.mubr.msk.f32.gmra.mrb[62].mxu0 %vm983_vm2, %v2119_v10 }
 0x605   :  { %v1737_v14 = vpop.trf.xlu0 }
 0x606   :  { %4977 = vmatmul.mubr.msk.f32.gmra.mrb[66].mxu1 %vm983_vm2, %v1737_v14  ;;  %v2120_v17 = vpop.trf.xlu1 }
 0x607   :  { %5021 = vmatprep.mubr.msk.f32.mxu0 %vm983_vm2, %v2120_v17 }
 0x609   :  { %v1738_v32 = vpop.trf.xlu0 }
 0x60a   :  { %v2121_v34 = vpop.trf.xlu1  ;;  %4979 = vmatprep.mubr.msk.f32.mxu1 %vm983_vm2, %v1738_v32 }
 0x60b   :  { %5022 = vmatmul.mubr.msk.f32.gmra.mrb[64].mxu0 %vm983_vm2, %v2121_v34 }
 0x60c   :  { %5040 = vmatprep.mubr.msk.f32.mxu0 %vm534_vm1, %v2094_v35 }
 0x60d   :  { %v1739_v36 = vpop.trf.xlu0 }
 0x60e   :  { %4980 = vmatmul.mubr.msk.f32.gmra.mrb[68].mxu1 %vm983_vm2, %v1739_v36 }
 0x60f   :  { %4998 = vmatprep.mubr.msk.f32.mxu1 %vm534_vm1, %v1712_v38 }
 0x6bf   :  { %v6579_v40 = vpop.f32.mrb[54].mxu0 }
 0x6c0   :  { %v6581_v42 = vpop.f32.mrb[55].mxu0 }
 0x6c1   :  { %v5419_v44 = vpack.c.bf16 %v6579_v40, %v6581_v42 }
 0x6c3   :  { %v6585_v45 = vpop.f32.mrb[56].mxu0 }
 0x6c4   :  { %v6587_v47 = vpop.f32.mrb[57].mxu0 }
 0x6c5   :  { %v5422_v48 = vpack.c.bf16 %v6585_v45, %v6587_v47 }
 0x6c7   :  { %v6591_v13 = vpop.f32.mrb[58].mxu0 }
 0x6c8   :  { %v6593_v23 = vpop.f32.mrb[59].mxu0  ;;  %v2262_v37 = vsel %vm534_vm1, %v6591_v13, -inf }
 0x6c9   :  { %v4972_v49 = vpop.f32.mrb[62].mxu1  ;;  %v2259_v39 = vsel %vm534_vm1, %v6593_v23, -inf }
 0x6ca   :  { %v1838_v50 = vpop.f32.mrb[63].mxu1  ;;  %v1880_v51 = vsel %vm534_vm1, %v4972_v49, -inf }
 0x6cb   :  { %1881 = vmax.xlane.f32.xlu1 %v1880_v51  ;;  %v1877_v52 = vsel %vm534_vm1, %v1838_v50, -inf }
 0x6cc   :  { %1878 = vmax.xlane.f32.xlu0 %v1877_v52 }
 0x6ce   :  { %v6597_v53 = vpop.f32.mrb[60].mxu0 }
 0x6cf   :  { %v6599_v54 = vpop.f32.mrb[61].mxu0  ;;  %v2268_v5 = vsel %vm534_vm1, %v6597_v53, -inf }
 0x6d0   :  { %v2265_v6 = vsel %vm534_vm1, %v6599_v54, -inf }
 0x6d1   :  { %v4975_v55 = vpop.f32.mrb[64].mxu1 }
 0x6d2   :  { %v1848_v56 = vpop.f32.mrb[65].mxu1  ;;  %v1886_v59 = vsel %vm534_vm1, %v4975_v55, -inf }
 0x6d3   :  { %v1883_v57 = vsel %vm534_vm1, %v1848_v56, -inf }
 0x6d4   :  { %1884 = vmax.xlane.f32.xlu0 %v1883_v57 }
 0x6d6   :  { %v6602_v58 = vpop.f32.mrb[62].mxu0 }
 0x6d7   :  { %v2274_v60 = vsel %vm534_vm1, %v6602_v58, -inf  ;;  %v6607_v61 = vpop.f32.mrb[63].mxu0 }
 0x6d8   :  { %1887 = vmax.xlane.f32.xlu0 %v1886_v59  ;;  %2275 = vmax.xlane.f32.xlu1 %v2274_v60  ;;  %v2271_v41 = vsel %vm534_vm1, %v6607_v61, -inf }
 0x6d9   :  { %v6609_v62 = vpop.f32.mrb[66].mxu1 }
 0x6da   :  { %v6611_v27 = vpop.f32.mrb[67].mxu1  ;;  %v1892_v33 = vsel %vm534_vm1, %v6609_v62, -inf }
 0x6db   :  { %v1889_v28 = vsel %vm534_vm1, %v6611_v27, -inf }
 0x6dc   :  { %1890 = vmax.xlane.f32.xlu0 %v1889_v28 }
 0x6de   :  { %v6615_v26 = vpop.f32.mrb[64].mxu0 }
 0x6df   :  { %v2280_v31 = vsel %vm534_vm1, %v6615_v26, -inf  ;;  %v6621_v63 = vpop.f32.mrb[65].mxu0 }
 0x6e0   :  { %1893 = vmax.xlane.f32.xlu0 %v1892_v33  ;;  %2281 = vmax.xlane.f32.xlu1 %v2280_v31  ;;  %v2277_v43 = vsel %vm534_vm1, %v6621_v63, -inf }
 0x6e1   :  { %v6623_v0 = vpop.f32.mrb[68].mxu1 }
 0x6e2   :  { %v6625_v1 = vpop.f32.mrb[69].mxu1  ;;  %v1898_v8 = vsel %vm534_vm1, %v6623_v0, -inf }
 0x6e3   :  { %v1895_v2 = vsel %vm534_vm1, %v6625_v1, -inf }
 0x6e4   :  { %1896 = vmax.xlane.f32.xlu0 %v1895_v2 }
 0x6e8   :  { %2263 = vmax.xlane.f32.xlu0 %v2262_v37 }
 0x6ec   :  { %2260 = vmax.xlane.f32.xlu0 %v2259_v39 }
 0x6f0   :  { %2269 = vmax.xlane.f32.xlu0 %v2268_v5 }
 0x6f4   :  { %2266 = vmax.xlane.f32.xlu0 %v2265_v6 }
 0x6f8   :  { %1899 = vmax.xlane.f32.xlu0 %v1898_v8 }
 0x6fc   :  { %2272 = vmax.xlane.f32.xlu0 %v2271_v41 }
 0x700   :  { %2278 = vmax.xlane.f32.xlu0 %v2277_v43 }
 0x758   :  { %v1882_v11 = vpop.xlane.xlu1 %1881 }
 0x759   :  { %v1902_v12 = vsub.f32 %v4972_v49, %v1882_v11  ;;  %v1879_v15 = vpop.xlane.xlu0 %1878 }
 0x75a   :  { %v1901_v16 = vsub.f32 %v1838_v50, %v1879_v15 }
 0x75b   :  { %v1911_v19 = vmul.f32 1.442695, %v1902_v12 }
 0x75c   :  { %v1909_v20 = vmul.f32 1.442695, %v1901_v16 }
 0x75d   :  { %5659 = vpow2.f32 %v1911_v19 }
 0x75e   :  { %5661 = vpow2.f32 %v1909_v20 }
 0x761   :  { %v1885_v24 = vpop.xlane.xlu0 %1884 }
 0x762   :  { %v1903_v3 = vsub.f32 %v1848_v56, %v1885_v24 }
 0x764   :  { %v1913_v4 = vmul.f32 1.442695, %v1903_v3 }
 0x765   :  { %v1888_v7 = vpop.xlane.xlu0 %1887  ;;  %v2276_v6 = vpop.xlane.xlu1 %2275 }
 0x766   :  { %5663 = vpow2.f32 %v1913_v4  ;;  %v1904_v9 = vsub.f32 %v4975_v55, %v1888_v7 }
 0x767   :  { %v6643_v10 = vpop.eup %5659 }
 0x768   :  { %v6645_v14 = vpop.eup %5661  ;;  %v1915_v17 = vmul.f32 1.442695, %v1904_v9  ;;  %v1928_v32 = vsel %vm534_vm1, %v6643_v10, 0.0 }
 0x769   :  { %v1891_v34 = vpop.xlane.xlu0 %1890  ;;  %1929 = vadd.xlane.f32.xlu1 %v1928_v32  ;;  %v1925_v35 = vsel %vm534_vm1, %v6645_v14, 0.0 }
 0x76a   :  { %5665 = vpow2.f32 %v1915_v17  ;;  %1926 = vadd.xlane.f32.xlu0 %v1925_v35  ;;  %v1905_v59 = vsub.f32 %v6611_v27, %v1891_v34 }
 0x76c   :  { %v1917_v2 = vmul.f32 1.442695, %v1905_v59 }
 0x76d   :  { %v1894_v36 = vpop.xlane.xlu0 %1893  ;;  %v2282_v12 = vpop.xlane.xlu1 %2281 }
 0x76e   :  { %v1906_v52 = vsub.f32 %v6609_v62, %v1894_v36  ;;  %v2290_v20 = vsub.f32 %v6615_v26, %v2282_v12 }
 0x770   :  { %v6651_v38 = vpop.eup %5663  ;;  %v1919_v60 = vmul.f32 1.442695, %v1906_v52  ;;  %v2305_v26 = vmul.f32 1.442695, %v2290_v20 }
 0x771   :  { %v1897_v49 = vpop.xlane.xlu0 %1896  ;;  %v1931_v50 = vsel %vm534_vm1, %v6651_v38, 0.0 }
 0x772   :  { %1932 = vadd.xlane.f32.xlu0 %v1931_v50  ;;  %v1907_v5 = vsub.f32 %v6625_v1, %v1897_v49 }
 0x774   :  { %v6655_v51 = vpop.eup %5665  ;;  %v1921_v43 = vmul.f32 1.442695, %v1907_v5  ;;  %v2926_v5 = vld [vmem:[#allocation2 + $0x1a0] sm:$0xff] }
 0x775   :  { %v2264_v55 = vpop.xlane.xlu0 %2263  ;;  %v1934_v56 = vsel %vm534_vm1, %v6655_v51, 0.0 }
 0x776   :  { %v2284_v57 = vsub.f32 %v6591_v13, %v2264_v55  ;;  %1935 = vadd.xlane.f32.xlu1 %v1934_v56 }
 0x778   :  { %v2293_v28 = vmul.f32 1.442695, %v2284_v57 }
 0x779   :  { %v2261_v33 = vpop.xlane.xlu0 %2260 }
 0x77a   :  { %5667 = vpow2.f32 %v2293_v28  ;;  %v2283_v31 = vsub.f32 %v6593_v23, %v2261_v33  ;;  %v2288_v23 = vsub.f32 %v6602_v58, %v2276_v6  ;;  %v2927_v6 = vld [vmem:[#allocation2 + $0x1a8] sm:$0xff] }
 0x77b   :  { %5669 = vpow2.f32 %v1919_v60 }
 0x77c   :  { %v2291_v37 = vmul.f32 1.442695, %v2283_v31 }
 0x77d   :  { %v2270_v39 = vpop.xlane.xlu0 %2269 }
 0x77e   :  { %5671 = vpow2.f32 %v2291_v37  ;;  %v2286_v62 = vsub.f32 %v6597_v53, %v2270_v39  ;;  %v2544_v39 = vld [vmem:[#allocation2 + $0x180] sm:$0xff] }
 0x77f   :  { %5673 = vpow2.f32 %v1917_v2 }
 0x780   :  { %v2297_v13 = vmul.f32 1.442695, %v2286_v62  ;;  %v2545_v62 = vld [vmem:[#allocation2 + $0x188] sm:$0xff] }
 0x781   :  { %v2267_v8 = vpop.xlane.xlu0 %2266 }
 0x782   :  { %5675 = vpow2.f32 %v2297_v13  ;;  %v2285_v27 = vsub.f32 %v6599_v54, %v2267_v8  ;;  %v2301_v54 = vmul.f32 1.442695, %v2288_v23  ;;  %v2546_v13 = vld [vmem:[#allocation2 + $0x190] sm:$0xff]  ;;  %v2547_v8 = vld [vmem:[#allocation2 + $0x198] sm:$0xff] }
 0x783   :  { %v2929_v23 = vld [vmem:[#allocation2 + $0x1b8] sm:$0xff] }
 0x784   :  { %v6666_v41 = vpop.eup %5667  ;;  %v2295_v11 = vmul.f32 1.442695, %v2285_v27  ;;  %v2928_v27 = vld [vmem:[#allocation2 + $0x1b0] sm:$0xff] }
 0x785   :  { %v1900_v15 = vpop.xlane.xlu0 %1899  ;;  %v2310_v53 = vsel %vm534_vm1, %v6666_v41, 0.0  ;;  %v6671_v16 = vpop.eup %5669 }
 0x786   :  { %5677 = vpow2.f32 %v2295_v11  ;;  %v1908_v1 = vsub.f32 %v6623_v0, %v1900_v15  ;;  %2311 = vadd.xlane.f32.xlu1 %v2310_v53  ;;  %v1940_v4 = vsel %vm534_vm1, %v6671_v16, 0.0 }
 0x787   :  { %5679 = vpow2.f32 %v1921_v43 }
 0x788   :  { %v6674_v19 = vpop.eup %5671  ;;  %v1923_v58 = vmul.f32 1.442695, %v1908_v1 }
 0x789   :  { %v2273_v24 = vpop.xlane.xlu0 %2272  ;;  %v2307_v3 = vsel %vm534_vm1, %v6674_v19, 0.0  ;;  %v6681_v7 = vpop.eup %5673 }
 0x78a   :  { %5681 = vpow2.f32 %v1923_v58  ;;  %v2287_v0 = vsub.f32 %v6607_v61, %v2273_v24  ;;  %2308 = vadd.xlane.f32.xlu0 %v2307_v3  ;;  %1941 = vadd.xlane.f32.xlu1 %v1940_v4  ;;  %v1937_v34 = vsel %vm534_vm1, %v6681_v7, 0.0 }
 0x78b   :  { %5683 = vpow2.f32 %v2301_v54 }
 0x78c   :  { %v6684_v9 = vpop.eup %5675  ;;  %v2299_v17 = vmul.f32 1.442695, %v2287_v0 }
 0x78d   :  { %v2279_v32 = vpop.xlane.xlu0 %2278  ;;  %v2316_v35 = vsel %vm534_vm1, %v6684_v9, 0.0 }
 0x78e   :  { %5685 = vpow2.f32 %v2299_v17  ;;  %v2289_v36 = vsub.f32 %v6621_v63, %v2279_v32  ;;  %1938 = vadd.xlane.f32.xlu0 %v1937_v34  ;;  %2317 = vadd.xlane.f32.xlu1 %v2316_v35 }
 0x78f   :  { %5687 = vpow2.f32 %v2305_v26 }
 0x790   :  { %v6691_v61 = vpop.eup %5677  ;;  %v2303_v49 = vmul.f32 1.442695, %v2289_v36 }
 0x791   :  { %v2313_v50 = vsel %vm534_vm1, %v6691_v61, 0.0  ;;  %v6695_v52 = vpop.eup %5679 }
 0x792   :  { %5689 = vpow2.f32 %v2303_v49  ;;  %2314 = vadd.xlane.f32.xlu0 %v2313_v50  ;;  %v1943_v56 = vsel %vm534_vm1, %v6695_v52, 0.0 }
 0x794   :  { %v6697_v55 = vpop.eup %5681 }
 0x795   :  { %v1946_v63 = vsel %vm534_vm1, %v6697_v55, 0.0  ;;  %v6703_v57 = vpop.eup %5683 }
 0x796   :  { %1944 = vadd.xlane.f32.xlu0 %v1943_v56  ;;  %1947 = vadd.xlane.f32.xlu1 %v1946_v63  ;;  %v2322_v28 = vsel %vm534_vm1, %v6703_v57, 0.0 }
 0x798   :  { %v6705_v59 = vpop.eup %5685 }
 0x799   :  { %v2319_v60 = vsel %vm534_vm1, %v6705_v59, 0.0  ;;  %v6711_v33 = vpop.eup %5687 }
 0x79a   :  { %2320 = vadd.xlane.f32.xlu0 %v2319_v60  ;;  %2323 = vadd.xlane.f32.xlu1 %v2322_v28  ;;  %v2328_v37 = vsel %vm534_vm1, %v6711_v33, 0.0 }
 0x79c   :  { %v6713_v31 = vpop.eup %5689 }
 0x79d   :  { %v2325_v2 = vsel %vm534_vm1, %v6713_v31, 0.0 }
 0x79e   :  { %2326 = vadd.xlane.f32.xlu0 %v2325_v2  ;;  %2329 = vadd.xlane.f32.xlu1 %v2328_v37 }
 0x7cb   :  { %2556 = vxpose.xlu0.b32.start [1/4] (short) (narrow) %v2544_v39, 64 }
 0x7cf   :  { %2557 = vxpose.xlu0.b32.cont [2/4] (short) (narrow) %v2545_v62, 64 }
 0x7d1   :  { %2938 = vxpose.xlu1.b32.start [1/4] (short) (narrow) %v2926_v5, 64 }
 0x7d3   :  { %2558 = vxpose.xlu0.b32.cont [3/4] (short) (narrow) %v2546_v13, 64 }
 0x7d5   :  { %2939 = vxpose.xlu1.b32.cont [2/4] (short) (narrow) %v2927_v6, 64 }
 0x7d7   :  { %2559 = vxpose.xlu0.b32.end [4/4] (short) (narrow) %v2547_v8, 64 }
 0x7d9   :  { %2940 = vxpose.xlu1.b32.cont [3/4] (short) (narrow) %v2928_v27, 64 }
 0x7dd   :  { %2941 = vxpose.xlu1.b32.end [4/4] (short) (narrow) %v2929_v23, 64 }
 0x7f6   :  { %v1930_v43 = vpop.xlane.xlu1 %1929 }
 0x7f7   :  { %5691 = vrcp.f32 %v1930_v43  ;;  %v1927_v11 = vpop.xlane.xlu0 %1926 }
 0x7f8   :  { %5693 = vrcp.f32 %v1927_v11 }
 0x7ff   :  { %v1933_v12 = vpop.xlane.xlu0 %1932 }
 0x800   :  { %5695 = vrcp.f32 %v1933_v12 }
 0x801   :  { %v5692_v15 = vpop.eup %5691 }
 0x802   :  { %v5694_v53 = vpop.eup %5693  ;;  %v1952_v1 = vmul.f32 %v5692_v15, %v6643_v10 }
 0x803   :  { %v1936_v54 = vpop.xlane.xlu1 %1935  ;;  %v1950_v20 = vmul.f32 %v5694_v53, %v6645_v14 }
 0x804   :  { %5697 = vrcp.f32 %v1936_v54  ;;  %v5852_v54 = vmov 0.0|0.0  }
 0x805   :  { %v5356_v58 = vpack.c.bf16 %v1952_v1, %v1950_v20 }
 0x807   :  { %5358 = vmatprep.subr.msk.bf16.mxu1 %vm6463_vm3, %v5356_v58 }
 0x808   :  { %5361 = vmatpush3.bf16.xpose.msk.msra.mxu1 %vm6463_vm3, %v5356_v58  ;;  %v1713_v58 = vld [vmem:[#allocation2 + $0x148] sm:$0xff] }
 0x80a   :  { %v5696_v24 = vpop.eup %5695 }
 0x80b   :  { %v1954_v4 = vmul.f32 %v5696_v24, %v6651_v38  ;;  %v1714_v24 = vld [vmem:[#allocation2 + $0x150] sm:$0xff] }
 0x80e   :  { %v5698_v3 = vpop.eup %5697 }
 0x80f   :  { %v1956_v0 = vmul.f32 %v5698_v3, %v6655_v51  ;;  %v2549_v3 = vld [vmem:[#allocation2 + $0x208] sm:$0xff] }
 0x811   :  { %v5362_v26 = vpack.c.bf16 %v1956_v0, %v1954_v4  ;;  %v2096_v0 = vld [vmem:[#allocation2 + $0x170] sm:$0xff] }
 0x813   :  { %5364 = vmatprep.subr.msk.bf16.mxu1 %vm6463_vm3, %v5362_v26  ;;  %v2312_v10 = vpop.xlane.xlu1 %2311 }
 0x814   :  { %5367 = vmatpush3.bf16.xpose.msk.msra.mxu1 %vm6463_vm3, %v5362_v26  ;;  %5699 = vrcp.f32 %v2312_v10  ;;  %v2552_v10 = vld [vmem:[#allocation2 + $0x280] sm:$0xff] }
 0x817   :  { %v2309_v14 = vpop.xlane.xlu0 %2308  ;;  %v1942_v17 = vpop.xlane.xlu1 %1941 }
 0x818   :  { %5701 = vrcp.f32 %v2309_v14  ;;  %v5854_v14 = vmov 0.0  }
 0x819   :  { %5703 = vrcp.f32 %v1942_v17 }
 0x81b   :  { %v1939_v32 = vpop.xlane.xlu0 %1938  ;;  %v2318_v34 = vpop.xlane.xlu1 %2317 }
 0x81c   :  { %5705 = vrcp.f32 %v1939_v32 }
 0x81d   :  { %5707 = vrcp.f32 %v2318_v34 }
 0x81e   :  { %v5700_v35 = vpop.eup %5699 }
 0x81f   :  { %v2315_v38 = vpop.xlane.xlu0 %2314  ;;  %v2334_v56 = vmul.f32 %v5700_v35, %v6666_v41 }
 0x820   :  { %5709 = vrcp.f32 %v2315_v38 }
 0x822   :  { %v5702_v51 = vpop.eup %5701 }
 0x823   :  { %v1945_v36 = vpop.xlane.xlu0 %1944  ;;  %v1948_v49 = vpop.xlane.xlu1 %1947  ;;  %v2332_v50 = vmul.f32 %v5702_v51, %v6674_v19 }
 0x824   :  { %v5704_v63 = vpop.eup %5703  ;;  %5711 = vrcp.f32 %v1945_v36 }
 0x825   :  { %5713 = vrcp.f32 %v1948_v49  ;;  %v5388_v60 = vpack.c.bf16 %v2334_v56, %v2332_v50  ;;  %v1960_v62 = vmul.f32 %v5704_v63, %v6671_v16 }
 0x826   :  { %v5706_v28 = vpop.eup %5705 }
 0x827   :  { %v2321_v2 = vpop.xlane.xlu0 %2320  ;;  %5390 = vmatprep.subr.msk.bf16.mxu0 %vm6463_vm3, %v5388_v60  ;;  %v2324_v37 = vpop.xlane.xlu1 %2323  ;;  %v1958_v39 = vmul.f32 %v5706_v28, %v6681_v7 }
 0x828   :  { %v5708_v5 = vpop.eup %5707  ;;  %5715 = vrcp.f32 %v2321_v2  ;;  %5393 = vmatpush3.bf16.xpose.msk.msra.mxu0 %vm6463_vm3, %v5388_v60  ;;  %v2930_v2 = vld [vmem:[#allocation2 + $0x220] sm:$0xff] }
 0x829   :  { %5717 = vrcp.f32 %v2324_v37  ;;  %v5368_v41 = vpack.c.bf16 %v1960_v62, %v1958_v39  ;;  %v2338_v27 = vmul.f32 %v5708_v5, %v6684_v9  ;;  %v2931_v37 = vld [vmem:[#allocation2 + $0x228] sm:$0xff] }
 0x82a   :  { %v5710_v19 = vpop.eup %5709 }
 0x82b   :  { %v2327_v13 = vpop.xlane.xlu0 %2326  ;;  %5370 = vmatprep.subr.msk.bf16.mxu1 %vm6463_vm3, %v5368_v41  ;;  %v2330_v6 = vpop.xlane.xlu1 %2329  ;;  %v2336_v8 = vmul.f32 %v5710_v19, %v6691_v61  ;;  %v81_v19 = vld [vmem:[%s7263_s2] sm:$0xff] }
 0x82c   :  { %5719 = vrcp.f32 %v2327_v13  ;;  %5373 = vmatpush3.bf16.xpose.msk.msra.mxu1 %vm6463_vm3, %v5368_v41  ;;  %v5468_v41 = vpack.c.bf16 %v2931_v37, %v2930_v2  ;;  %v2932_v13 = vld [vmem:[#allocation2 + $0x230] sm:$0xff] }
 0x82d   :  { %5721 = vrcp.f32 %v2330_v6  ;;  %v5394_v16 = vpack.c.bf16 %v2338_v27, %v2336_v8  ;;  %v2933_v6 = vld [vmem:[#allocation2 + $0x238] sm:$0xff] }
 0x82e   :  { %v5712_v7 = vpop.eup %5711 }
 0x82f   :  { %v5714_v23 = vpop.eup %5713  ;;  %5396 = vmatprep.subr.msk.bf16.mxu0 %vm6463_vm3, %v5394_v16  ;;  %v1962_v43 = vmul.f32 %v5712_v7, %v6695_v52 }
 0x830   :  { %5399 = vmatpush3.bf16.xpose.msk.msra.mxu0 %vm6463_vm3, %v5394_v16  ;;  %v1964_v61 = vmul.f32 %v5714_v23, %v6697_v55  ;;  %v5472_v23 = vpack.c.bf16 %v2933_v6, %v2932_v13 }
 0x832   :  { %v5716_v11 = vpop.eup %5715  ;;  %v5374_v9 = vpack.c.bf16 %v1964_v61, %v1962_v43 }
 0x833   :  { %v5718_v12 = vpop.eup %5717  ;;  %v2340_v15 = vmul.f32 %v5716_v11, %v6705_v59 }
 0x834   :  { %5376 = vmatprep.subr.msk.bf16.mxu1 %vm6463_vm3, %v5374_v9  ;;  %v2342_v53 = vmul.f32 %v5718_v12, %v6703_v57 }
 0x835   :  { %5379 = vmatpush3.bf16.xpose.msk.msra.mxu1 %vm6463_vm3, %v5374_v9 }
 0x836   :  { %v5720_v1 = vpop.eup %5719  ;;  %v5400_v52 = vpack.c.bf16 %v2342_v53, %v2340_v15  ;;  %5412 = vmatprep.subr.bf16.mxu1 %v5852_v54 }
 0x837   :  { %v5722_v20 = vpop.eup %5721  ;;  %v2344_v55 = vmul.f32 %v5720_v1, %v6713_v31  ;;  %v2548_v31 = vld [vmem:[#allocation2 + $0x200] sm:$0xff] }
 0x838   :  { %5402 = vmatprep.subr.msk.bf16.mxu0 %vm6463_vm3, %v5400_v52  ;;  %v2346_v59 = vmul.f32 %v5722_v20, %v6711_v33  ;;  %v1715_v33 = vld [vmem:[#allocation2 + $0x158] sm:$0xff]  ;;  %v5436_v4 = vpack.c.bf16 %v2549_v3, %v2548_v31 }
 0x839   :  { %5405 = vmatpush3.bf16.xpose.msk.msra.mxu0 %vm6463_vm3, %v5400_v52  ;;  %v2934_v52 = vld [vmem:[#allocation2 + $0x2a0] sm:$0xff] }
 0x83a   :  { %v5406_v57 = vpack.c.bf16 %v2346_v59, %v2344_v55 }
 0x83c   :  { %4999 = vmatmul.mubr.msk.f32.vlgmr.msra.gmra.mrb[70].mxu1 %vm534_vm1, %v1713_v58  ;;  %5408 = vmatprep.subr.msk.bf16.mxu0 %vm6463_vm3, %v5406_v57 }
 0x83d   :  { %5001 = vmatprep.mubr.msk.f32.mxu1 %vm534_vm1, %v1714_v24  ;;  %5414 = vmatpush3.bf16.msra.mxu1 %v5413_v22  ;;  %v2095_v22 = vld [vmem:[#allocation2 + $0x168] sm:$0xff] }
 0x83e   :  { %5415 = vmatprep.subr.bf16.mxu1 %v5852_v54 }
 0x840   :  { %5002 = vmatmul.mubr.msk.f32.gmra.mrb[72].mxu1 %vm534_vm1, %v1715_v33 }
 0x841   :  { %5411 = vmatpush3.bf16.xpose.msk.msra.mxu0 %vm6463_vm3, %v5406_v57  ;;  %5417 = vmatpush3.bf16.msra.mxu1 %v5416_v30  ;;  %v2097_v30 = vld [vmem:[#allocation2 + $0x178] sm:$0xff] }
 0x842   :  { %5437 = vmatprep.subr.bf16.mxu0 %v5436_v4  ;;  %5418 = vmatprep.subr.bf16.mxu1 %v5852_v54 }
 0x843   :  { %5078 = vmatprep.mubr.msk.f32.mxu1 %vm5853_vm4, %v5854_v14 }
 0x845   :  { %5420 = vmatpush3.bf16.msra.mxu1 %v5419_v44 }
 0x846   :  { %5421 = vmatprep.subr.bf16.mxu1 %v5852_v54 }
 0x848   :  { %5041 = vmatmul.mubr.msk.f32.vlgmr.msra.gmra.mrb[66].mxu0 %vm534_vm1, %v2095_v22 }
 0x849   :  { %5043 = vmatprep.mubr.msk.f32.mxu0 %vm534_vm1, %v2096_v0  ;;  %5423 = vmatpush3.bf16.msra.mxu1 %v5422_v48 }
 0x84a   :  { %5439 = vmatpush3.bf16.msra.mxu0 %v5436_v4  ;;  %5424 = vmatprep.subr.bf16.mxu1 %v5852_v54 }
 0x84b   :  { %5441 = vmatprep.subr.bf16.mxu0 %v5440_v25  ;;  %v2572_v29 = vpop.trf.xlu0 }
 0x84c   :  { %5044 = vmatmul.mubr.msk.f32.gmra.mrb[68].mxu0 %vm534_vm1, %v2097_v30 }
 0x84d   :  { %5089 = vmatprep.mubr.msk.f32.mxu0 %vm983_vm2, %v2572_v29 }
 0x84e   :  { %5443 = vmatpush3.bf16.msra.mxu0 %v5440_v25 }
 0x84f   :  { %v2573_v40 = vpop.trf.xlu0 }
 0x851   :  { %5090 = vmatmul.mubr.msk.f32.vlgmr.msra.gmra.mrb[70].mxu0 %vm983_vm2, %v2573_v40  ;;  %v2954_v17 = vpop.trf.xlu1 }
 0x853   :  { %v2574_v42 = vpop.trf.xlu0 }
 0x854   :  { %5092 = vmatprep.mubr.msk.f32.mxu0 %vm983_vm2, %v2574_v42 }
 0x855   :  { %v2955_v51 = vpop.trf.xlu1 }
 0x857   :  { %v2575_v44 = vpop.trf.xlu0 }
 0x858   :  { %5093 = vmatmul.mubr.msk.f32.gmra.mrb[72].mxu0 %vm983_vm2, %v2575_v44 }
 0x859   :  { %v2956_v50 = vpop.trf.xlu1 }
 0x85b   :  { %v2576_v45 = vpop.trf.xlu0 }
 0x85c   :  { %5095 = vmatprep.mubr.msk.f32.mxu0 %vm983_vm2, %v2576_v45 }
 0x85d   :  { %v2957_v39 = vpop.trf.xlu1 }
 0x85f   :  { %v2577_v47 = vpop.trf.xlu0 }
 0x860   :  { %5096 = vmatmul.mubr.msk.f32.gmra.mrb[74].mxu0 %vm983_vm2, %v2577_v47 }
 0x861   :  { %v2958_v27 = vpop.trf.xlu1 }
 0x863   :  { %v2578_v48 = vpop.trf.xlu0 }
 0x864   :  { %5098 = vmatprep.mubr.msk.f32.mxu0 %vm983_vm2, %v2578_v48 }
 0x865   :  { %v2959_v61 = vpop.trf.xlu1 }
 0x867   :  { %v2579_v26 = vpop.trf.xlu0 }
 0x868   :  { %5099 = vmatmul.mubr.msk.f32.gmra.mrb[76].mxu0 %vm983_vm2, %v2579_v26 }
 0x869   :  { %5117 = vmatprep.mubr.msk.f32.mxu0 %vm534_vm1, %v2552_v10  ;;  %v2960_v53 = vpop.trf.xlu1 }
 0x86d   :  { %v2961_v1 = vpop.trf.xlu1 }
 0x90f   :  { %v5000_v32 = vpop.f32.mrb[70].mxu1 }
 0x910   :  { %v2067_v34 = vpop.f32.mrb[71].mxu1 }
 0x911   :  { %v5425_v38 = vpack.c.bf16 %v5000_v32, %v2067_v34 }
 0x913   :  { %v5003_v35 = vpop.f32.mrb[72].mxu1  ;;  %5426 = vmatpush3.bf16.msra.mxu1 %v5425_v38 }
 0x914   :  { %v2077_v36 = vpop.f32.mrb[73].mxu1  ;;  %5427 = vmatprep.subr.bf16.mxu1 %v5852_v54 }
 0x915   :  { %v5428_v49 = vpack.c.bf16 %v5003_v35, %v2077_v36 }
 0x917   :  { %5429 = vmatpush3.bf16.msra.mxu1 %v5428_v49 }
 0x918   :  { %5430 = vmatprep.subr.bf16.mxu1 %v5852_v54 }
 0x91b   :  { %v5042_v56 = vpop.f32.mrb[66].mxu0 }
 0x91c   :  { %v2449_v63 = vpop.f32.mrb[67].mxu0 }
 0x91d   :  { %v5431_v60 = vpack.c.bf16 %v5042_v56, %v2449_v63 }
 0x91f   :  { %v5045_v28 = vpop.f32.mrb[68].mxu0  ;;  %5432 = vmatpush3.bf16.msra.mxu1 %v5431_v60 }
 0x920   :  { %v2459_v62 = vpop.f32.mrb[69].mxu0  ;;  %5433 = vmatprep.subr.bf16.mxu1 %v5852_v54 }
 0x921   :  { %v5434_v5 = vpack.c.bf16 %v5045_v28, %v2459_v62 }
 0x923   :  { %5435 = vmatpush3.bf16.msra.mxu1 %v5434_v5 }
 0x924   :  { %5469 = vmatprep.subr.bf16.mxu1 %v5468_v41  ;;  %v5091_v8 = vpop.f32.mrb[70].mxu0 }
 0x925   :  { %v2678_v16 = vpop.f32.mrb[71].mxu0  ;;  %v2720_v7 = vsel %vm534_vm1, %v5091_v8, -inf }
 0x926   :  { %5079 = vmatmul.mubr.f32.vlgmr.msra.gmra.mrb[74].mxu1 %v81_v19  ;;  %2721 = vmax.xlane.f32.xlu1 %v2720_v7  ;;  %v2717_v43 = vsel %vm534_vm1, %v2678_v16, -inf }
 0x927   :  { %5471 = vmatpush3.bf16.msra.mxu1 %v5468_v41  ;;  %5131 = vmatprep.mubr.msk.f32.mxu1 %vm983_vm2, %v2954_v17 }
 0x928   :  { %5473 = vmatprep.subr.bf16.mxu1 %v5472_v23  ;;  %2718 = vmax.xlane.f32.xlu0 %v2717_v43 }
 0x92b   :  { %5475 = vmatpush3.bf16.msra.mxu1 %v5472_v23  ;;  %v5094_v11 = vpop.f32.mrb[72].mxu0 }
 0x92c   :  { %v2688_v9 = vpop.f32.mrb[73].mxu0  ;;  %v2726_v12 = vsel %vm534_vm1, %v5094_v11, -inf }
 0x92d   :  { %2727 = vmax.xlane.f32.xlu1 %v2726_v12  ;;  %v2723_v15 = vsel %vm534_vm1, %v2688_v9, -inf }
 0x92e   :  { %5132 = vmatmul.mubr.msk.f32.vlgmr.msra.gmra.mrb[76].mxu1 %vm983_vm2, %v2955_v51  ;;  %2724 = vmax.xlane.f32.xlu0 %v2723_v15 }
 0x92f   :  { %5134 = vmatprep.mubr.msk.f32.mxu1 %vm983_vm2, %v2956_v50 }
 0x932   :  { %5135 = vmatmul.mubr.msk.f32.gmra.mrb[78].mxu1 %vm983_vm2, %v2957_v39 }
 0x933   :  { %5137 = vmatprep.mubr.msk.f32.mxu1 %vm983_vm2, %v2958_v27  ;;  %v6820_v20 = vpop.f32.mrb[74].mxu0 }
 0x934   :  { %v6822_v55 = vpop.f32.mrb[75].mxu0  ;;  %v2732_v22 = vsel %vm534_vm1, %v6820_v20, -inf }
 0x935   :  { %v2729_v0 = vsel %vm534_vm1, %v6822_v55, -inf }
 0x936   :  { %5138 = vmatmul.mubr.msk.f32.gmra.mrb[80].mxu1 %vm983_vm2, %v2959_v61 }
 0x937   :  { %5140 = vmatprep.mubr.msk.f32.mxu1 %vm983_vm2, %v2960_v53 }
 0x93a   :  { %5141 = vmatmul.mubr.msk.f32.gmra.mrb[82].mxu1 %vm983_vm2, %v2961_v1 }
 0x93b   :  { %5159 = vmatprep.mubr.msk.f32.mxu1 %vm534_vm1, %v2934_v52  ;;  %v6824_v59 = vpop.f32.mrb[76].mxu0 }
 0x93c   :  { %v6826_v57 = vpop.f32.mrb[77].mxu0  ;;  %v2738_v38 = vsel %vm534_vm1, %v6824_v59, -inf }
 0x93d   :  { %v2735_v51 = vsel %vm534_vm1, %v6826_v57, -inf }
 0x9b3   :  { %v2722_v4 = vpop.xlane.xlu1 %2721 }
 0x9b4   :  { %v2742_v29 = vsub.f32 %v5091_v8, %v2722_v4 }
 0x9b5   :  { %v2719_v21 = vpop.xlane.xlu0 %2718 }
 0x9b6   :  { %v2741_v40 = vsub.f32 %v2678_v16, %v2719_v21  ;;  %v2751_v45 = vmul.f32 1.442695, %v2742_v29 }
 0x9b8   :  { %v2749_v26 = vmul.f32 1.442695, %v2741_v40  ;;  %5723 = vpow2.f32 %v2751_v45 }
 0x9ba   :  { %v2728_v42 = vpop.xlane.xlu1 %2727  ;;  %5725 = vpow2.f32 %v2749_v26 }
 0x9bb   :  { %v2725_v44 = vpop.xlane.xlu0 %2724  ;;  %v2744_v47 = vsub.f32 %v5094_v11, %v2728_v42 }
 0x9bc   :  { %v2743_v17 = vsub.f32 %v2688_v9, %v2725_v44 }
 0x9bd   :  { %v2755_v35 = vmul.f32 1.442695, %v2744_v47 }
 0x9be   :  { %v2753_v49 = vmul.f32 1.442695, %v2743_v17 }
 0x9bf   :  { %5727 = vpow2.f32 %v2755_v35 }
 0x9c0   :  { %5729 = vpow2.f32 %v2753_v49 }
 0x9c2   :  { %v6870_v2 = vpop.eup %5723 }
 0x9c3   :  { %v2768_v39 = vsel %vm534_vm1, %v6870_v2, 0.0 }
 0x9c4   :  { %v6872_v37 = vpop.eup %5725 }
 0x9c5   :  { %v2765_v5 = vsel %vm534_vm1, %v6872_v37, 0.0 }
 0x9c9   :  { %v6876_v62 = vpop.eup %5727 }
 0x9ca   :  { %v6880_v41 = vpop.eup %5729  ;;  %v2774_v19 = vsel %vm534_vm1, %v6876_v62, 0.0 }
 0x9cb   :  { %v2771_v13 = vsel %vm534_vm1, %v6880_v41, 0.0 }
 0x9f9   :  { %v6828_v58 = vpop.f32.mrb[74].mxu1 }
 0x9fa   :  { %v5080_v24 = vpop.f32.mrb[75].mxu1 }
 0xa01   :  { %v6830_v31 = vpop.f32.mrb[76].mxu1 }
 0xa02   :  { %v6832_v3 = vpop.f32.mrb[77].mxu1  ;;  %v3102_v33 = vsel %vm534_vm1, %v6830_v31, -inf }
 0xa03   :  { %3103 = vmax.xlane.f32.xlu1 %v3102_v33  ;;  %v3099_v18 = vsel %vm534_vm1, %v6832_v3, -inf }
 0xa04   :  { %3100 = vmax.xlane.f32.xlu0 %v3099_v18 }
 0xa05   :  { %v6842_v25 = vpop.f32.mrb[78].mxu1 }
 0xa06   :  { %v6844_v30 = vpop.f32.mrb[79].mxu1  ;;  %v3108_v10 = vsel %vm534_vm1, %v6842_v25, -inf }
 0xa07   :  { %2733 = vmax.xlane.f32.xlu1 %v2732_v22  ;;  %v3105_v34 = vsel %vm534_vm1, %v6844_v30, -inf }
 0xa08   :  { %2730 = vmax.xlane.f32.xlu0 %v2729_v0 }
 0xa09   :  { %v6846_v48 = vpop.f32.mrb[80].mxu1 }
 0xa0a   :  { %v6850_v32 = vpop.f32.mrb[81].mxu1  ;;  %v3114_v56 = vsel %vm534_vm1, %v6846_v48, -inf }
 0xa0b   :  { %3109 = vmax.xlane.f32.xlu1 %v3108_v10  ;;  %v3111_v63 = vsel %vm534_vm1, %v6850_v32, -inf }
 0xa0c   :  { %3106 = vmax.xlane.f32.xlu0 %v3105_v34 }
 0xa0d   :  { %v6858_v36 = vpop.f32.mrb[82].mxu1 }
 0xa0e   :  { %v6860_v50 = vpop.f32.mrb[83].mxu1  ;;  %v3120_v60 = vsel %vm534_vm1, %v6858_v36, -inf }
 0xa0f   :  { %2739 = vmax.xlane.f32.xlu1 %v2738_v38  ;;  %v3117_v28 = vsel %vm534_vm1, %v6860_v50, -inf }
 0xa10   :  { %2736 = vmax.xlane.f32.xlu0 %v2735_v51 }
 0xa13   :  { %3115 = vmax.xlane.f32.xlu1 %v3114_v56 }
 0xa14   :  { %3112 = vmax.xlane.f32.xlu0 %v3111_v63 }
 0xa17   :  { %3121 = vmax.xlane.f32.xlu1 %v3120_v60 }
 0xa18   :  { %3118 = vmax.xlane.f32.xlu0 %v3117_v28 }
 0xa1b   :  { %2769 = vadd.xlane.f32.xlu1 %v2768_v39 }
 0xa1c   :  { %2766 = vadd.xlane.f32.xlu0 %v2765_v5 }
 0xa1f   :  { %2775 = vadd.xlane.f32.xlu1 %v2774_v19 }
 0xa20   :  { %2772 = vadd.xlane.f32.xlu0 %v2771_v13 }
 0xa90   :  { %v3104_v6 = vpop.xlane.xlu1 %3103 }
 0xa91   :  { %v3124_v8 = vsub.f32 %v6830_v31, %v3104_v6  ;;  %v3101_v27 = vpop.xlane.xlu0 %3100 }
 0xa92   :  { %v3123_v16 = vsub.f32 %v6832_v3, %v3101_v27 }
 0xa93   :  { %v3133_v7 = vmul.f32 1.442695, %v3124_v8 }
 0xa94   :  { %v3131_v23 = vmul.f32 1.442695, %v3123_v16  ;;  %v2734_v43 = vpop.xlane.xlu1 %2733 }
 0xa95   :  { %5731 = vpow2.f32 %v3133_v7  ;;  %v2746_v61 = vsub.f32 %v6820_v20, %v2734_v43  ;;  %v2731_v11 = vpop.xlane.xlu0 %2730 }
 0xa96   :  { %5733 = vpow2.f32 %v3131_v23  ;;  %v2745_v9 = vsub.f32 %v6822_v55, %v2731_v11 }
 0xa97   :  { %v2759_v12 = vmul.f32 1.442695, %v2746_v61 }
 0xa98   :  { %v2757_v15 = vmul.f32 1.442695, %v2745_v9  ;;  %v3110_v53 = vpop.xlane.xlu1 %3109 }
 0xa99   :  { %5735 = vpow2.f32 %v2759_v12  ;;  %v3126_v1 = vsub.f32 %v6842_v25, %v3110_v53  ;;  %v3107_v52 = vpop.xlane.xlu0 %3106 }
 0xa9a   :  { %5737 = vpow2.f32 %v2757_v15  ;;  %v3125_v24 = vsub.f32 %v6844_v30, %v3107_v52 }
 0xa9b   :  { %v3137_v31 = vmul.f32 1.442695, %v3126_v1 }
 0xa9c   :  { %v3135_v3 = vmul.f32 1.442695, %v3125_v24  ;;  %v2740_v33 = vpop.xlane.xlu1 %2739 }
 0xa9d   :  { %5739 = vpow2.f32 %v3137_v31  ;;  %v2748_v20 = vsub.f32 %v6824_v59, %v2740_v33  ;;  %v2737_v4 = vpop.xlane.xlu0 %2736  ;;  %v3691_v33 = vld [vmem:[#allocation2 + $0x1e8] sm:$0xff] }
 0xa9e   :  { %5741 = vpow2.f32 %v3135_v3  ;;  %v2747_v55 = vsub.f32 %v6826_v57, %v2737_v4  ;;  %v3692_v4 = vld [vmem:[#allocation2 + $0x1f0] sm:$0xff] }
 0xa9f   :  { %v6894_v18 = vpop.eup %5731  ;;  %v2763_v21 = vmul.f32 1.442695, %v2748_v20  ;;  %v3311_v20 = vld [vmem:[#allocation2 + $0x1d8] sm:$0xff] }
 0xaa0   :  { %v6896_v22 = vpop.eup %5733  ;;  %v2761_v0 = vmul.f32 1.442695, %v2747_v55  ;;  %v3116_v25 = vpop.xlane.xlu1 %3115  ;;  %v3150_v29 = vsel %vm534_vm1, %v6894_v18, 0.0  ;;  %v3693_v55 = vld [vmem:[#allocation2 + $0x1f8] sm:$0xff] }
 0xaa1   :  { %5743 = vpow2.f32 %v2763_v21  ;;  %v3128_v30 = vsub.f32 %v6846_v48, %v3116_v25  ;;  %v3113_v40 = vpop.xlane.xlu0 %3112  ;;  %3151 = vadd.xlane.f32.xlu1 %v3150_v29  ;;  %v3147_v59 = vsel %vm534_vm1, %v6896_v22, 0.0 }
 0xaa2   :  { %5745 = vpow2.f32 %v2761_v0  ;;  %v3127_v57 = vsub.f32 %v6850_v32, %v3113_v40  ;;  %3148 = vadd.xlane.f32.xlu0 %v3147_v59 }
 0xaa3   :  { %v6904_v42 = vpop.eup %5735  ;;  %v3141_v44 = vmul.f32 1.442695, %v3128_v30 }
 0xaa4   :  { %v6906_v45 = vpop.eup %5737  ;;  %v3139_v47 = vmul.f32 1.442695, %v3127_v57  ;;  %v3122_v26 = vpop.xlane.xlu1 %3121  ;;  %v2780_v10 = vsel %vm534_vm1, %v6904_v42, 0.0 }
 0xaa5   :  { %5747 = vpow2.f32 %v3141_v44  ;;  %v3130_v48 = vsub.f32 %v6858_v36, %v3122_v26  ;;  %2781 = vadd.xlane.f32.xlu1 %v2780_v10  ;;  %v3119_v17 = vpop.xlane.xlu0 %3118  ;;  %v2777_v34 = vsel %vm534_vm1, %v6906_v45, 0.0 }
 0xaa6   :  { %5749 = vpow2.f32 %v3139_v47  ;;  %v3129_v32 = vsub.f32 %v6860_v50, %v3119_v17  ;;  %2778 = vadd.xlane.f32.xlu0 %v2777_v34 }
 0xaa7   :  { %v6914_v38 = vpop.eup %5739  ;;  %v3145_v35 = vmul.f32 1.442695, %v3130_v48 }
 0xaa8   :  { %v6916_v51 = vpop.eup %5741  ;;  %v3143_v49 = vmul.f32 1.442695, %v3129_v32  ;;  %v2770_v56 = vpop.xlane.xlu1 %2769  ;;  %v3156_v63 = vsel %vm534_vm1, %v6914_v38, 0.0 }
 0xaa9   :  { %5751 = vpow2.f32 %v3145_v35  ;;  %3157 = vadd.xlane.f32.xlu1 %v3156_v63  ;;  %v2767_v36 = vpop.xlane.xlu0 %2766  ;;  %v3153_v60 = vsel %vm534_vm1, %v6916_v51, 0.0 }
 0xaaa   :  { %5753 = vpow2.f32 %v3143_v49  ;;  %3154 = vadd.xlane.f32.xlu0 %v3153_v60 }
 0xaab   :  { %v6922_v50 = vpop.eup %5743  ;;  %5755 = vrcp.f32 %v2770_v56 }
 0xaac   :  { %v6924_v28 = vpop.eup %5745  ;;  %5757 = vrcp.f32 %v2767_v36  ;;  %v2776_v39 = vpop.xlane.xlu1 %2775  ;;  %v2786_v5 = vsel %vm534_vm1, %v6922_v50, 0.0 }
 0xaad   :  { %5759 = vrcp.f32 %v2776_v39  ;;  %2787 = vadd.xlane.f32.xlu1 %v2786_v5  ;;  %v2773_v19 = vpop.xlane.xlu0 %2772  ;;  %v2783_v13 = vsel %vm534_vm1, %v6924_v28, 0.0 }
 0xaae   :  { %5761 = vrcp.f32 %v2773_v19  ;;  %2784 = vadd.xlane.f32.xlu0 %v2783_v13 }
 0xaaf   :  { %v6930_v6 = vpop.eup %5747 }
 0xab0   :  { %v6932_v8 = vpop.eup %5749  ;;  %v3162_v27 = vsel %vm534_vm1, %v6930_v6, 0.0 }
 0xab1   :  { %3163 = vadd.xlane.f32.xlu1 %v3162_v27  ;;  %v3159_v16 = vsel %vm534_vm1, %v6932_v8, 0.0  ;;  %v3312_v27 = vld [vmem:[#allocation2 + $0x240] sm:$0xff] }
 0xab2   :  { %3160 = vadd.xlane.f32.xlu0 %v3159_v16  ;;  %v3313_v16 = vld [vmem:[#allocation2 + $0x248] sm:$0xff] }
 0xab3   :  { %v6938_v7 = vpop.eup %5751 }
 0xab4   :  { %v6940_v23 = vpop.eup %5753  ;;  %v3168_v43 = vsel %vm534_vm1, %v6938_v7, 0.0 }
 0xab5   :  { %v5756_v61 = vpop.eup %5755  ;;  %3169 = vadd.xlane.f32.xlu1 %v3168_v43  ;;  %v3165_v11 = vsel %vm534_vm1, %v6940_v23, 0.0 }
 0xab6   :  { %v5758_v9 = vpop.eup %5757  ;;  %3166 = vadd.xlane.f32.xlu0 %v3165_v11  ;;  %v2792_v12 = vmul.f32 %v5756_v61, %v6870_v2  ;;  %v3308_v2 = vld [vmem:[#allocation2 + $0x1c0] sm:$0xff] }
 0xab7   :  { %v5760_v15 = vpop.eup %5759  ;;  %v2790_v53 = vmul.f32 %v5758_v9, %v6872_v37  ;;  %v3309_v37 = vld [vmem:[#allocation2 + $0x1c8] sm:$0xff]  ;;  %v5500_v9 = vpack.c.bf16 %v3313_v16, %v3312_v27 }
 0xab8   :  { %v5762_v1 = vpop.eup %5761  ;;  %v2796_v52 = vmul.f32 %v5760_v15, %v6876_v62  ;;  %v3690_v62 = vld [vmem:[#allocation2 + $0x1e0] sm:$0xff] }
 0xab9   :  { %v5444_v24 = vpack.c.bf16 %v2792_v12, %v2790_v53  ;;  %v2794_v31 = vmul.f32 %v5762_v1, %v6880_v41  ;;  %v3310_v41 = vld [vmem:[#allocation2 + $0x1d0] sm:$0xff] }
 0xaba   :  { %v3314_v1 = vld [vmem:[#allocation2 + $0x250] sm:$0xff] }
 0xabb   :  { %5446 = vmatprep.subr.msk.bf16.mxu0 %vm6463_vm3, %v5444_v24  ;;  %v5450_v3 = vpack.c.bf16 %v2796_v52, %v2794_v31  ;;  %v3315_v52 = vld [vmem:[#allocation2 + $0x258] sm:$0xff]  ;;  %v2554_v31 = vld [vmem:[#allocation2 + $0x290] sm:$0xff] }
 0xabc   :  { %5449 = vmatpush3.bf16.xpose.msk.msra.mxu0 %vm6463_vm3, %v5444_v24  ;;  %v2553_v24 = vld [vmem:[#allocation2 + $0x288] sm:$0xff] }
 0xabd   :  { %5452 = vmatprep.subr.msk.bf16.mxu0 %vm6463_vm3, %v5450_v3 }
 0xac4   :  { %5455 = vmatpush3.bf16.xpose.msk.msra.mxu0 %vm6463_vm3, %v5450_v3  ;;  %v5504_v3 = vpack.c.bf16 %v3315_v52, %v3314_v1 }
 0xae3   :  { %3320 = vxpose.xlu0.b32.start [1/4] (short) (narrow) %v3308_v2, 64  ;;  %v3695_v2 = vld [vmem:[#allocation2 + $0x268] sm:$0xff] }
 0xae7   :  { %3321 = vxpose.xlu0.b32.cont [2/4] (short) (narrow) %v3309_v37, 64 }
 0xae8   :  { %3702 = vxpose.xlu1.b32.start [1/4] (short) (narrow) %v3690_v62, 64  ;;  %v3696_v62 = vld [vmem:[#allocation2 + $0x270] sm:$0xff] }
 0xaeb   :  { %3322 = vxpose.xlu0.b32.cont [3/4] (short) (narrow) %v3310_v41, 64  ;;  %v3697_v41 = vld [vmem:[#allocation2 + $0x278] sm:$0xff] }
 0xaec   :  { %3703 = vxpose.xlu1.b32.cont [2/4] (short) (narrow) %v3691_v33, 64  ;;  %v2935_v33 = vld [vmem:[#allocation2 + $0x2a8] sm:$0xff] }
 0xaef   :  { %3323 = vxpose.xlu0.b32.end [4/4] (short) (narrow) %v3311_v20, 64  ;;  %v2936_v20 = vld [vmem:[#allocation2 + $0x2b0] sm:$0xff] }
 0xaf0   :  { %3704 = vxpose.xlu1.b32.cont [3/4] (short) (narrow) %v3692_v4, 64  ;;  %v5536_v4 = vpack.c.bf16 %v3697_v41, %v3696_v62 }
 0xaf4   :  { %3705 = vxpose.xlu1.b32.end [4/4] (short) (narrow) %v3693_v55, 64  ;;  %v2937_v55 = vld [vmem:[#allocation2 + $0x2b8] sm:$0xff] }
 0xb2e   :  { %v3152_v21 = vpop.xlane.xlu1 %3151 }
 0xb2f   :  { %5763 = vrcp.f32 %v3152_v21  ;;  %v3149_v0 = vpop.xlane.xlu0 %3148 }
 0xb30   :  { %5765 = vrcp.f32 %v3149_v0 }
 0xb32   :  { %v2782_v25 = vpop.xlane.xlu1 %2781 }
 0xb33   :  { %5767 = vrcp.f32 %v2782_v25  ;;  %v2779_v29 = vpop.xlane.xlu0 %2778 }
 0xb34   :  { %5769 = vrcp.f32 %v2779_v29 }
 0xb36   :  { %v3158_v30 = vpop.xlane.xlu1 %3157 }
 0xb37   :  { %5771 = vrcp.f32 %v3158_v30  ;;  %v3155_v40 = vpop.xlane.xlu0 %3154 }
 0xb38   :  { %5773 = vrcp.f32 %v3155_v40 }
 0xb39   :  { %v5764_v59 = vpop.eup %5763 }
 0xb3a   :  { %v5766_v57 = vpop.eup %5765  ;;  %v2788_v44 = vpop.xlane.xlu1 %2787  ;;  %v3174_v47 = vmul.f32 %v5764_v59, %v6894_v18 }
 0xb3b   :  { %5775 = vrcp.f32 %v2788_v44  ;;  %v2785_v26 = vpop.xlane.xlu0 %2784  ;;  %v3172_v10 = vmul.f32 %v5766_v57, %v6896_v22 }
 0xb3c   :  { %5777 = vrcp.f32 %v2785_v26 }
 0xb3d   :  { %v5768_v48 = vpop.eup %5767  ;;  %v5476_v17 = vpack.c.bf16 %v3174_v47, %v3172_v10 }
 0xb3e   :  { %v5770_v34 = vpop.eup %5769  ;;  %v3164_v32 = vpop.xlane.xlu1 %3163  ;;  %v2800_v35 = vmul.f32 %v5768_v48, %v6904_v42 }
 0xb3f   :  { %5779 = vrcp.f32 %v3164_v32  ;;  %5478 = vmatprep.subr.msk.bf16.mxu1 %vm6463_vm3, %v5476_v17  ;;  %v3161_v49 = vpop.xlane.xlu0 %3160  ;;  %v2798_v56 = vmul.f32 %v5770_v34, %v6906_v45  ;;  %v3316_v32 = vld [vmem:[#allocation2 + $0x2c0] sm:$0xff] }
 0xb40   :  { %5781 = vrcp.f32 %v3161_v49  ;;  %5481 = vmatpush3.bf16.xpose.msk.msra.mxu1 %vm6463_vm3, %v5476_v17  ;;  %v3698_v49 = vld [vmem:[#allocation2 + $0x2e0] sm:$0xff] }
 0xb41   :  { %v5772_v18 = vpop.eup %5771  ;;  %v5456_v22 = vpack.c.bf16 %v2800_v35, %v2798_v56 }
 0xb42   :  { %v5774_v63 = vpop.eup %5773  ;;  %v3170_v36 = vpop.xlane.xlu1 %3169  ;;  %v3178_v60 = vmul.f32 %v5772_v18, %v6914_v38 }
 0xb43   :  { %5783 = vrcp.f32 %v3170_v36  ;;  %5458 = vmatprep.subr.msk.bf16.mxu0 %vm6463_vm3, %v5456_v22  ;;  %v3167_v42 = vpop.xlane.xlu0 %3166  ;;  %v3176_v39 = vmul.f32 %v5774_v63, %v6916_v51 }
 0xb44   :  { %5785 = vrcp.f32 %v3167_v42  ;;  %5461 = vmatpush3.bf16.xpose.msk.msra.mxu0 %vm6463_vm3, %v5456_v22 }
 0xb45   :  { %v5776_v45 = vpop.eup %5775  ;;  %v5482_v5 = vpack.c.bf16 %v3178_v60, %v3176_v39 }
 0xb46   :  { %v5778_v19 = vpop.eup %5777  ;;  %v2804_v13 = vmul.f32 %v5776_v45, %v6922_v50 }
 0xb47   :  { %5484 = vmatprep.subr.msk.bf16.mxu1 %vm6463_vm3, %v5482_v5  ;;  %v2802_v38 = vmul.f32 %v5778_v19, %v6924_v28 }
 0xb48   :  { %5487 = vmatpush3.bf16.xpose.msk.msra.mxu1 %vm6463_vm3, %v5482_v5 }
 0xb49   :  { %v5780_v51 = vpop.eup %5779  ;;  %v5462_v43 = vpack.c.bf16 %v2804_v13, %v2802_v38 }
 0xb4a   :  { %v5782_v61 = vpop.eup %5781  ;;  %v3182_v11 = vmul.f32 %v5780_v51, %v6930_v6 }
 0xb4b   :  { %5464 = vmatprep.subr.msk.bf16.mxu0 %vm6463_vm3, %v5462_v43  ;;  %v3180_v50 = vmul.f32 %v5782_v61, %v6932_v8 }
 0xb4c   :  { %5467 = vmatpush3.bf16.xpose.msk.msra.mxu0 %vm6463_vm3, %v5462_v43 }
 0xb4d   :  { %v5784_v28 = vpop.eup %5783  ;;  %5501 = vmatprep.subr.bf16.mxu0 %v5500_v9  ;;  %v5488_v12 = vpack.c.bf16 %v3182_v11, %v3180_v50 }
 0xb4e   :  { %v5786_v15 = vpop.eup %5785  ;;  %v3186_v53 = vmul.f32 %v5784_v28, %v6938_v7  ;;  %v3694_v7 = vld [vmem:[#allocation2 + $0x260] sm:$0xff] }
 0xb4f   :  { %5490 = vmatprep.subr.msk.bf16.mxu1 %vm6463_vm3, %v5488_v12  ;;  %v3184_v6 = vmul.f32 %v5786_v15, %v6940_v23  ;;  %v2555_v23 = vld [vmem:[#allocation2 + $0x298] sm:$0xff]  ;;  %v5532_v37 = vpack.c.bf16 %v3695_v2, %v3694_v7 }
 0xb50   :  { %5493 = vmatpush3.bf16.xpose.msk.msra.mxu1 %vm6463_vm3, %v5488_v12 }
 0xb51   :  { %v5494_v8 = vpack.c.bf16 %v3186_v53, %v3184_v6 }
 0xb53   :  { %5118 = vmatmul.mubr.msk.f32.vlgmr.msra.gmra.mrb[78].mxu0 %vm534_vm1, %v2553_v24  ;;  %5496 = vmatprep.subr.msk.bf16.mxu1 %vm6463_vm3, %v5494_v8 }
 0xb54   :  { %5120 = vmatprep.mubr.msk.f32.mxu0 %vm534_vm1, %v2554_v31  ;;  %5503 = vmatpush3.bf16.msra.mxu0 %v5500_v9 }
 0xb55   :  { %5505 = vmatprep.subr.bf16.mxu0 %v5504_v3 }
 0xb57   :  { %5121 = vmatmul.mubr.msk.f32.gmra.mrb[80].mxu0 %vm534_vm1, %v2555_v23 }
 0xb58   :  { %5499 = vmatpush3.bf16.xpose.msk.msra.mxu1 %vm6463_vm3, %v5494_v8  ;;  %5507 = vmatpush3.bf16.msra.mxu0 %v5504_v3 }
 0xb59   :  { %5533 = vmatprep.subr.bf16.mxu1 %v5532_v37 }
 0xb5f   :  { %5160 = vmatmul.mubr.msk.f32.vlgmr.msra.gmra.mrb[84].mxu1 %vm534_vm1, %v2935_v33 }
 0xb60   :  { %5162 = vmatprep.mubr.msk.f32.mxu1 %vm534_vm1, %v2936_v20  ;;  %5535 = vmatpush3.bf16.msra.mxu1 %v5532_v37 }
 0xb61   :  { %5537 = vmatprep.subr.bf16.mxu1 %v5536_v4 }
 0xb63   :  { %5163 = vmatmul.mubr.msk.f32.gmra.mrb[86].mxu1 %vm534_vm1, %v2937_v55  ;;  %v3336_v21 = vpop.trf.xlu0 }
 0xb64   :  { %5539 = vmatpush3.bf16.msra.mxu1 %v5536_v4  ;;  %5173 = vmatprep.mubr.msk.f32.mxu0 %vm983_vm2, %v3336_v21 }
 0xb67   :  { %v3337_v0 = vpop.trf.xlu0 }
 0xb68   :  { %v3718_v25 = vpop.trf.xlu1  ;;  %5174 = vmatmul.mubr.msk.f32.vlgmr.msra.gmra.mrb[82].mxu0 %vm983_vm2, %v3337_v0 }
 0xb69   :  { %5215 = vmatprep.mubr.msk.f32.mxu1 %vm983_vm2, %v3718_v25  ;;  %v5855_v25 = vmov 0  }
 0xb6a   :  { %5594 = vset.pattern.permute.xlu0 %v5855_v25 }
 0xb6b   :  { %v3338_v29 = vpop.trf.xlu0 }
 0xb6c   :  { %v3719_v30 = vpop.trf.xlu1  ;;  %5176 = vmatprep.mubr.msk.f32.mxu0 %vm983_vm2, %v3338_v29 }
 0xb6d   :  { %5216 = vmatmul.mubr.msk.f32.vlgmr.msra.gmra.mrb[88].mxu1 %vm983_vm2, %v3719_v30 }
 0xb6f   :  { %v3339_v40 = vpop.trf.xlu0 }
 0xb70   :  { %v3720_v59 = vpop.trf.xlu1  ;;  %5177 = vmatmul.mubr.msk.f32.gmra.mrb[84].mxu0 %vm983_vm2, %v3339_v40 }
 0xb71   :  { %5218 = vmatprep.mubr.msk.f32.mxu1 %vm983_vm2, %v3720_v59 }
 0xb73   :  { %v3340_v57 = vpop.trf.xlu0 }
 0xb74   :  { %v3721_v44 = vpop.trf.xlu1  ;;  %5179 = vmatprep.mubr.msk.f32.mxu0 %vm983_vm2, %v3340_v57 }
 0xb75   :  { %5219 = vmatmul.mubr.msk.f32.gmra.mrb[90].mxu1 %vm983_vm2, %v3721_v44 }
 0xb77   :  { %v3341_v47 = vpop.trf.xlu0 }
 0xb78   :  { %v3722_v26 = vpop.trf.xlu1  ;;  %5180 = vmatmul.mubr.msk.f32.gmra.mrb[86].mxu0 %vm983_vm2, %v3341_v47 }
 0xb79   :  { %5221 = vmatprep.mubr.msk.f32.mxu1 %vm983_vm2, %v3722_v26 }
 0xb7b   :  { %v3342_v10 = vpop.trf.xlu0 }
 0xb7c   :  { %v3723_v48 = vpop.trf.xlu1  ;;  %5182 = vmatprep.mubr.msk.f32.mxu0 %vm983_vm2, %v3342_v10 }
 0xb7d   :  { %5222 = vmatmul.mubr.msk.f32.gmra.mrb[92].mxu1 %vm983_vm2, %v3723_v48 }
 0xb7f   :  { %v3343_v17 = vpop.trf.xlu0 }
 0xb80   :  { %v3724_v34 = vpop.trf.xlu1  ;;  %5183 = vmatmul.mubr.msk.f32.gmra.mrb[88].mxu0 %vm983_vm2, %v3343_v17 }
 0xb81   :  { %5201 = vmatprep.mubr.msk.f32.mxu0 %vm534_vm1, %v3316_v32  ;;  %5224 = vmatprep.mubr.msk.f32.mxu1 %vm983_vm2, %v3724_v34 }
 0xb84   :  { %v3725_v35 = vpop.trf.xlu1 }
 0xb85   :  { %5225 = vmatmul.mubr.msk.f32.gmra.mrb[94].mxu1 %vm983_vm2, %v3725_v35 }
 0xb86   :  { %5243 = vmatprep.mubr.msk.f32.mxu1 %vm534_vm1, %v3698_v49 }
 0xc26   :  { %v7018_v56 = vpop.f32.mrb[78].mxu0 }
 0xc27   :  { %v7020_v18 = vpop.f32.mrb[79].mxu0 }
 0xc28   :  { %v5565_v22 = vpack.c.bf16 %v7018_v56, %v7020_v18  ;;  %v3699_v56 = vld [vmem:[#allocation2 + $0x2e8] sm:$0xff]  ;;  %v3701_v18 = vld [vmem:[#allocation2 + $0x2f8] sm:$0xff] }
 0xc2a   :  { %v7024_v63 = vpop.f32.mrb[80].mxu0 }
 0xc2b   :  { %v7026_v36 = vpop.f32.mrb[81].mxu0 }
 0xc2c   :  { %v5568_v60 = vpack.c.bf16 %v7024_v63, %v7026_v36 }
 0xc32   :  { %v7030_v42 = vpop.f32.mrb[84].mxu1 }
 0xc33   :  { %v7032_v39 = vpop.f32.mrb[85].mxu1 }
 0xc34   :  { %v5571_v45 = vpack.c.bf16 %v7030_v42, %v7032_v39 }
 0xc36   :  { %v7036_v5 = vpop.f32.mrb[86].mxu1 }
 0xc37   :  { %v7038_v19 = vpop.f32.mrb[87].mxu1 }
 0xc38   :  { %v5574_v13 = vpack.c.bf16 %v7036_v5, %v7038_v19 }
 0xc3b   :  { %v5175_v38 = vpop.f32.mrb[82].mxu0 }
 0xc3c   :  { %v3442_v27 = vpop.f32.mrb[83].mxu0  ;;  %v3484_v16 = vsel %vm534_vm1, %v5175_v38, -inf }
 0xc3d   :  { %3485 = vmax.xlane.f32.xlu1 %v3484_v16  ;;  %v3481_v51 = vsel %vm534_vm1, %v3442_v27, -inf }
 0xc3e   :  { %3482 = vmax.xlane.f32.xlu0 %v3481_v51 }
 0xc40   :  { %v7044_v43 = vpop.f32.mrb[88].mxu1 }
 0xc41   :  { %v7046_v61 = vpop.f32.mrb[89].mxu1  ;;  %v3866_v12 = vsel %vm534_vm1, %v7044_v43, -inf }
 0xc42   :  { %v3863_v15 = vsel %vm534_vm1, %v7046_v61, -inf }
 0xc43   :  { %v5178_v11 = vpop.f32.mrb[84].mxu0 }
 0xc44   :  { %v3452_v9 = vpop.f32.mrb[85].mxu0  ;;  %v3490_v50 = vsel %vm534_vm1, %v5178_v11, -inf }
 0xc45   :  { %3491 = vmax.xlane.f32.xlu1 %v3490_v50  ;;  %v3487_v28 = vsel %vm534_vm1, %v3452_v9, -inf }
 0xc46   :  { %3488 = vmax.xlane.f32.xlu0 %v3487_v28 }
 0xc48   :  { %v7054_v53 = vpop.f32.mrb[90].mxu1 }
 0xc49   :  { %3867 = vmax.xlane.f32.xlu1 %v3866_v12  ;;  %v7056_v6 = vpop.f32.mrb[91].mxu1  ;;  %v3872_v31 = vsel %vm534_vm1, %v7054_v53, -inf }
 0xc4a   :  { %3864 = vmax.xlane.f32.xlu0 %v3863_v15  ;;  %v3869_v3 = vsel %vm534_vm1, %v7056_v6, -inf }
 0xc4b   :  { %v7058_v1 = vpop.f32.mrb[86].mxu0 }
 0xc4c   :  { %v7060_v52 = vpop.f32.mrb[87].mxu0  ;;  %v3496_v8 = vsel %vm534_vm1, %v7058_v1, -inf }
 0xc4d   :  { %3497 = vmax.xlane.f32.xlu1 %v3496_v8  ;;  %v3493_v24 = vsel %vm534_vm1, %v7060_v52, -inf }
 0xc4e   :  { %3494 = vmax.xlane.f32.xlu0 %v3493_v24 }
 0xc50   :  { %v7070_v7 = vpop.f32.mrb[92].mxu1 }
 0xc51   :  { %3873 = vmax.xlane.f32.xlu1 %v3872_v31  ;;  %v7072_v2 = vpop.f32.mrb[93].mxu1  ;;  %v3878_v33 = vsel %vm534_vm1, %v7070_v7, -inf }
 0xc52   :  { %3870 = vmax.xlane.f32.xlu0 %v3869_v3  ;;  %v3875_v20 = vsel %vm534_vm1, %v7072_v2, -inf }
 0xc53   :  { %v7074_v23 = vpop.f32.mrb[88].mxu0 }
 0xc54   :  { %v7076_v37 = vpop.f32.mrb[89].mxu0  ;;  %v3502_v62 = vsel %vm534_vm1, %v7074_v23, -inf }
 0xc55   :  { %3503 = vmax.xlane.f32.xlu1 %v3502_v62  ;;  %v3499_v41 = vsel %vm534_vm1, %v7076_v37, -inf }
 0xc56   :  { %3500 = vmax.xlane.f32.xlu0 %v3499_v41 }
 0xc58   :  { %v7086_v4 = vpop.f32.mrb[94].mxu1 }
 0xc59   :  { %3879 = vmax.xlane.f32.xlu1 %v3878_v33  ;;  %v7088_v55 = vpop.f32.mrb[95].mxu1  ;;  %v3884_v21 = vsel %vm534_vm1, %v7086_v4, -inf }
 0xc5a   :  { %3876 = vmax.xlane.f32.xlu0 %v3875_v20  ;;  %v3881_v0 = vsel %vm534_vm1, %v7088_v55, -inf }
 0xc5d   :  { %3885 = vmax.xlane.f32.xlu1 %v3884_v21 }
 0xc5e   :  { %3882 = vmax.xlane.f32.xlu0 %v3881_v0 }
 0xcca   :  { %v3486_v29 = vpop.xlane.xlu1 %3485 }
 0xccb   :  { %v3506_v30 = vsub.f32 %v5175_v38, %v3486_v29  ;;  %v3483_v40 = vpop.xlane.xlu0 %3482 }
 0xccc   :  { %v3505_v59 = vsub.f32 %v3442_v27, %v3483_v40 }
 0xccd   :  { %v3515_v57 = vmul.f32 1.442695, %v3506_v30 }
 0xcce   :  { %v3513_v44 = vmul.f32 1.442695, %v3505_v59 }
 0xccf   :  { %5787 = vpow2.f32 %v3515_v57 }
 0xcd0   :  { %5789 = vpow2.f32 %v3513_v44 }
 0xcd2   :  { %v3492_v47 = vpop.xlane.xlu1 %3491 }
 0xcd3   :  { %v3508_v26 = vsub.f32 %v5178_v11, %v3492_v47  ;;  %v3489_v10 = vpop.xlane.xlu0 %3488 }
 0xcd4   :  { %v3507_v48 = vsub.f32 %v3452_v9, %v3489_v10 }
 0xcd5   :  { %v3519_v17 = vmul.f32 1.442695, %v3508_v26 }
 0xcd6   :  { %v3517_v34 = vmul.f32 1.442695, %v3507_v48  ;;  %v3868_v32 = vpop.xlane.xlu1 %3867 }
 0xcd7   :  { %5791 = vpow2.f32 %v3519_v17  ;;  %v3888_v35 = vsub.f32 %v7044_v43, %v3868_v32  ;;  %v3865_v49 = vpop.xlane.xlu0 %3864 }
 0xcd8   :  { %5793 = vpow2.f32 %v3517_v34  ;;  %v3887_v38 = vsub.f32 %v7046_v61, %v3865_v49 }
 0xcd9   :  { %v7096_v16 = vpop.eup %5787  ;;  %v3897_v27 = vmul.f32 1.442695, %v3888_v35 }
 0xcda   :  { %v7098_v51 = vpop.eup %5789  ;;  %v3895_v50 = vmul.f32 1.442695, %v3887_v38  ;;  %v3498_v28 = vpop.xlane.xlu1 %3497  ;;  %v3532_v11 = vsel %vm534_vm1, %v7096_v16, 0.0 }
 0xcdb   :  { %5795 = vpow2.f32 %v3897_v27  ;;  %v3510_v9 = vsub.f32 %v7058_v1, %v3498_v28  ;;  %3533 = vadd.xlane.f32.xlu1 %v3532_v11  ;;  %v3495_v12 = vpop.xlane.xlu0 %3494  ;;  %v3529_v43 = vsel %vm534_vm1, %v7098_v51, 0.0 }
 0xcdc   :  { %5797 = vpow2.f32 %v3895_v50  ;;  %v3509_v61 = vsub.f32 %v7060_v52, %v3495_v12  ;;  %3530 = vadd.xlane.f32.xlu0 %v3529_v43 }
 0xcdd   :  { %v3523_v15 = vmul.f32 1.442695, %v3510_v9 }
 0xcde   :  { %v3521_v8 = vmul.f32 1.442695, %v3509_v61  ;;  %v3874_v24 = vpop.xlane.xlu1 %3873 }
 0xcdf   :  { %5799 = vpow2.f32 %v3523_v15  ;;  %v3890_v31 = vsub.f32 %v7054_v53, %v3874_v24  ;;  %v3871_v3 = vpop.xlane.xlu0 %3870 }
 0xce0   :  { %5801 = vpow2.f32 %v3521_v8  ;;  %v3889_v62 = vsub.f32 %v7056_v6, %v3871_v3 }
 0xce1   :  { %v7108_v1 = vpop.eup %5791  ;;  %v3901_v41 = vmul.f32 1.442695, %v3890_v31 }
 0xce2   :  { %v7110_v33 = vpop.eup %5793  ;;  %v3899_v20 = vmul.f32 1.442695, %v3889_v62  ;;  %v3504_v21 = vpop.xlane.xlu1 %3503  ;;  %v3538_v52 = vsel %vm534_vm1, %v7108_v1, 0.0 }
 0xce3   :  { %5803 = vpow2.f32 %v3901_v41  ;;  %v3512_v0 = vsub.f32 %v7074_v23, %v3504_v21  ;;  %3539 = vadd.xlane.f32.xlu1 %v3538_v52  ;;  %v3501_v25 = vpop.xlane.xlu0 %3500  ;;  %v3535_v53 = vsel %vm534_vm1, %v7110_v33, 0.0  ;;  %v82_v21 = vld [vmem:[%s7264_s3] sm:$0xff] }
 0xce4   :  { %5805 = vpow2.f32 %v3899_v20  ;;  %v3511_v6 = vsub.f32 %v7076_v37, %v3501_v25  ;;  %3536 = vadd.xlane.f32.xlu0 %v3535_v53 }
 0xce5   :  { %v7118_v29 = vpop.eup %5795  ;;  %v3527_v30 = vmul.f32 1.442695, %v3512_v0 }
 0xce6   :  { %v7120_v40 = vpop.eup %5797  ;;  %v3525_v59 = vmul.f32 1.442695, %v3511_v6  ;;  %v3880_v57 = vpop.xlane.xlu1 %3879  ;;  %v3914_v44 = vsel %vm534_vm1, %v7118_v29, 0.0 }
 0xce7   :  { %5807 = vpow2.f32 %v3527_v30  ;;  %v3892_v23 = vsub.f32 %v7070_v7, %v3880_v57  ;;  %3915 = vadd.xlane.f32.xlu1 %v3914_v44  ;;  %v3877_v47 = vpop.xlane.xlu0 %3876  ;;  %v3911_v26 = vsel %vm534_vm1, %v7120_v40, 0.0 }
 0xce8   :  { %5809 = vpow2.f32 %v3525_v59  ;;  %v3891_v37 = vsub.f32 %v7072_v2, %v3877_v47  ;;  %3912 = vadd.xlane.f32.xlu0 %v3911_v26 }
 0xce9   :  { %v7128_v10 = vpop.eup %5799  ;;  %v3905_v48 = vmul.f32 1.442695, %v3892_v23 }
 0xcea   :  { %v7130_v17 = vpop.eup %5801  ;;  %v3903_v34 = vmul.f32 1.442695, %v3891_v37  ;;  %v3886_v32 = vpop.xlane.xlu1 %3885  ;;  %v3544_v35 = vsel %vm534_vm1, %v7128_v10, 0.0 }
 0xceb   :  { %5811 = vpow2.f32 %v3905_v48  ;;  %v3894_v7 = vsub.f32 %v7086_v4, %v3886_v32  ;;  %3545 = vadd.xlane.f32.xlu1 %v3544_v35  ;;  %v3883_v49 = vpop.xlane.xlu0 %3882  ;;  %v3541_v38 = vsel %vm534_vm1, %v7130_v17, 0.0 }
 0xcec   :  { %5813 = vpow2.f32 %v3903_v34  ;;  %v3893_v2 = vsub.f32 %v7088_v55, %v3883_v49  ;;  %3542 = vadd.xlane.f32.xlu0 %v3541_v38 }
 0xced   :  { %v7138_v27 = vpop.eup %5803  ;;  %v3909_v50 = vmul.f32 1.442695, %v3894_v7 }
 0xcee   :  { %v7140_v28 = vpop.eup %5805  ;;  %v3907_v11 = vmul.f32 1.442695, %v3893_v2  ;;  %v3920_v9 = vsel %vm534_vm1, %v7138_v27, 0.0 }
 0xcef   :  { %5815 = vpow2.f32 %v3909_v50  ;;  %3921 = vadd.xlane.f32.xlu1 %v3920_v9  ;;  %v3917_v4 = vsel %vm534_vm1, %v7140_v28, 0.0 }
 0xcf0   :  { %5817 = vpow2.f32 %v3907_v11  ;;  %3918 = vadd.xlane.f32.xlu0 %v3917_v4 }
 0xcf1   :  { %v7146_v12 = vpop.eup %5807 }
 0xcf2   :  { %v7148_v55 = vpop.eup %5809  ;;  %v3550_v43 = vsel %vm534_vm1, %v7146_v12, 0.0 }
 0xcf3   :  { %3551 = vadd.xlane.f32.xlu1 %v3550_v43  ;;  %v3547_v61 = vsel %vm534_vm1, %v7148_v55, 0.0 }
 0xcf4   :  { %3548 = vadd.xlane.f32.xlu0 %v3547_v61 }
 0xcf5   :  { %v7154_v15 = vpop.eup %5811 }
 0xcf6   :  { %v7156_v8 = vpop.eup %5813  ;;  %v3926_v24 = vsel %vm534_vm1, %v7154_v15, 0.0 }
 0xcf7   :  { %3927 = vadd.xlane.f32.xlu1 %v3926_v24  ;;  %v3923_v31 = vsel %vm534_vm1, %v7156_v8, 0.0 }
 0xcf8   :  { %3924 = vadd.xlane.f32.xlu0 %v3923_v31 }
 0xcf9   :  { %v7162_v3 = vpop.eup %5815 }
 0xcfa   :  { %v7164_v62 = vpop.eup %5817  ;;  %v3932_v41 = vsel %vm534_vm1, %v7162_v3, 0.0 }
 0xcfb   :  { %3933 = vadd.xlane.f32.xlu1 %v3932_v41  ;;  %v3929_v20 = vsel %vm534_vm1, %v7164_v62, 0.0 }
 0xcfc   :  { %3930 = vadd.xlane.f32.xlu0 %v3929_v20 }
 0xd12   :  { %2470 = vperm.xlu0 %5594, %v82_v21  }
 0xd68   :  { %v3534_v52 = vpop.xlane.xlu1 %3533 }
 0xd69   :  { %5819 = vrcp.f32 %v3534_v52  ;;  %v3531_v0 = vpop.xlane.xlu0 %3530 }
 0xd6a   :  { %5821 = vrcp.f32 %v3531_v0 }
 0xd70   :  { %v3540_v25 = vpop.xlane.xlu1 %3539 }
 0xd71   :  { %5823 = vrcp.f32 %v3540_v25  ;;  %v3537_v53 = vpop.xlane.xlu0 %3536 }
 0xd72   :  { %5825 = vrcp.f32 %v3537_v53 }
 0xd73   :  { %v5820_v6 = vpop.eup %5819 }
 0xd74   :  { %v5822_v30 = vpop.eup %5821  ;;  %v3916_v59 = vpop.xlane.xlu1 %3915  ;;  %v3556_v57 = vmul.f32 %v5820_v6, %v7096_v16 }
 0xd75   :  { %5827 = vrcp.f32 %v3916_v59  ;;  %v3913_v44 = vpop.xlane.xlu0 %3912  ;;  %v3554_v23 = vmul.f32 %v5822_v30, %v7098_v51 }
 0xd76   :  { %5829 = vrcp.f32 %v3913_v44 }
 0xd77   :  { %v5508_v47 = vpack.c.bf16 %v3556_v57, %v3554_v23 }
 0xd78   :  { %v3546_v26 = vpop.xlane.xlu1 %3545 }
 0xd79   :  { %5831 = vrcp.f32 %v3546_v26  ;;  %5510 = vmatprep.subr.msk.bf16.mxu0 %vm6463_vm3, %v5508_v47  ;;  %v3543_v37 = vpop.xlane.xlu0 %3542  ;;  %v3317_v26 = vld [vmem:[#allocation2 + $0x2c8] sm:$0xff] }
 0xd7a   :  { %5833 = vrcp.f32 %v3543_v37  ;;  %5513 = vmatpush3.bf16.xpose.msk.msra.mxu0 %vm6463_vm3, %v5508_v47  ;;  %v3318_v37 = vld [vmem:[#allocation2 + $0x2d0] sm:$0xff] }
 0xd7b   :  { %v5824_v48 = vpop.eup %5823 }
 0xd7c   :  { %v5826_v34 = vpop.eup %5825  ;;  %v3922_v32 = vpop.xlane.xlu1 %3921  ;;  %v3560_v16 = vmul.f32 %v5824_v48, %v7108_v1  ;;  %v5851_v48 = vld [vmem:[%s7263_s2] sm:$0xff] }
 0xd7d   :  { %5835 = vrcp.f32 %v3922_v32  ;;  %v3919_v35 = vpop.xlane.xlu0 %3918  ;;  %v3558_v51 = vmul.f32 %v5826_v34, %v7110_v33 }
 0xd7e   :  { %5837 = vrcp.f32 %v3919_v35 }
 0xd7f   :  { %v5828_v7 = vpop.eup %5827  ;;  %v5514_v49 = vpack.c.bf16 %v3560_v16, %v3558_v51 }
 0xd80   :  { %v5830_v38 = vpop.eup %5829  ;;  %v3552_v2 = vpop.xlane.xlu1 %3551  ;;  %v3938_v50 = vmul.f32 %v5828_v7, %v7118_v29 }
 0xd81   :  { %5839 = vrcp.f32 %v3552_v2  ;;  %5516 = vmatprep.subr.msk.bf16.mxu0 %vm6463_vm3, %v5514_v49  ;;  %v3549_v11 = vpop.xlane.xlu0 %3548  ;;  %v3936_v9 = vmul.f32 %v5830_v38, %v7120_v40 }
 0xd82   :  { %5841 = vrcp.f32 %v3549_v11  ;;  %5519 = vmatpush3.bf16.xpose.msk.msra.mxu0 %vm6463_vm3, %v5514_v49 }
 0xd83   :  { %v5832_v1 = vpop.eup %5831  ;;  %v5540_v33 = vpack.c.bf16 %v3938_v50, %v3936_v9 }
 0xd84   :  { %v5834_v4 = vpop.eup %5833  ;;  %v3928_v43 = vpop.xlane.xlu1 %3927  ;;  %v3564_v61 = vmul.f32 %v5832_v1, %v7128_v10 }
 0xd85   :  { %5843 = vrcp.f32 %v3928_v43  ;;  %5542 = vmatprep.subr.msk.bf16.mxu1 %vm6463_vm3, %v5540_v33  ;;  %v3925_v29 = vpop.xlane.xlu0 %3924  ;;  %v3562_v24 = vmul.f32 %v5834_v4, %v7130_v17 }
 0xd86   :  { %5845 = vrcp.f32 %v3925_v29  ;;  %5545 = vmatpush3.bf16.xpose.msk.msra.mxu1 %vm6463_vm3, %v5540_v33 }
 0xd87   :  { %v5836_v40 = vpop.eup %5835  ;;  %v5520_v31 = vpack.c.bf16 %v3564_v61, %v3562_v24 }
 0xd88   :  { %v5838_v41 = vpop.eup %5837  ;;  %v3934_v20 = vpop.xlane.xlu1 %3933  ;;  %v3942_v21 = vmul.f32 %v5836_v40, %v7138_v27 }
 0xd89   :  { %5847 = vrcp.f32 %v3934_v20  ;;  %5522 = vmatprep.subr.msk.bf16.mxu0 %vm6463_vm3, %v5520_v31  ;;  %v3931_v10 = vpop.xlane.xlu0 %3930  ;;  %v3940_v52 = vmul.f32 %v5838_v41, %v7140_v28 }
 0xd8a   :  { %5849 = vrcp.f32 %v3931_v10  ;;  %5525 = vmatpush3.bf16.xpose.msk.msra.mxu0 %vm6463_vm3, %v5520_v31 }
 0xd8b   :  { %v5840_v17 = vpop.eup %5839  ;;  %v5546_v0 = vpack.c.bf16 %v3942_v21, %v3940_v52 }
 0xd8c   :  { %v5842_v25 = vpop.eup %5841  ;;  %v3568_v53 = vmul.f32 %v5840_v17, %v7146_v12 }
 0xd8d   :  { %5548 = vmatprep.subr.msk.bf16.mxu1 %vm6463_vm3, %v5546_v0  ;;  %v3566_v27 = vmul.f32 %v5842_v25, %v7148_v55 }
 0xd8e   :  { %5551 = vmatpush3.bf16.xpose.msk.msra.mxu1 %vm6463_vm3, %v5546_v0 }
 0xd8f   :  { %v5844_v6 = vpop.eup %5843  ;;  %v5526_v30 = vpack.c.bf16 %v3568_v53, %v3566_v27 }
 0xd90   :  { %v5846_v28 = vpop.eup %5845  ;;  %v3946_v59 = vmul.f32 %v5844_v6, %v7154_v15 }
 0xd91   :  { %5528 = vmatprep.subr.msk.bf16.mxu0 %vm6463_vm3, %v5526_v30  ;;  %v2471_v57 = vpop.permute.xlu0 %2470  ;;  %v3944_v44 = vmul.f32 %v5846_v28, %v7156_v8 }
 0xd92   :  { %v2540_v12 = vadd.f32 %v6828_v58, %v2471_v57  ;;  %5531 = vmatpush3.bf16.xpose.msk.msra.mxu0 %vm6463_vm3, %v5526_v30 }
 0xd93   :  { %v5848_v55 = vpop.eup %5847  ;;  %v5552_v23 = vpack.c.bf16 %v3946_v59, %v3944_v44  ;;  %5564 = vmatprep.subr.bf16.mxu0 %v5852_v54 }
 0xd94   :  { %v5850_v47 = vpop.eup %5849  ;;  %2543 = vst.msk [vmem:[%s7265_s4] sm:$0xff] %vm534_vm1, %v2540_v12  ;;  %v3950_v15 = vmul.f32 %v5848_v55, %v7162_v3  ;;  %v3319_v3 = vld [vmem:[#allocation2 + $0x2d8] sm:$0xff] }
 0xd95   :  { %5554 = vmatprep.subr.msk.bf16.mxu1 %vm6463_vm3, %v5552_v23  ;;  %v3948_v58 = vmul.f32 %v5850_v47, %v7164_v62 }
 0xd96   :  { %5557 = vmatpush3.bf16.xpose.msk.msra.mxu1 %vm6463_vm3, %v5552_v23 }
 0xd97   :  { %v5558_v8 = vpack.c.bf16 %v3950_v15, %v3948_v58 }
 0xd99   :  { %5202 = vmatmul.mubr.msk.f32.vlgmr.msra.gmra.mrb[90].mxu0 %vm534_vm1, %v3317_v26  ;;  %5560 = vmatprep.subr.msk.bf16.mxu1 %vm6463_vm3, %v5558_v8 }
 0xd9a   :  { %5204 = vmatprep.mubr.msk.f32.mxu0 %vm534_vm1, %v3318_v37  ;;  %5566 = vmatpush3.bf16.msra.mxu0 %v5565_v22 }
 0xd9b   :  { %5567 = vmatprep.subr.bf16.mxu0 %v5852_v54 }
 0xd9d   :  { %5205 = vmatmul.mubr.msk.f32.gmra.mrb[92].mxu0 %vm534_vm1, %v3319_v3 }
 0xd9e   :  { %5563 = vmatpush3.bf16.xpose.msk.msra.mxu1 %vm6463_vm3, %v5558_v8  ;;  %5569 = vmatpush3.bf16.msra.mxu0 %v5568_v60 }
 0xd9f   :  { %5570 = vmatprep.subr.bf16.mxu0 %v5852_v54  ;;  %5281 = vmatprep.mubr.msk.f32.mxu0 %vm5853_vm4, %v5854_v14 }
 0xda2   :  { %5572 = vmatpush3.bf16.msra.mxu0 %v5571_v45 }
 0xda3   :  { %5573 = vmatprep.subr.bf16.mxu0 %v5852_v54 }
 0xda5   :  { %5244 = vmatmul.mubr.msk.f32.vlgmr.msra.gmra.mrb[96].mxu1 %vm534_vm1, %v3699_v56 }
 0xda6   :  { %5246 = vmatprep.mubr.msk.f32.mxu1 %vm534_vm1, %v3700_v46  ;;  %5575 = vmatpush3.bf16.msra.mxu0 %v5574_v13 }
 0xda7   :  { %5576 = vmatprep.subr.bf16.mxu0 %v5852_v54 }
 0xda9   :  { %5247 = vmatmul.mubr.msk.f32.gmra.mrb[98].mxu1 %vm534_vm1, %v3701_v18 }
 0xe6c   :  { %v5203_v14 = vpop.f32.mrb[90].mxu0 }
 0xe6d   :  { %v3671_v22 = vpop.f32.mrb[91].mxu0 }
 0xe6e   :  { %v5577_v63 = vpack.c.bf16 %v5203_v14, %v3671_v22 }
 0xe70   :  { %v5206_v36 = vpop.f32.mrb[92].mxu0  ;;  %5578 = vmatpush3.bf16.msra.mxu0 %v5577_v63 }
 0xe71   :  { %v3681_v60 = vpop.f32.mrb[93].mxu0  ;;  %5579 = vmatprep.subr.bf16.mxu0 %v5852_v54 }
 0xe72   :  { %v5580_v42 = vpack.c.bf16 %v5206_v36, %v3681_v60 }
 0xe74   :  { %5581 = vmatpush3.bf16.msra.mxu0 %v5580_v42 }
 0xe75   :  { %5582 = vmatprep.subr.bf16.mxu0 %v5852_v54 }
 0xe78   :  { %v5245_v39 = vpop.f32.mrb[96].mxu1 }
 0xe79   :  { %v4053_v45 = vpop.f32.mrb[97].mxu1 }
 0xe7a   :  { %v5583_v5 = vpack.c.bf16 %v5245_v39, %v4053_v45 }
 0xe7c   :  { %v5248_v19 = vpop.f32.mrb[98].mxu1  ;;  %5584 = vmatpush3.bf16.msra.mxu0 %v5583_v5 }
 0xe7d   :  { %v4063_v13 = vpop.f32.mrb[99].mxu1  ;;  %5585 = vmatprep.subr.bf16.mxu0 %v5852_v54 }
 0xe7e   :  { %v5586_v62 = vpack.c.bf16 %v5248_v19, %v4063_v13 }
 0xe80   :  { %5587 = vmatpush3.bf16.msra.mxu0 %v5586_v62 }
 0xe83   :  { %5282 = vmatmul.mubr.f32.vlgmr.msra.gmra.mrb[94].mxu0 %v5851_v48 }
 0xf56   :  { %v4138_v34 = vpop.f32.mrb[94].mxu0 }
 0xf57   :  { %v4139_v32 = vadd.f32 %v4138_v34, %v2471_v57  ;;  %v5283_v16 = vpop.f32.mrb[95].mxu0 }
 0xf59   :  { %4405 = vst.msk [vmem:[%s7265_s4 + $0x8] sm:$0xff] %vm534_vm1, %v4139_v32 }

</bundles_post_ra>
